<compile_context>
chip_gen: v7x
topology: tpu7x:2x2x1
jax: 0.10.0
libtpu: 0.0.40
codegen_flags: <defaults>
</compile_context>

<pallas_src>
import functools
import math

import jax
import jax.numpy as jnp
import numpy as np
from jax.experimental import pallas as pl
from jax.experimental.pallas import tpu as pltpu

_EPS = 1e-5

_COMPILER_PARAMS = pltpu.CompilerParams(
    dimension_semantics=("parallel",),
    # <= v7x's 64 MiB physical VMEM per TensorCore; ample headroom on v5e/v6e (128 MiB).
    vmem_limit_bytes=48 * 1024 * 1024,
)


# ---------------------------------------------------------------------------
# Pallas kernels
# ---------------------------------------------------------------------------
def _fused_layer_kernel(x_ref, scale_ref, shift_ref, w_ref, y_ref, s1_ref, s2_ref,
                        *, apply_relu):
    """y = act(x * scale + shift) @ W ; also emit per-tile column sum / sum-of-squares."""
    x = x_ref[...].astype(jnp.float32)
    h = x * scale_ref[...] + shift_ref[...]            # previous layer's BN folded in (f32)
    if apply_relu:
        h = jnp.maximum(h, 0.0)
    w = w_ref[...]
    # bf16 x bf16 -> f32 accumulate on the MXU (f32 weights -> exact-mode validation path).
    y = jnp.dot(h.astype(w.dtype), w, preferred_element_type=jnp.float32)
    y_ref[...] = y.astype(y_ref.dtype)
    # Direct sub-block stores for the BN partial stats (no concat/reshape copies).
    # NOTE: if the VALU ever saturates, these column reductions can move to the MXU via a
    # (1, TR) ones-vector matmul; not needed while the layers are HBM-bound.
    s1_ref[0] = jnp.sum(y, axis=0, keepdims=True)       # (1, C)
    s2_ref[0] = jnp.sum(y * y, axis=0, keepdims=True)   # (1, C)


def _final_kernel(ss_ref, x_ref, xt_ref, o_ref):
    """dec3 BN(1ch) + ReLU + symmetrize + per-sample min/max normalize (batched samples)."""
    scale = ss_ref[:, 0:1]                               # (1, 1) -> broadcast
    shift = ss_ref[:, 1:2]
    z = jnp.maximum(x_ref[...].astype(jnp.float32) * scale + shift, 0.0)    # (NB, H, W)
    zt = jnp.maximum(xt_ref[...].astype(jnp.float32) * scale + shift, 0.0)  # transposed planes
    s = 0.5 * (z + zt)                                   # symmetrize
    vmax = jnp.max(jnp.max(s, axis=2, keepdims=True), axis=1, keepdims=True)
    vmin = jnp.min(jnp.min(s, axis=2, keepdims=True), axis=1, keepdims=True)
    inv = pl.reciprocal(vmax - vmin, approx=False)       # one EUP reciprocal per sample
    o_ref[...] = (s - vmin) * inv                        # VPU multiply instead of divide


# ---------------------------------------------------------------------------
# Tiling helpers
# ---------------------------------------------------------------------------
def _pick_group(rows, gmax):
    """Largest power-of-two group size <= gmax that divides `rows`."""
    g = gmax
    while g > 1 and rows % g:
        g //= 2
    return g


def _pick_row_tile(rows, k, c, *, budget_bytes=16 * 1024 * 1024):
    """Largest multiple-of-8 divisor of `rows` whose double-buffered working set
    (bf16 x/y I/O + f32 in-kernel temps) fits the per-step VMEM budget.  Keeps >= 2
    grid steps when possible (pipelining + v7x 2-TensorCore sharding)."""
    if rows <= 8:
        return rows
    per_row = 8 * (k + c)                 # ~2x bf16 dbl-buffered I/O + f32 temps per row
    cap = max(8, budget_bytes // per_row)
    cap = min(cap, max(8, rows // 2), rows)
    best = 0
    for tr in range(8, cap + 1, 8):
        if rows % tr == 0:
            best = tr
    if best:
        return best
    # TODO(synk): pad rows + mask the tail tile for shapes with no multiple-of-8 divisor;
    # currently falls back to a single whole-array block (always valid, just unpipelined).
    return rows


# ---------------------------------------------------------------------------
# Pallas wrappers
# ---------------------------------------------------------------------------
def fused_layer(x, scale, shift, w, *, apply_relu=True, out_dtype=None):
    """act(x*scale+shift) @ w, row-tiled; returns (y, per-column [sum, sum_sq])."""
    R, K = x.shape
    C = w.shape[1]
    out_dtype = out_dtype or x.dtype
    tr = _pick_row_tile(R, K, C)
    nt = R // tr
    kernel = functools.partial(_fused_layer_kernel, apply_relu=apply_relu)
    y, s1, s2 = pl.pallas_call(
        kernel,
        grid=(nt,),
        in_specs=[
            pl.BlockSpec((tr, K), lambda i: (i, 0)),
            pl.BlockSpec((1, K), lambda i: (0, 0)),
            pl.BlockSpec((1, K), lambda i: (0, 0)),
            pl.BlockSpec((K, C), lambda i: (0, 0)),
        ],
        out_specs=[
            pl.BlockSpec((tr, C), lambda i: (i, 0)),
            pl.BlockSpec((1, 1, C), lambda i: (i, 0, 0)),
            pl.BlockSpec((1, 1, C), lambda i: (i, 0, 0)),
        ],
        out_shape=[
            jax.ShapeDtypeStruct((R, C), out_dtype),
            jax.ShapeDtypeStruct((nt, 1, C), jnp.float32),
            jax.ShapeDtypeStruct((nt, 1, C), jnp.float32),
        ],
        compiler_params=_COMPILER_PARAMS,
    )(x,
      scale.reshape(1, K).astype(jnp.float32),
      shift.reshape(1, K).astype(jnp.float32),
      w)
    stats = jnp.stack([jnp.sum(s1.reshape(nt, C), axis=0),
                       jnp.sum(s2.reshape(nt, C), axis=0)])   # (2, C)
    return y, stats


def final_sym_norm(plane, plane_t, scale, shift, *, vmem_budget=8 * 1024 * 1024):
    """Fused dec3-BN + ReLU + symmetrize + per-sample min/max normalize."""
    N, H, W = plane.shape
    # Per-sample bytes: 2 (double-buffered) inputs + f32 temps + f32 output.
    per_sample = H * W * (4 * plane.dtype.itemsize + 3 * 4)
    nb = max(1, min(N, vmem_budget // max(1, per_sample)))
    nb = math.gcd(N, nb)
    # TODO(synk): add a two-pass (partial min/max, then normalize) path for planes too
    # large to hold (nb, H, W) blocks in VMEM.
    ss = jnp.stack([scale, shift]).reshape(1, 2).astype(jnp.float32)
    return pl.pallas_call(
        _final_kernel,
        grid=(N // nb,),
        in_specs=[
            pl.BlockSpec((1, 2), lambda i: (0, 0)),
            pl.BlockSpec((nb, H, W), lambda i: (i, 0, 0)),
            pl.BlockSpec((nb, H, W), lambda i: (i, 0, 0)),
        ],
        out_specs=pl.BlockSpec((nb, H, W), lambda i: (i, 0, 0)),
        out_shape=jax.ShapeDtypeStruct((N, H, W), jnp.float32),
        compiler_params=_COMPILER_PARAMS,
    )(ss, plane, plane_t)


# ---------------------------------------------------------------------------
# Training-mode BatchNorm folded into a per-channel affine (applied in the next kernel)
# ---------------------------------------------------------------------------
def _bn_affine(stats, count, gamma, beta):
    mean = stats[0] / count
    var = jnp.maximum(stats[1] / count - mean * mean, 0.0)    # biased variance
    inv = jax.lax.rsqrt(var + _EPS)
    scale = gamma * inv
    shift = beta - mean * scale
    return scale, shift


# ---------------------------------------------------------------------------
# Forward pass
# ---------------------------------------------------------------------------
def autoencoder_forward(x_nchw, params, *, act_dtype=jnp.bfloat16):
    N, Cin, H, W = x_nchw.shape
    assert Cin == 1 and H == W and H % 8 == 0
    H3, W3 = H // 8, W // 8
    nhw = N * H * W

    # ---- hierarchical (space-to-depth^3) reorder of the 1-channel input (tiny, one-time) --
    # pixel (n, 8h3+4a2+2a1+a0, 8w3+4b2+2b1+b0) -> flat order (n,h3,w3,a2,b2,a1,b1,a0,b0)
    x9 = x_nchw.reshape(N, H3, 2, 2, 2, W3, 2, 2, 2)          # n h3 a2 a1 a0 w3 b2 b1 b0
    xh = x9.transpose(0, 1, 5, 2, 6, 3, 7, 4, 8).reshape(-1)

    # ---- lane-widening group sizes for the narrow layers ----
    g1 = _pick_group(nhw // 4, 32)     # enc1: 32-ch  -> 32*g1 lanes
    g3 = _pick_group(nhw // 64, 8)     # enc3/dec1: 16-ch bottleneck -> 16*g3 (=128) lanes
    g6 = _pick_group(nhw // 4, 32)     # dec3: 4-col  -> 4*g6 lanes

    # ---- weights in matmul form (tiny); block-diagonal widening + act-dtype cast ----
    w1 = params["enc1"]["w"].transpose(2, 3, 1, 0).reshape(4 * 1, 32)     # rows=(kh,kw,ci)
    w2 = params["enc2"]["w"].transpose(2, 3, 1, 0).reshape(4 * 32, 128)
    w3 = params["enc3"]["w"].transpose(2, 3, 1, 0).reshape(4 * 128, 16)
    w4 = params["dec1"]["w"].transpose(0, 2, 3, 1).reshape(16, 4 * 128)   # cols=(kh,kw,co)
    w5 = params["dec2"]["w"].transpose(0, 2, 3, 1).reshape(128, 4 * 32)
    w6 = params["dec3"]["w"].transpose(0, 2, 3, 1).reshape(32, 4 * 1)

    w1_bd = jnp.kron(jnp.eye(g1, dtype=w1.dtype), w1).astype(act_dtype)   # (4*g1, 32*g1)
    w3_bd = jnp.kron(jnp.eye(g3, dtype=w3.dtype), w3).astype(act_dtype)   # (512*g3, 16*g3)
    w4_bd = jnp.kron(jnp.eye(g3, dtype=w4.dtype), w4).astype(act_dtype)   # (16*g3, 512*g3)
    w6_bd = jnp.kron(jnp.eye(g6, dtype=w6.dtype), w6).astype(act_dtype)   # (32*g6, 4*g6)
    w2 = w2.astype(act_dtype)
    w5 = w5.astype(act_dtype)

    ones = lambda k: jnp.ones((k,), jnp.float32)
    zeros = lambda k: jnp.zeros((k,), jnp.float32)

    # ---- enc1: Conv 1->32 (bias dropped; BN1+ReLU applied inside enc2's kernel) ----
    x0 = xh.reshape(nhw // (4 * g1), 4 * g1).astype(act_dtype)
    y1, st1 = fused_layer(x0, ones(4 * g1), zeros(4 * g1), w1_bd, apply_relu=False)
    st1 = st1.reshape(2, g1, 32).sum(axis=1)
    sc1, sh1 = _bn_affine(st1, N * (H // 2) * (W // 2),
                          params["enc1"]["gamma"], params["enc1"]["beta"])

    # ---- enc2: BN1+ReLU+Conv 32->128 ----
    x1 = y1.reshape(nhw // 16, 128)                 # free reshape: rows=(n,h3,w3,a2,b2)
    y2, st2 = fused_layer(x1, jnp.tile(sc1, 4), jnp.tile(sh1, 4), w2)
    sc2, sh2 = _bn_affine(st2, N * (H // 4) * (W // 4),
                          params["enc2"]["gamma"], params["enc2"]["beta"])

    # ---- enc3: BN2+ReLU+Conv 128->16, lane-widened so the output is 16*g3 (=128) dense ----
    x2 = y2.reshape(nhw // (64 * g3), 512 * g3)     # free reshape: rows group g3 positions
    y3, st3 = fused_layer(x2, jnp.tile(sc2, 4 * g3), jnp.tile(sh2, 4 * g3), w3_bd)
    st3 = st3.reshape(2, g3, 16).sum(axis=1)
    sc3, sh3 = _bn_affine(st3, N * (H // 8) * (W // 8),
                          params["enc3"]["gamma"], params["enc3"]["beta"])

    # ---- dec1: BN3+ReLU+ConvT 16->128, same widening (contraction dim 16*g3 = 128) ----
    y4, st4 = fused_layer(y3, jnp.tile(sc3, g3), jnp.tile(sh3, g3), w4_bd)
    st4 = st4.reshape(2, g3 * 4, 128).sum(axis=1)
    sc4, sh4 = _bn_affine(st4, N * (H // 4) * (W // 4),
                          params["dec1"]["gamma"], params["dec1"]["beta"])

    # ---- dec2: BN4+ReLU+ConvT 128->32 ----
    x4 = y4.reshape(nhw // 16, 128)
    y5, st5 = fused_layer(x4, sc4, sh4, w5)
    st5 = st5.reshape(2, 4, 32).sum(axis=1)
    sc5, sh5 = _bn_affine(st5, N * (H // 2) * (W // 2),
                          params["dec2"]["gamma"], params["dec2"]["beta"])

    # ---- dec3: BN5+ReLU+ConvT 32->1, lane-widened so the output is 4*g6 (=128) dense ----
    x5 = y5.reshape(nhw // (4 * g6), 32 * g6)
    y6, st6 = fused_layer(x5, jnp.tile(sc5, g6), jnp.tile(sh5, g6), w6_bd)
    st6 = st6.sum(axis=1)                                      # single channel
    sc6, sh6 = _bn_affine(st6, nhw, params["dec3"]["gamma"], params["dec3"]["beta"])
    sc6 = sc6.reshape(())
    sh6 = sh6.reshape(())

    # ---- un-hierarchize the 1-channel output into (N,H,W) planes (+ transposed planes) ----
    # Planes stay in act_dtype (bf16) so the transpose round-trip traffic is halved.
    # (An in-kernel (H,W) XLU transpose would save the plane_t round-trip entirely; kept as
    #  an XLA transpose here for robust lowering at arbitrary H,W.)
    y6f = y6.reshape(N, H3, W3, 2, 2, 2, 2, 2, 2)
    #               n  h3  w3 a2 b2 a1 b1 a0 b0
    plane = y6f.transpose(0, 1, 3, 5, 7, 2, 4, 6, 8).reshape(N, H, W)
    plane_t = y6f.transpose(0, 2, 4, 6, 8, 1, 3, 5, 7).reshape(N, W, H)

    # ---- fused dec3-BN + ReLU + symmetrize + per-sample min/max normalize ----
    out = final_sym_norm(plane, plane_t, sc6, sh6)
    return out.reshape(N, 1, H, W)


# ---------------------------------------------------------------------------
# Pure-JAX reference (direct NCHW convs) for a correctness check
# ---------------------------------------------------------------------------
def _reference_forward(x, params):
    hp = jax.lax.Precision.HIGHEST

    def conv(x, w, b):                       # w: (Co, Ci, 2, 2)
        n, c, hh, ww = x.shape
        xr = x.reshape(n, c, hh // 2, 2, ww // 2, 2)
        y = jnp.einsum("nchkwl,ockl->nohw", xr, w, precision=hp)
        return y + b.reshape(1, -1, 1, 1)

    def convT(x, w, b):                      # w: (Ci, Co, 2, 2)
        n, c, hh, ww = x.shape
        co = w.shape[1]
        y = jnp.einsum("nihw,iokl->nohkwl", x, w, precision=hp)
        return y.reshape(n, co, 2 * hh, 2 * ww) + b.reshape(1, -1, 1, 1)

    def bn_relu(x, gamma, beta):
        mean = x.mean(axis=(0, 2, 3), keepdims=True)
        var = x.var(axis=(0, 2, 3), keepdims=True)
        y = (x - mean) * jax.lax.rsqrt(var + _EPS)
        y = y * gamma.reshape(1, -1, 1, 1) + beta.reshape(1, -1, 1, 1)
        return jnp.maximum(y, 0.0)

    h = x
    for name, op in [("enc1", conv), ("enc2", conv), ("enc3", conv),
                     ("dec1", convT), ("dec2", convT), ("dec3", convT)]:
        p = params[name]
        h = bn_relu(op(h, p["w"], p["b"]), p["gamma"], p["beta"])
    s = 0.5 * (h + jnp.swapaxes(h, -1, -2))
    vmax = s.reshape(s.shape[0], -1).max(axis=1).reshape(-1, 1, 1, 1)
    vmin = s.reshape(s.shape[0], -1).min(axis=1).reshape(-1, 1, 1, 1)
    return (s - vmin) / (vmax - vmin)


# ---------------------------------------------------------------------------
# Deterministic parameter init (shapes from the PyTorch __init__)
# ---------------------------------------------------------------------------
def init_params(key):
    def layer(k, w_shape, cout, fan_in):
        kw, kb = jax.random.split(k)
        return {
            "w": jax.random.normal(kw, w_shape, jnp.float32) / jnp.sqrt(fan_in),
            # bias kept for the reference; the Pallas path drops it because training-mode
            # BatchNorm cancels it exactly.
            "b": 0.01 * jax.random.normal(kb, (cout,), jnp.float32),
            "gamma": jnp.ones((cout,), jnp.float32),
            "beta": jnp.zeros((cout,), jnp.float32),
        }

    ks = jax.random.split(key, 6)
    return {
        # Conv2d weight: (Cout, Cin, 2, 2)
        "enc1": layer(ks[0], (32, 1, 2, 2), 32, 1 * 4),
        "enc2": layer(ks[1], (128, 32, 2, 2), 128, 32 * 4),
        "enc3": layer(ks[2], (16, 128, 2, 2), 16, 128 * 4),
        # ConvTranspose2d weight: (Cin, Cout, 2, 2)
        "dec1": layer(ks[3], (16, 128, 2, 2), 128, 16 * 4),
        "dec2": layer(ks[4], (128, 32, 2, 2), 32, 128 * 4),
        "dec3": layer(ks[5], (32, 1, 2, 2), 1, 32 * 4),
    }


if __name__ == "__main__":
    key = jax.random.PRNGKey(0)
    kx, kp = jax.random.split(key)
    # batch=2, 1 channel, 16x16 (divisible by 8 for the three stride-2 convs)
    x = jax.random.normal(kx, (2, 1, 16, 16), jnp.float32)
    params = init_params(kp)

    # Fast path: bf16 activation storage / MXU operands (the production configuration).
    fwd_fast = jax.jit(functools.partial(autoencoder_forward, act_dtype=jnp.bfloat16))
    out = jax.block_until_ready(fwd_fast(x, params))
    assert out.shape == (2, 1, 16, 16)

    ref = jax.block_until_ready(jax.jit(_reference_forward)(x, params))

    # Exact-storage path (f32 activations) must match the f32 reference tightly: this
    # validates the fused-layer / folded-BN / widening / tail structure bit-for-bit-ish.
    fwd_exact = jax.jit(functools.partial(autoencoder_forward, act_dtype=jnp.float32))
    out_exact = jax.block_until_ready(fwd_exact(x, params))
    np.testing.assert_allclose(np.asarray(out_exact), np.asarray(ref), atol=5e-3, rtol=0)

    # bf16 path: same structure, looser bound that only reflects bf16 storage/operand
    # rounding through 6 layers of a [0,1]-normalized output.
    err = np.abs(np.asarray(out) - np.asarray(ref))
    assert np.isfinite(err).all()
    assert float(err.mean()) < 5e-3 and float(err.max()) < 5e-2, (float(err.mean()),
                                                                  float(err.max()))

    print("KERNEL_OK")
</pallas_src>

<mosaic_0001>
module attributes {stable_mosaic.version = 11 : i64} {
  func.func @_fused_layer_kernel(%arg0: i32, %arg1: memref<4x128xbf16, #tpu.memory_space<vmem>>, %arg2: memref<1x128xf32, #tpu.memory_space<vmem>>, %arg3: memref<1x128xf32, #tpu.memory_space<vmem>>, %arg4: memref<128x1024xbf16, #tpu.memory_space<vmem>>, %arg5: memref<4x1024xbf16, #tpu.memory_space<vmem>>, %arg6: memref<1x1x1024xf32, #tpu.memory_space<vmem>>, %arg7: memref<1x1x1024xf32, #tpu.memory_space<vmem>>) attributes {dimension_semantics = [#tpu.dimension_semantics<parallel>], iteration_bounds = array<i64: 1>, scalar_prefetch = 0 : i64, scratch_operands = 0 : i64, tpu.core_type = #tpu.core_type<tc>, window_params = [{transform_indices = @transform_0, window_bounds = array<i64: 4, 128>}, {pipeline_mode = #tpu.pipeline_mode<synchronous>, transform_indices = @transform_1, window_bounds = array<i64: 1, 128>}, {pipeline_mode = #tpu.pipeline_mode<synchronous>, transform_indices = @transform_2, window_bounds = array<i64: 1, 128>}, {pipeline_mode = #tpu.pipeline_mode<synchronous>, transform_indices = @transform_3, window_bounds = array<i64: 128, 1024>}, {transform_indices = @transform_4, window_bounds = array<i64: 4, 1024>}, {transform_indices = @transform_5, window_bounds = array<i64: 1, 1, 1024>}, {transform_indices = @transform_6, window_bounds = array<i64: 1, 1, 1024>}]} {
    %c0 = arith.constant 0 : index
    %c0_0 = arith.constant 0 : index
    %0 = vector.load %arg1[%c0, %c0_0] : memref<4x128xbf16, #tpu.memory_space<vmem>>, vector<4x128xbf16>
    %1 = arith.extf %0 : vector<4x128xbf16> to vector<4x128xf32>
    %c0_1 = arith.constant 0 : index
    %c0_2 = arith.constant 0 : index
    %2 = vector.load %arg2[%c0_1, %c0_2] : memref<1x128xf32, #tpu.memory_space<vmem>>, vector<1x128xf32>
    %3 = vector.broadcast %2 : vector<1x128xf32> to vector<4x128xf32>
    %4 = arith.mulf %1, %3 : vector<4x128xf32>
    %c0_3 = arith.constant 0 : index
    %c0_4 = arith.constant 0 : index
    %5 = vector.load %arg3[%c0_3, %c0_4] : memref<1x128xf32, #tpu.memory_space<vmem>>, vector<1x128xf32>
    %6 = vector.broadcast %5 : vector<1x128xf32> to vector<4x128xf32>
    %7 = arith.addf %4, %6 : vector<4x128xf32>
    %c0_5 = arith.constant 0 : index
    %c0_6 = arith.constant 0 : index
    %8 = vector.load %arg4[%c0_5, %c0_6] : memref<128x1024xbf16, #tpu.memory_space<vmem>>, vector<128x1024xbf16>
    %9 = arith.truncf %7 : vector<4x128xf32> to vector<4x128xbf16>
    %cst = arith.constant dense<0.000000e+00> : vector<4x1024xf32>
    %10 = tpu.matmul %9, %8, %cst {dimension_numbers = #tpu.dot_dimension_numbers<[1], [0], [0], [1], [0, 0, 1, 1], [], []>} : vector<4x128xbf16>, vector<128x1024xbf16>, vector<4x1024xf32> -> vector<4x1024xf32>
    %11 = arith.truncf %10 : vector<4x1024xf32> to vector<4x1024xbf16>
    %c0_7 = arith.constant 0 : index
    %c0_8 = arith.constant 0 : index
    %12 = vector.load %arg5[%c0_7, %c0_8] : memref<4x1024xbf16, #tpu.memory_space<vmem>>, vector<4x1024xbf16>
    tpu.vector_store %arg5[%c0_7, %c0_8], %11 {strides = array<i32>} : memref<4x1024xbf16, #tpu.memory_space<vmem>>, vector<4x1024xbf16>,
    %cst_9 = arith.constant dense<0.000000e+00> : vector<1024xf32>
    %13 = vector.multi_reduction <add>, %10, %cst_9 [0] : vector<4x1024xf32> to vector<1024xf32>
    %14 = vector.shape_cast %13 : vector<1024xf32> to vector<1x1024xf32>
    %c0_10 = arith.constant 0 : index
    %c0_11 = arith.constant 0 : index
    %c0_12 = arith.constant 0 : index
    %15 = vector.load %arg6[%c0_10, %c0_11, %c0_12] : memref<1x1x1024xf32, #tpu.memory_space<vmem>>, vector<1x1x1024xf32>
    %16 = vector.shape_cast %15 : vector<1x1x1024xf32> to vector<1x1024xf32>
    %17 = vector.shape_cast %14 : vector<1x1024xf32> to vector<1x1x1024xf32>
    tpu.vector_store %arg6[%c0_10, %c0_11, %c0_12], %17 {strides = array<i32>} : memref<1x1x1024xf32, #tpu.memory_space<vmem>>, vector<1x1x1024xf32>,
    %18 = arith.mulf %10, %10 : vector<4x1024xf32>
    %cst_13 = arith.constant dense<0.000000e+00> : vector<1024xf32>
    %19 = vector.multi_reduction <add>, %18, %cst_13 [0] : vector<4x1024xf32> to vector<1024xf32>
    %20 = vector.shape_cast %19 : vector<1024xf32> to vector<1x1024xf32>
    %c0_14 = arith.constant 0 : index
    %c0_15 = arith.constant 0 : index
    %c0_16 = arith.constant 0 : index
    %21 = vector.load %arg7[%c0_14, %c0_15, %c0_16] : memref<1x1x1024xf32, #tpu.memory_space<vmem>>, vector<1x1x1024xf32>
    %22 = vector.shape_cast %21 : vector<1x1x1024xf32> to vector<1x1024xf32>
    %23 = vector.shape_cast %20 : vector<1x1024xf32> to vector<1x1x1024xf32>
    tpu.vector_store %arg7[%c0_14, %c0_15, %c0_16], %23 {strides = array<i32>} : memref<1x1x1024xf32, #tpu.memory_space<vmem>>, vector<1x1x1024xf32>,
    return
  }
  func.func @transform_0(%arg0: i32) -> (i32, i32) {
    %c0_i32 = arith.constant 0 : i32
    %c0_i32_0 = arith.constant 0 : i32
    return %arg0, %c0_i32 : i32, i32
  }
  func.func @transform_1(%arg0: i32) -> (i32, i32) {
    %c0_i32 = arith.constant 0 : i32
    %c0_i32_0 = arith.constant 0 : i32
    %c0_i32_1 = arith.constant 0 : i32
    return %c0_i32, %c0_i32_0 : i32, i32
  }
  func.func @transform_2(%arg0: i32) -> (i32, i32) {
    %c0_i32 = arith.constant 0 : i32
    %c0_i32_0 = arith.constant 0 : i32
    %c0_i32_1 = arith.constant 0 : i32
    return %c0_i32, %c0_i32_0 : i32, i32
  }
  func.func @transform_3(%arg0: i32) -> (i32, i32) {
    %c0_i32 = arith.constant 0 : i32
    %c0_i32_0 = arith.constant 0 : i32
    %c0_i32_1 = arith.constant 0 : i32
    return %c0_i32, %c0_i32_0 : i32, i32
  }
  func.func @transform_4(%arg0: i32) -> (i32, i32) {
    %c0_i32 = arith.constant 0 : i32
    %c0_i32_0 = arith.constant 0 : i32
    return %arg0, %c0_i32 : i32, i32
  }
  func.func @transform_5(%arg0: i32) -> (i32, i32, i32) {
    %c0_i32 = arith.constant 0 : i32
    %c0_i32_0 = arith.constant 0 : i32
    %c0_i32_1 = arith.constant 0 : i32
    return %arg0, %c0_i32, %c0_i32_0 : i32, i32, i32
  }
  func.func @transform_6(%arg0: i32) -> (i32, i32, i32) {
    %c0_i32 = arith.constant 0 : i32
    %c0_i32_0 = arith.constant 0 : i32
    %c0_i32_1 = arith.constant 0 : i32
    return %arg0, %c0_i32, %c0_i32_0 : i32, i32, i32
  }
}

module attributes {stable_mosaic.version = 11 : i64} {
  func.func @_fused_layer_kernel(%arg0: i32, %arg1: memref<16x128xbf16, #tpu.memory_space<vmem>>, %arg2: memref<1x128xf32, #tpu.memory_space<vmem>>, %arg3: memref<1x128xf32, #tpu.memory_space<vmem>>, %arg4: memref<128x128xbf16, #tpu.memory_space<vmem>>, %arg5: memref<16x128xbf16, #tpu.memory_space<vmem>>, %arg6: memref<1x1x128xf32, #tpu.memory_space<vmem>>, %arg7: memref<1x1x128xf32, #tpu.memory_space<vmem>>) attributes {dimension_semantics = [#tpu.dimension_semantics<parallel>], iteration_bounds = array<i64: 2>, scalar_prefetch = 0 : i64, scratch_operands = 0 : i64, tpu.core_type = #tpu.core_type<tc>, window_params = [{transform_indices = @transform_0, window_bounds = array<i64: 16, 128>}, {pipeline_mode = #tpu.pipeline_mode<synchronous>, transform_indices = @transform_1, window_bounds = array<i64: 1, 128>}, {pipeline_mode = #tpu.pipeline_mode<synchronous>, transform_indices = @transform_2, window_bounds = array<i64: 1, 128>}, {pipeline_mode = #tpu.pipeline_mode<synchronous>, transform_indices = @transform_3, window_bounds = array<i64: 128, 128>}, {transform_indices = @transform_4, window_bounds = array<i64: 16, 128>}, {transform_indices = @transform_5, window_bounds = array<i64: 1, 1, 128>}, {transform_indices = @transform_6, window_bounds = array<i64: 1, 1, 128>}]} {
    %c0 = arith.constant 0 : index
    %c0_0 = arith.constant 0 : index
    %0 = vector.load %arg1[%c0, %c0_0] : memref<16x128xbf16, #tpu.memory_space<vmem>>, vector<16x128xbf16>
    %1 = arith.extf %0 : vector<16x128xbf16> to vector<16x128xf32>
    %c0_1 = arith.constant 0 : index
    %c0_2 = arith.constant 0 : index
    %2 = vector.load %arg2[%c0_1, %c0_2] : memref<1x128xf32, #tpu.memory_space<vmem>>, vector<1x128xf32>
    %3 = vector.broadcast %2 : vector<1x128xf32> to vector<16x128xf32>
    %4 = arith.mulf %1, %3 : vector<16x128xf32>
    %c0_3 = arith.constant 0 : index
    %c0_4 = arith.constant 0 : index
    %5 = vector.load %arg3[%c0_3, %c0_4] : memref<1x128xf32, #tpu.memory_space<vmem>>, vector<1x128xf32>
    %6 = vector.broadcast %5 : vector<1x128xf32> to vector<16x128xf32>
    %7 = arith.addf %4, %6 : vector<16x128xf32>
    %cst = arith.constant 0.000000e+00 : f32
    %8 = vector.broadcast %cst : f32 to vector<16x128xf32>
    %9 = arith.maximumf %7, %8 : vector<16x128xf32>
    %c0_5 = arith.constant 0 : index
    %c0_6 = arith.constant 0 : index
    %10 = vector.load %arg4[%c0_5, %c0_6] : memref<128x128xbf16, #tpu.memory_space<vmem>>, vector<128x128xbf16>
    %11 = arith.truncf %9 : vector<16x128xf32> to vector<16x128xbf16>
    %cst_7 = arith.constant dense<0.000000e+00> : vector<16x128xf32>
    %12 = tpu.matmul %11, %10, %cst_7 {dimension_numbers = #tpu.dot_dimension_numbers<[1], [0], [0], [1], [0, 0, 1, 1], [], []>} : vector<16x128xbf16>, vector<128x128xbf16>, vector<16x128xf32> -> vector<16x128xf32>
    %13 = arith.truncf %12 : vector<16x128xf32> to vector<16x128xbf16>
    %c0_8 = arith.constant 0 : index
    %c0_9 = arith.constant 0 : index
    %14 = vector.load %arg5[%c0_8, %c0_9] : memref<16x128xbf16, #tpu.memory_space<vmem>>, vector<16x128xbf16>
    tpu.vector_store %arg5[%c0_8, %c0_9], %13 {strides = array<i32>} : memref<16x128xbf16, #tpu.memory_space<vmem>>, vector<16x128xbf16>,
    %cst_10 = arith.constant dense<0.000000e+00> : vector<128xf32>
    %15 = vector.multi_reduction <add>, %12, %cst_10 [0] : vector<16x128xf32> to vector<128xf32>
    %16 = vector.shape_cast %15 : vector<128xf32> to vector<1x128xf32>
    %c0_11 = arith.constant 0 : index
    %c0_12 = arith.constant 0 : index
    %c0_13 = arith.constant 0 : index
    %17 = vector.load %arg6[%c0_11, %c0_12, %c0_13] : memref<1x1x128xf32, #tpu.memory_space<vmem>>, vector<1x1x128xf32>
    %18 = vector.shape_cast %17 : vector<1x1x128xf32> to vector<1x128xf32>
    %19 = vector.shape_cast %16 : vector<1x128xf32> to vector<1x1x128xf32>
    tpu.vector_store %arg6[%c0_11, %c0_12, %c0_13], %19 {strides = array<i32>} : memref<1x1x128xf32, #tpu.memory_space<vmem>>, vector<1x1x128xf32>,
    %20 = arith.mulf %12, %12 : vector<16x128xf32>
    %cst_14 = arith.constant dense<0.000000e+00> : vector<128xf32>
    %21 = vector.multi_reduction <add>, %20, %cst_14 [0] : vector<16x128xf32> to vector<128xf32>
    %22 = vector.shape_cast %21 : vector<128xf32> to vector<1x128xf32>
    %c0_15 = arith.constant 0 : index
    %c0_16 = arith.constant 0 : index
    %c0_17 = arith.constant 0 : index
    %23 = vector.load %arg7[%c0_15, %c0_16, %c0_17] : memref<1x1x128xf32, #tpu.memory_space<vmem>>, vector<1x1x128xf32>
    %24 = vector.shape_cast %23 : vector<1x1x128xf32> to vector<1x128xf32>
    %25 = vector.shape_cast %22 : vector<1x128xf32> to vector<1x1x128xf32>
    tpu.vector_store %arg7[%c0_15, %c0_16, %c0_17], %25 {strides = array<i32>} : memref<1x1x128xf32, #tpu.memory_space<vmem>>, vector<1x1x128xf32>,
    return
  }
  func.func @transform_0(%arg0: i32) -> (i32, i32) {
    %c0_i32 = arith.constant 0 : i32
    %c0_i32_0 = arith.constant 0 : i32
    return %arg0, %c0_i32 : i32, i32
  }
  func.func @transform_1(%arg0: i32) -> (i32, i32) {
    %c0_i32 = arith.constant 0 : i32
    %c0_i32_0 = arith.constant 0 : i32
    %c0_i32_1 = arith.constant 0 : i32
    return %c0_i32, %c0_i32_0 : i32, i32
  }
  func.func @transform_2(%arg0: i32) -> (i32, i32) {
    %c0_i32 = arith.constant 0 : i32
    %c0_i32_0 = arith.constant 0 : i32
    %c0_i32_1 = arith.constant 0 : i32
    return %c0_i32, %c0_i32_0 : i32, i32
  }
  func.func @transform_3(%arg0: i32) -> (i32, i32) {
    %c0_i32 = arith.constant 0 : i32
    %c0_i32_0 = arith.constant 0 : i32
    %c0_i32_1 = arith.constant 0 : i32
    return %c0_i32, %c0_i32_0 : i32, i32
  }
  func.func @transform_4(%arg0: i32) -> (i32, i32) {
    %c0_i32 = arith.constant 0 : i32
    %c0_i32_0 = arith.constant 0 : i32
    return %arg0, %c0_i32 : i32, i32
  }
  func.func @transform_5(%arg0: i32) -> (i32, i32, i32) {
    %c0_i32 = arith.constant 0 : i32
    %c0_i32_0 = arith.constant 0 : i32
    %c0_i32_1 = arith.constant 0 : i32
    return %arg0, %c0_i32, %c0_i32_0 : i32, i32, i32
  }
  func.func @transform_6(%arg0: i32) -> (i32, i32, i32) {
    %c0_i32 = arith.constant 0 : i32
    %c0_i32_0 = arith.constant 0 : i32
    %c0_i32_1 = arith.constant 0 : i32
    return %arg0, %c0_i32, %c0_i32_0 : i32, i32, i32
  }
}

module attributes {stable_mosaic.version = 11 : i64} {
  func.func @_fused_layer_kernel(%arg0: i32, %arg1: memref<1x4096xbf16, #tpu.memory_space<vmem>>, %arg2: memref<1x4096xf32, #tpu.memory_space<vmem>>, %arg3: memref<1x4096xf32, #tpu.memory_space<vmem>>, %arg4: memref<4096x128xbf16, #tpu.memory_space<vmem>>, %arg5: memref<1x128xbf16, #tpu.memory_space<vmem>>, %arg6: memref<1x1x128xf32, #tpu.memory_space<vmem>>, %arg7: memref<1x1x128xf32, #tpu.memory_space<vmem>>) attributes {dimension_semantics = [#tpu.dimension_semantics<parallel>], iteration_bounds = array<i64: 1>, scalar_prefetch = 0 : i64, scratch_operands = 0 : i64, tpu.core_type = #tpu.core_type<tc>, window_params = [{transform_indices = @transform_0, window_bounds = array<i64: 1, 4096>}, {pipeline_mode = #tpu.pipeline_mode<synchronous>, transform_indices = @transform_1, window_bounds = array<i64: 1, 4096>}, {pipeline_mode = #tpu.pipeline_mode<synchronous>, transform_indices = @transform_2, window_bounds = array<i64: 1, 4096>}, {pipeline_mode = #tpu.pipeline_mode<synchronous>, transform_indices = @transform_3, window_bounds = array<i64: 4096, 128>}, {transform_indices = @transform_4, window_bounds = array<i64: 1, 128>}, {transform_indices = @transform_5, window_bounds = array<i64: 1, 1, 128>}, {transform_indices = @transform_6, window_bounds = array<i64: 1, 1, 128>}]} {
    %c0 = arith.constant 0 : index
    %c0_0 = arith.constant 0 : index
    %0 = vector.load %arg1[%c0, %c0_0] : memref<1x4096xbf16, #tpu.memory_space<vmem>>, vector<1x4096xbf16>
    %1 = arith.extf %0 : vector<1x4096xbf16> to vector<1x4096xf32>
    %c0_1 = arith.constant 0 : index
    %c0_2 = arith.constant 0 : index
    %2 = vector.load %arg2[%c0_1, %c0_2] : memref<1x4096xf32, #tpu.memory_space<vmem>>, vector<1x4096xf32>
    %3 = arith.mulf %1, %2 : vector<1x4096xf32>
    %c0_3 = arith.constant 0 : index
    %c0_4 = arith.constant 0 : index
    %4 = vector.load %arg3[%c0_3, %c0_4] : memref<1x4096xf32, #tpu.memory_space<vmem>>, vector<1x4096xf32>
    %5 = arith.addf %3, %4 : vector<1x4096xf32>
    %cst = arith.constant 0.000000e+00 : f32
    %6 = vector.broadcast %cst : f32 to vector<1x4096xf32>
    %7 = arith.maximumf %5, %6 : vector<1x4096xf32>
    %c0_5 = arith.constant 0 : index
    %c0_6 = arith.constant 0 : index
    %8 = vector.load %arg4[%c0_5, %c0_6] : memref<4096x128xbf16, #tpu.memory_space<vmem>>, vector<4096x128xbf16>
    %9 = arith.truncf %7 : vector<1x4096xf32> to vector<1x4096xbf16>
    %cst_7 = arith.constant dense<0.000000e+00> : vector<1x128xf32>
    %10 = tpu.matmul %9, %8, %cst_7 {dimension_numbers = #tpu.dot_dimension_numbers<[1], [0], [0], [1], [0, 0, 1, 1], [], []>} : vector<1x4096xbf16>, vector<4096x128xbf16>, vector<1x128xf32> -> vector<1x128xf32>
    %11 = arith.truncf %10 : vector<1x128xf32> to vector<1x128xbf16>
    %c0_8 = arith.constant 0 : index
    %c0_9 = arith.constant 0 : index
    %12 = vector.load %arg5[%c0_8, %c0_9] : memref<1x128xbf16, #tpu.memory_space<vmem>>, vector<1x128xbf16>
    tpu.vector_store %arg5[%c0_8, %c0_9], %11 {strides = array<i32>} : memref<1x128xbf16, #tpu.memory_space<vmem>>, vector<1x128xbf16>,
    %cst_10 = arith.constant dense<0.000000e+00> : vector<128xf32>
    %13 = vector.multi_reduction <add>, %10, %cst_10 [0] : vector<1x128xf32> to vector<128xf32>
    %14 = vector.shape_cast %13 : vector<128xf32> to vector<1x128xf32>
    %c0_11 = arith.constant 0 : index
    %c0_12 = arith.constant 0 : index
    %c0_13 = arith.constant 0 : index
    %15 = vector.load %arg6[%c0_11, %c0_12, %c0_13] : memref<1x1x128xf32, #tpu.memory_space<vmem>>, vector<1x1x128xf32>
    %16 = vector.shape_cast %15 : vector<1x1x128xf32> to vector<1x128xf32>
    %17 = vector.shape_cast %14 : vector<1x128xf32> to vector<1x1x128xf32>
    tpu.vector_store %arg6[%c0_11, %c0_12, %c0_13], %17 {strides = array<i32>} : memref<1x1x128xf32, #tpu.memory_space<vmem>>, vector<1x1x128xf32>,
    %18 = arith.mulf %10, %10 : vector<1x128xf32>
    %cst_14 = arith.constant dense<0.000000e+00> : vector<128xf32>
    %19 = vector.multi_reduction <add>, %18, %cst_14 [0] : vector<1x128xf32> to vector<128xf32>
    %20 = vector.shape_cast %19 : vector<128xf32> to vector<1x128xf32>
    %c0_15 = arith.constant 0 : index
    %c0_16 = arith.constant 0 : index
    %c0_17 = arith.constant 0 : index
    %21 = vector.load %arg7[%c0_15, %c0_16, %c0_17] : memref<1x1x128xf32, #tpu.memory_space<vmem>>, vector<1x1x128xf32>
    %22 = vector.shape_cast %21 : vector<1x1x128xf32> to vector<1x128xf32>
    %23 = vector.shape_cast %20 : vector<1x128xf32> to vector<1x1x128xf32>
    tpu.vector_store %arg7[%c0_15, %c0_16, %c0_17], %23 {strides = array<i32>} : memref<1x1x128xf32, #tpu.memory_space<vmem>>, vector<1x1x128xf32>,
    return
  }
  func.func @transform_0(%arg0: i32) -> (i32, i32) {
    %c0_i32 = arith.constant 0 : i32
    %c0_i32_0 = arith.constant 0 : i32
    return %arg0, %c0_i32 : i32, i32
  }
  func.func @transform_1(%arg0: i32) -> (i32, i32) {
    %c0_i32 = arith.constant 0 : i32
    %c0_i32_0 = arith.constant 0 : i32
    %c0_i32_1 = arith.constant 0 : i32
    return %c0_i32, %c0_i32_0 : i32, i32
  }
  func.func @transform_2(%arg0: i32) -> (i32, i32) {
    %c0_i32 = arith.constant 0 : i32
    %c0_i32_0 = arith.constant 0 : i32
    %c0_i32_1 = arith.constant 0 : i32
    return %c0_i32, %c0_i32_0 : i32, i32
  }
  func.func @transform_3(%arg0: i32) -> (i32, i32) {
    %c0_i32 = arith.constant 0 : i32
    %c0_i32_0 = arith.constant 0 : i32
    %c0_i32_1 = arith.constant 0 : i32
    return %c0_i32, %c0_i32_0 : i32, i32
  }
  func.func @transform_4(%arg0: i32) -> (i32, i32) {
    %c0_i32 = arith.constant 0 : i32
    %c0_i32_0 = arith.constant 0 : i32
    return %arg0, %c0_i32 : i32, i32
  }
  func.func @transform_5(%arg0: i32) -> (i32, i32, i32) {
    %c0_i32 = arith.constant 0 : i32
    %c0_i32_0 = arith.constant 0 : i32
    %c0_i32_1 = arith.constant 0 : i32
    return %arg0, %c0_i32, %c0_i32_0 : i32, i32, i32
  }
  func.func @transform_6(%arg0: i32) -> (i32, i32, i32) {
    %c0_i32 = arith.constant 0 : i32
    %c0_i32_0 = arith.constant 0 : i32
    %c0_i32_1 = arith.constant 0 : i32
    return %arg0, %c0_i32, %c0_i32_0 : i32, i32, i32
  }
}

module attributes {stable_mosaic.version = 11 : i64} {
  func.func @_fused_layer_kernel(%arg0: i32, %arg1: memref<1x128xbf16, #tpu.memory_space<vmem>>, %arg2: memref<1x128xf32, #tpu.memory_space<vmem>>, %arg3: memref<1x128xf32, #tpu.memory_space<vmem>>, %arg4: memref<128x4096xbf16, #tpu.memory_space<vmem>>, %arg5: memref<1x4096xbf16, #tpu.memory_space<vmem>>, %arg6: memref<1x1x4096xf32, #tpu.memory_space<vmem>>, %arg7: memref<1x1x4096xf32, #tpu.memory_space<vmem>>) attributes {dimension_semantics = [#tpu.dimension_semantics<parallel>], iteration_bounds = array<i64: 1>, scalar_prefetch = 0 : i64, scratch_operands = 0 : i64, tpu.core_type = #tpu.core_type<tc>, window_params = [{transform_indices = @transform_0, window_bounds = array<i64: 1, 128>}, {pipeline_mode = #tpu.pipeline_mode<synchronous>, transform_indices = @transform_1, window_bounds = array<i64: 1, 128>}, {pipeline_mode = #tpu.pipeline_mode<synchronous>, transform_indices = @transform_2, window_bounds = array<i64: 1, 128>}, {pipeline_mode = #tpu.pipeline_mode<synchronous>, transform_indices = @transform_3, window_bounds = array<i64: 128, 4096>}, {transform_indices = @transform_4, window_bounds = array<i64: 1, 4096>}, {transform_indices = @transform_5, window_bounds = array<i64: 1, 1, 4096>}, {transform_indices = @transform_6, window_bounds = array<i64: 1, 1, 4096>}]} {
    %c0 = arith.constant 0 : index
    %c0_0 = arith.constant 0 : index
    %0 = vector.load %arg1[%c0, %c0_0] : memref<1x128xbf16, #tpu.memory_space<vmem>>, vector<1x128xbf16>
    %1 = arith.extf %0 : vector<1x128xbf16> to vector<1x128xf32>
    %c0_1 = arith.constant 0 : index
    %c0_2 = arith.constant 0 : index
    %2 = vector.load %arg2[%c0_1, %c0_2] : memref<1x128xf32, #tpu.memory_space<vmem>>, vector<1x128xf32>
    %3 = arith.mulf %1, %2 : vector<1x128xf32>
    %c0_3 = arith.constant 0 : index
    %c0_4 = arith.constant 0 : index
    %4 = vector.load %arg3[%c0_3, %c0_4] : memref<1x128xf32, #tpu.memory_space<vmem>>, vector<1x128xf32>
    %5 = arith.addf %3, %4 : vector<1x128xf32>
    %cst = arith.constant 0.000000e+00 : f32
    %6 = vector.broadcast %cst : f32 to vector<1x128xf32>
    %7 = arith.maximumf %5, %6 : vector<1x128xf32>
    %c0_5 = arith.constant 0 : index
    %c0_6 = arith.constant 0 : index
    %8 = vector.load %arg4[%c0_5, %c0_6] : memref<128x4096xbf16, #tpu.memory_space<vmem>>, vector<128x4096xbf16>
    %9 = arith.truncf %7 : vector<1x128xf32> to vector<1x128xbf16>
    %cst_7 = arith.constant dense<0.000000e+00> : vector<1x4096xf32>
    %10 = tpu.matmul %9, %8, %cst_7 {dimension_numbers = #tpu.dot_dimension_numbers<[1], [0], [0], [1], [0, 0, 1, 1], [], []>} : vector<1x128xbf16>, vector<128x4096xbf16>, vector<1x4096xf32> -> vector<1x4096xf32>
    %11 = arith.truncf %10 : vector<1x4096xf32> to vector<1x4096xbf16>
    %c0_8 = arith.constant 0 : index
    %c0_9 = arith.constant 0 : index
    %12 = vector.load %arg5[%c0_8, %c0_9] : memref<1x4096xbf16, #tpu.memory_space<vmem>>, vector<1x4096xbf16>
    tpu.vector_store %arg5[%c0_8, %c0_9], %11 {strides = array<i32>} : memref<1x4096xbf16, #tpu.memory_space<vmem>>, vector<1x4096xbf16>,
    %cst_10 = arith.constant dense<0.000000e+00> : vector<4096xf32>
    %13 = vector.multi_reduction <add>, %10, %cst_10 [0] : vector<1x4096xf32> to vector<4096xf32>
    %14 = vector.shape_cast %13 : vector<4096xf32> to vector<1x4096xf32>
    %c0_11 = arith.constant 0 : index
    %c0_12 = arith.constant 0 : index
    %c0_13 = arith.constant 0 : index
    %15 = vector.load %arg6[%c0_11, %c0_12, %c0_13] : memref<1x1x4096xf32, #tpu.memory_space<vmem>>, vector<1x1x4096xf32>
    %16 = vector.shape_cast %15 : vector<1x1x4096xf32> to vector<1x4096xf32>
    %17 = vector.shape_cast %14 : vector<1x4096xf32> to vector<1x1x4096xf32>
    tpu.vector_store %arg6[%c0_11, %c0_12, %c0_13], %17 {strides = array<i32>} : memref<1x1x4096xf32, #tpu.memory_space<vmem>>, vector<1x1x4096xf32>,
    %18 = arith.mulf %10, %10 : vector<1x4096xf32>
    %cst_14 = arith.constant dense<0.000000e+00> : vector<4096xf32>
    %19 = vector.multi_reduction <add>, %18, %cst_14 [0] : vector<1x4096xf32> to vector<4096xf32>
    %20 = vector.shape_cast %19 : vector<4096xf32> to vector<1x4096xf32>
    %c0_15 = arith.constant 0 : index
    %c0_16 = arith.constant 0 : index
    %c0_17 = arith.constant 0 : index
    %21 = vector.load %arg7[%c0_15, %c0_16, %c0_17] : memref<1x1x4096xf32, #tpu.memory_space<vmem>>, vector<1x1x4096xf32>
    %22 = vector.shape_cast %21 : vector<1x1x4096xf32> to vector<1x4096xf32>
    %23 = vector.shape_cast %20 : vector<1x4096xf32> to vector<1x1x4096xf32>
    tpu.vector_store %arg7[%c0_15, %c0_16, %c0_17], %23 {strides = array<i32>} : memref<1x1x4096xf32, #tpu.memory_space<vmem>>, vector<1x1x4096xf32>,
    return
  }
  func.func @transform_0(%arg0: i32) -> (i32, i32) {
    %c0_i32 = arith.constant 0 : i32
    %c0_i32_0 = arith.constant 0 : i32
    return %arg0, %c0_i32 : i32, i32
  }
  func.func @transform_1(%arg0: i32) -> (i32, i32) {
    %c0_i32 = arith.constant 0 : i32
    %c0_i32_0 = arith.constant 0 : i32
    %c0_i32_1 = arith.constant 0 : i32
    return %c0_i32, %c0_i32_0 : i32, i32
  }
  func.func @transform_2(%arg0: i32) -> (i32, i32) {
    %c0_i32 = arith.constant 0 : i32
    %c0_i32_0 = arith.constant 0 : i32
    %c0_i32_1 = arith.constant 0 : i32
    return %c0_i32, %c0_i32_0 : i32, i32
  }
  func.func @transform_3(%arg0: i32) -> (i32, i32) {
    %c0_i32 = arith.constant 0 : i32
    %c0_i32_0 = arith.constant 0 : i32
    %c0_i32_1 = arith.constant 0 : i32
    return %c0_i32, %c0_i32_0 : i32, i32
  }
  func.func @transform_4(%arg0: i32) -> (i32, i32) {
    %c0_i32 = arith.constant 0 : i32
    %c0_i32_0 = arith.constant 0 : i32
    return %arg0, %c0_i32 : i32, i32
  }
  func.func @transform_5(%arg0: i32) -> (i32, i32, i32) {
    %c0_i32 = arith.constant 0 : i32
    %c0_i32_0 = arith.constant 0 : i32
    %c0_i32_1 = arith.constant 0 : i32
    return %arg0, %c0_i32, %c0_i32_0 : i32, i32, i32
  }
  func.func @transform_6(%arg0: i32) -> (i32, i32, i32) {
    %c0_i32 = arith.constant 0 : i32
    %c0_i32_0 = arith.constant 0 : i32
    %c0_i32_1 = arith.constant 0 : i32
    return %arg0, %c0_i32, %c0_i32_0 : i32, i32, i32
  }
}

module attributes {stable_mosaic.version = 11 : i64} {
  func.func @_fused_layer_kernel(%arg0: i32, %arg1: memref<4x1024xbf16, #tpu.memory_space<vmem>>, %arg2: memref<1x1024xf32, #tpu.memory_space<vmem>>, %arg3: memref<1x1024xf32, #tpu.memory_space<vmem>>, %arg4: memref<1024x128xbf16, #tpu.memory_space<vmem>>, %arg5: memref<4x128xbf16, #tpu.memory_space<vmem>>, %arg6: memref<1x1x128xf32, #tpu.memory_space<vmem>>, %arg7: memref<1x1x128xf32, #tpu.memory_space<vmem>>) attributes {dimension_semantics = [#tpu.dimension_semantics<parallel>], iteration_bounds = array<i64: 1>, scalar_prefetch = 0 : i64, scratch_operands = 0 : i64, tpu.core_type = #tpu.core_type<tc>, window_params = [{transform_indices = @transform_0, window_bounds = array<i64: 4, 1024>}, {pipeline_mode = #tpu.pipeline_mode<synchronous>, transform_indices = @transform_1, window_bounds = array<i64: 1, 1024>}, {pipeline_mode = #tpu.pipeline_mode<synchronous>, transform_indices = @transform_2, window_bounds = array<i64: 1, 1024>}, {pipeline_mode = #tpu.pipeline_mode<synchronous>, transform_indices = @transform_3, window_bounds = array<i64: 1024, 128>}, {transform_indices = @transform_4, window_bounds = array<i64: 4, 128>}, {transform_indices = @transform_5, window_bounds = array<i64: 1, 1, 128>}, {transform_indices = @transform_6, window_bounds = array<i64: 1, 1, 128>}]} {
    %c0 = arith.constant 0 : index
    %c0_0 = arith.constant 0 : index
    %0 = vector.load %arg1[%c0, %c0_0] : memref<4x1024xbf16, #tpu.memory_space<vmem>>, vector<4x1024xbf16>
    %1 = arith.extf %0 : vector<4x1024xbf16> to vector<4x1024xf32>
    %c0_1 = arith.constant 0 : index
    %c0_2 = arith.constant 0 : index
    %2 = vector.load %arg2[%c0_1, %c0_2] : memref<1x1024xf32, #tpu.memory_space<vmem>>, vector<1x1024xf32>
    %3 = vector.broadcast %2 : vector<1x1024xf32> to vector<4x1024xf32>
    %4 = arith.mulf %1, %3 : vector<4x1024xf32>
    %c0_3 = arith.constant 0 : index
    %c0_4 = arith.constant 0 : index
    %5 = vector.load %arg3[%c0_3, %c0_4] : memref<1x1024xf32, #tpu.memory_space<vmem>>, vector<1x1024xf32>
    %6 = vector.broadcast %5 : vector<1x1024xf32> to vector<4x1024xf32>
    %7 = arith.addf %4, %6 : vector<4x1024xf32>
    %cst = arith.constant 0.000000e+00 : f32
    %8 = vector.broadcast %cst : f32 to vector<4x1024xf32>
    %9 = arith.maximumf %7, %8 : vector<4x1024xf32>
    %c0_5 = arith.constant 0 : index
    %c0_6 = arith.constant 0 : index
    %10 = vector.load %arg4[%c0_5, %c0_6] : memref<1024x128xbf16, #tpu.memory_space<vmem>>, vector<1024x128xbf16>
    %11 = arith.truncf %9 : vector<4x1024xf32> to vector<4x1024xbf16>
    %cst_7 = arith.constant dense<0.000000e+00> : vector<4x128xf32>
    %12 = tpu.matmul %11, %10, %cst_7 {dimension_numbers = #tpu.dot_dimension_numbers<[1], [0], [0], [1], [0, 0, 1, 1], [], []>} : vector<4x1024xbf16>, vector<1024x128xbf16>, vector<4x128xf32> -> vector<4x128xf32>
    %13 = arith.truncf %12 : vector<4x128xf32> to vector<4x128xbf16>
    %c0_8 = arith.constant 0 : index
    %c0_9 = arith.constant 0 : index
    %14 = vector.load %arg5[%c0_8, %c0_9] : memref<4x128xbf16, #tpu.memory_space<vmem>>, vector<4x128xbf16>
    tpu.vector_store %arg5[%c0_8, %c0_9], %13 {strides = array<i32>} : memref<4x128xbf16, #tpu.memory_space<vmem>>, vector<4x128xbf16>,
    %cst_10 = arith.constant dense<0.000000e+00> : vector<128xf32>
    %15 = vector.multi_reduction <add>, %12, %cst_10 [0] : vector<4x128xf32> to vector<128xf32>
    %16 = vector.shape_cast %15 : vector<128xf32> to vector<1x128xf32>
    %c0_11 = arith.constant 0 : index
    %c0_12 = arith.constant 0 : index
    %c0_13 = arith.constant 0 : index
    %17 = vector.load %arg6[%c0_11, %c0_12, %c0_13] : memref<1x1x128xf32, #tpu.memory_space<vmem>>, vector<1x1x128xf32>
    %18 = vector.shape_cast %17 : vector<1x1x128xf32> to vector<1x128xf32>
    %19 = vector.shape_cast %16 : vector<1x128xf32> to vector<1x1x128xf32>
    tpu.vector_store %arg6[%c0_11, %c0_12, %c0_13], %19 {strides = array<i32>} : memref<1x1x128xf32, #tpu.memory_space<vmem>>, vector<1x1x128xf32>,
    %20 = arith.mulf %12, %12 : vector<4x128xf32>
    %cst_14 = arith.constant dense<0.000000e+00> : vector<128xf32>
    %21 = vector.multi_reduction <add>, %20, %cst_14 [0] : vector<4x128xf32> to vector<128xf32>
    %22 = vector.shape_cast %21 : vector<128xf32> to vector<1x128xf32>
    %c0_15 = arith.constant 0 : index
    %c0_16 = arith.constant 0 : index
    %c0_17 = arith.constant 0 : index
    %23 = vector.load %arg7[%c0_15, %c0_16, %c0_17] : memref<1x1x128xf32, #tpu.memory_space<vmem>>, vector<1x1x128xf32>
    %24 = vector.shape_cast %23 : vector<1x1x128xf32> to vector<1x128xf32>
    %25 = vector.shape_cast %22 : vector<1x128xf32> to vector<1x1x128xf32>
    tpu.vector_store %arg7[%c0_15, %c0_16, %c0_17], %25 {strides = array<i32>} : memref<1x1x128xf32, #tpu.memory_space<vmem>>, vector<1x1x128xf32>,
    return
  }
  func.func @transform_0(%arg0: i32) -> (i32, i32) {
    %c0_i32 = arith.constant 0 : i32
    %c0_i32_0 = arith.constant 0 : i32
    return %arg0, %c0_i32 : i32, i32
  }
  func.func @transform_1(%arg0: i32) -> (i32, i32) {
    %c0_i32 = arith.constant 0 : i32
    %c0_i32_0 = arith.constant 0 : i32
    %c0_i32_1 = arith.constant 0 : i32
    return %c0_i32, %c0_i32_0 : i32, i32
  }
  func.func @transform_2(%arg0: i32) -> (i32, i32) {
    %c0_i32 = arith.constant 0 : i32
    %c0_i32_0 = arith.constant 0 : i32
    %c0_i32_1 = arith.constant 0 : i32
    return %c0_i32, %c0_i32_0 : i32, i32
  }
  func.func @transform_3(%arg0: i32) -> (i32, i32) {
    %c0_i32 = arith.constant 0 : i32
    %c0_i32_0 = arith.constant 0 : i32
    %c0_i32_1 = arith.constant 0 : i32
    return %c0_i32, %c0_i32_0 : i32, i32
  }
  func.func @transform_4(%arg0: i32) -> (i32, i32) {
    %c0_i32 = arith.constant 0 : i32
    %c0_i32_0 = arith.constant 0 : i32
    return %arg0, %c0_i32 : i32, i32
  }
  func.func @transform_5(%arg0: i32) -> (i32, i32, i32) {
    %c0_i32 = arith.constant 0 : i32
    %c0_i32_0 = arith.constant 0 : i32
    %c0_i32_1 = arith.constant 0 : i32
    return %arg0, %c0_i32, %c0_i32_0 : i32, i32, i32
  }
  func.func @transform_6(%arg0: i32) -> (i32, i32, i32) {
    %c0_i32 = arith.constant 0 : i32
    %c0_i32_0 = arith.constant 0 : i32
    %c0_i32_1 = arith.constant 0 : i32
    return %arg0, %c0_i32, %c0_i32_0 : i32, i32, i32
  }
}

module attributes {stable_mosaic.version = 11 : i64} {
  func.func @_final_kernel(%arg0: i32, %arg1: memref<1x2xf32, #tpu.memory_space<vmem>>, %arg2: memref<2x16x16xbf16, #tpu.memory_space<vmem>>, %arg3: memref<2x16x16xbf16, #tpu.memory_space<vmem>>, %arg4: memref<2x16x16xf32, #tpu.memory_space<vmem>>) attributes {dimension_semantics = [#tpu.dimension_semantics<parallel>], iteration_bounds = array<i64: 1>, scalar_prefetch = 0 : i64, scratch_operands = 0 : i64, tpu.core_type = #tpu.core_type<tc>, window_params = [{pipeline_mode = #tpu.pipeline_mode<synchronous>, transform_indices = @transform_0, window_bounds = array<i64: 1, 2>}, {transform_indices = @transform_1, window_bounds = array<i64: 2, 16, 16>}, {transform_indices = @transform_2, window_bounds = array<i64: 2, 16, 16>}, {transform_indices = @transform_3, window_bounds = array<i64: 2, 16, 16>}]} {
    %c0 = arith.constant 0 : index
    %c0_0 = arith.constant 0 : index
    %0 = vector.load %arg1[%c0, %c0_0] : memref<1x2xf32, #tpu.memory_space<vmem>>, vector<1x1xf32>
    %c0_1 = arith.constant 0 : index
    %c1 = arith.constant 1 : index
    %1 = vector.load %arg1[%c0_1, %c1] : memref<1x2xf32, #tpu.memory_space<vmem>>, vector<1x1xf32>
    %c0_2 = arith.constant 0 : index
    %c0_3 = arith.constant 0 : index
    %c0_4 = arith.constant 0 : index
    %2 = vector.load %arg2[%c0_2, %c0_3, %c0_4] : memref<2x16x16xbf16, #tpu.memory_space<vmem>>, vector<2x16x16xbf16>
    %3 = arith.extf %2 : vector<2x16x16xbf16> to vector<2x16x16xf32>
    %4 = vector.shape_cast %0 : vector<1x1xf32> to vector<1x1x1xf32>
    %5 = vector.broadcast %4 : vector<1x1x1xf32> to vector<2x16x16xf32>
    %6 = arith.mulf %3, %5 : vector<2x16x16xf32>
    %7 = vector.shape_cast %1 : vector<1x1xf32> to vector<1x1x1xf32>
    %8 = vector.broadcast %7 : vector<1x1x1xf32> to vector<2x16x16xf32>
    %9 = arith.addf %6, %8 : vector<2x16x16xf32>
    %cst = arith.constant 0.000000e+00 : f32
    %10 = vector.broadcast %cst : f32 to vector<2x16x16xf32>
    %11 = arith.maximumf %9, %10 : vector<2x16x16xf32>
    %c0_5 = arith.constant 0 : index
    %c0_6 = arith.constant 0 : index
    %c0_7 = arith.constant 0 : index
    %12 = vector.load %arg3[%c0_5, %c0_6, %c0_7] : memref<2x16x16xbf16, #tpu.memory_space<vmem>>, vector<2x16x16xbf16>
    %13 = arith.extf %12 : vector<2x16x16xbf16> to vector<2x16x16xf32>
    %14 = vector.shape_cast %0 : vector<1x1xf32> to vector<1x1x1xf32>
    %15 = vector.broadcast %14 : vector<1x1x1xf32> to vector<2x16x16xf32>
    %16 = arith.mulf %13, %15 : vector<2x16x16xf32>
    %17 = vector.shape_cast %1 : vector<1x1xf32> to vector<1x1x1xf32>
    %18 = vector.broadcast %17 : vector<1x1x1xf32> to vector<2x16x16xf32>
    %19 = arith.addf %16, %18 : vector<2x16x16xf32>
    %cst_8 = arith.constant 0.000000e+00 : f32
    %20 = vector.broadcast %cst_8 : f32 to vector<2x16x16xf32>
    %21 = arith.maximumf %19, %20 : vector<2x16x16xf32>
    %22 = arith.addf %11, %21 : vector<2x16x16xf32>
    %cst_9 = arith.constant 5.000000e-01 : f32
    %23 = vector.broadcast %cst_9 : f32 to vector<2x16x16xf32>
    %24 = arith.mulf %23, %22 : vector<2x16x16xf32>
    %cst_10 = arith.constant dense<0xFF800000> : vector<2x16xf32>
    %25 = vector.multi_reduction <maximumf>, %24, %cst_10 [2] : vector<2x16x16xf32> to vector<2x16xf32>
    %26 = vector.shape_cast %25 : vector<2x16xf32> to vector<2x16x1xf32>
    %cst_11 = arith.constant dense<0xFF800000> : vector<2x1xf32>
    %27 = vector.multi_reduction <maximumf>, %26, %cst_11 [1] : vector<2x16x1xf32> to vector<2x1xf32>
    %28 = vector.shape_cast %27 : vector<2x1xf32> to vector<2x1x1xf32>
    %cst_12 = arith.constant dense<0x7F800000> : vector<2x16xf32>
    %29 = vector.multi_reduction <minimumf>, %24, %cst_12 [2] : vector<2x16x16xf32> to vector<2x16xf32>
    %30 = vector.shape_cast %29 : vector<2x16xf32> to vector<2x16x1xf32>
    %cst_13 = arith.constant dense<0x7F800000> : vector<2x1xf32>
    %31 = vector.multi_reduction <minimumf>, %30, %cst_13 [1] : vector<2x16x1xf32> to vector<2x1xf32>
    %32 = vector.shape_cast %31 : vector<2x1xf32> to vector<2x1x1xf32>
    %33 = arith.subf %28, %32 : vector<2x1x1xf32>
    %34 = tpu.reciprocal %33 : vector<2x1x1xf32> -> vector<2x1x1xf32>
    %35 = vector.broadcast %32 : vector<2x1x1xf32> to vector<2x16x16xf32>
    %36 = arith.subf %24, %35 : vector<2x16x16xf32>
    %37 = vector.broadcast %34 : vector<2x1x1xf32> to vector<2x16x16xf32>
    %38 = arith.mulf %36, %37 : vector<2x16x16xf32>
    %c0_14 = arith.constant 0 : index
    %c0_15 = arith.constant 0 : index
    %c0_16 = arith.constant 0 : index
    %39 = vector.load %arg4[%c0_14, %c0_15, %c0_16] : memref<2x16x16xf32, #tpu.memory_space<vmem>>, vector<2x16x16xf32>
    tpu.vector_store %arg4[%c0_14, %c0_15, %c0_16], %38 {strides = array<i32>} : memref<2x16x16xf32, #tpu.memory_space<vmem>>, vector<2x16x16xf32>,
    return
  }
  func.func @transform_0(%arg0: i32) -> (i32, i32) {
    %c0_i32 = arith.constant 0 : i32
    %c0_i32_0 = arith.constant 0 : i32
    %c0_i32_1 = arith.constant 0 : i32
    return %c0_i32, %c0_i32_0 : i32, i32
  }
  func.func @transform_1(%arg0: i32) -> (i32, i32, i32) {
    %c0_i32 = arith.constant 0 : i32
    %c0_i32_0 = arith.constant 0 : i32
    %c0_i32_1 = arith.constant 0 : i32
    return %arg0, %c0_i32, %c0_i32_0 : i32, i32, i32
  }
  func.func @transform_2(%arg0: i32) -> (i32, i32, i32) {
    %c0_i32 = arith.constant 0 : i32
    %c0_i32_0 = arith.constant 0 : i32
    %c0_i32_1 = arith.constant 0 : i32
    return %arg0, %c0_i32, %c0_i32_0 : i32, i32, i32
  }
  func.func @transform_3(%arg0: i32) -> (i32, i32, i32) {
    %c0_i32 = arith.constant 0 : i32
    %c0_i32_0 = arith.constant 0 : i32
    %c0_i32_1 = arith.constant 0 : i32
    return %arg0, %c0_i32, %c0_i32_0 : i32, i32, i32
  }
}

</mosaic_0001>

<bundles_post_ra>
// kernel: tile.43
= control target key start
LH: loop header
LB: loop body
LE: loop exit
PB: predicated region body
PF: predicated region fallthrough
CT: control target
= control target key end

     0   :  { %s22_s0 = inlined_call_operand.vmem [shape: f32[32], index: 0, kind: input, shape index: {}]   ;;  %s23_s1 = inlined_call_operand.vmem [shape: f32[4,32], index: 1, kind: output, shape index: {}]  }
   0x1   :  { %v4_v0 = vld [vmem:[%s22_s0] ss:$0 sm:$0xff] }
   0x2   :  { %5 = vst [vmem:[%s23_s1] sm:$0xf] %v4_v0 }

// kernel: tile.48
= control target key start
LH: loop header
LB: loop body
LE: loop exit
PB: predicated region body
PF: predicated region fallthrough
CT: control target
= control target key end

     0   :  { %vm7_vm0 = vcmask 261120   ;;  %s37_s8 = smov 32   ;;  %s38_s9 = smov 64   ;;  %vm13_vm1 = vcmask 1048320   ;;  %vm19_vm2 = vcmask 785920   ;;  %vm25_vm3 = vcmask 523520   ;;  %s55_s0 = inlined_call_operand.vmem [shape: f32[4,32], index: 0, kind: input, shape index: {}]   ;;  %s56_s1 = inlined_call_operand.vmem [shape: f32[1,128], index: 1, kind: output, shape index: {}]  }
   0x1   :  { %v4_v0 = vld [vmem:[%s55_s0] sm:$0xf]  ;;  %s36_s0 = smov 96  }
   0x2   :  { %5 = vst [vmem:[#allocation1] sm:$0xf] %v4_v0 }
   0x9   :  { %v10_v1 = vld [vmem:[#allocation1 + $0x3] sm:$0x1]   ;;  %v22_v2 = vld [vmem:[#allocation1 + $0x1] sm:$0x1]   ;;  %v6_v3 = vld [vmem:[#allocation1] sm:$0x1]  }
   0xa   :  { %11 = vrot.lane.b32.xlu0 %v10_v1, %s36_s0  ;;  %23 = vrot.lane.b32.xlu1 %v22_v2, %s37_s8  ;;  %v16_v4 = vld [vmem:[#allocation1 + $0x2] sm:$0x1]   ;;  %8 = vst.msk [vmem:[#allocation0] sm:$0x1] %vm7_vm0, %v6_v3  }
   0xe   :  { %17 = vrot.lane.b32.xlu0 %v16_v4, %s38_s9 }
  0x7c   :  { %v12_v5 = vpop.permute.xlu0 %11   ;;  %v24_v6 = vpop.permute.xlu1 %23  }
  0x7d   :  { %14 = vst.msk [vmem:[#allocation0] sm:$0x1] %vm13_vm1, %v12_v5  }
  0x80   :  { %v18_v7 = vpop.permute.xlu0 %17  }
  0x81   :  { %20 = vst.msk [vmem:[#allocation0] sm:$0x1] %vm19_vm2, %v18_v7  }
  0x82   :  { %26 = vst.msk [vmem:[#allocation0] sm:$0x1] %vm25_vm3, %v24_v6  }
  0x89   :  { %v30_v8 = vld [vmem:[#allocation0] sm:$0x1] }
  0x8a   :  { %32 = vst [vmem:[%s56_s1] sm:$0x1] %v30_v8 }

// kernel: tile.53
= control target key start
LH: loop header
LB: loop body
LE: loop exit
PB: predicated region body
PF: predicated region fallthrough
CT: control target
= control target key end

     0   :  { %s40_s0 = inlined_call_operand.vmem [shape: f32[128], index: 0, kind: input, shape index: {}]   ;;  %s41_s1 = inlined_call_operand.vmem [shape: f32[32,128], index: 1, kind: output, shape index: {}]  }
   0x1   :  { %v4_v0 = vld [vmem:[%s40_s0] ss:$0 sm:$0xff] }
   0x2   :  { %5 = vst [vmem:[%s41_s1] sm:$0xff] %v4_v0  ;;  %12 = vst [vmem:[%s41_s1 + $0x8] sm:$0xff] %v4_v0 }
   0x3   :  { %13 = vst [vmem:[%s41_s1 + $0x10] sm:$0xff] %v4_v0  ;;  %14 = vst [vmem:[%s41_s1 + $0x18] sm:$0xff] %v4_v0 }

// kernel: mul.18
= control target key start
LH: loop header
LB: loop body
LE: loop exit
PB: predicated region body
PF: predicated region fallthrough
CT: control target
= control target key end

     0   :  { %s580_s0 = inlined_call_operand.vmem [shape: f32[2,2,128,16], index: 0, kind: input, shape index: {}]   ;;  %s581_s1 = inlined_call_operand.vmem [shape: f32[512,16], index: 1, kind: output, shape index: {}]  }
   0x1   :  { %v316_v0 = vld [vmem:[%s580_s0 + $0x3e] sm:$0x3]  ;;  %v317_v1 = vld [vmem:[%s580_s0 + $0x3c] sm:$0x3]  ;;  %v318_v2 = vld [vmem:[%s580_s0 + $0x3a] sm:$0x3] }
   0x2   :  { %8 = vst [vmem:[#allocation0 + $0xf8] sm:$0x3] %v316_v0  ;;  %13 = vst [vmem:[#allocation0 + $0xf0] sm:$0x3] %v317_v1  ;;  %v319_v3 = vld [vmem:[%s580_s0 + $0x38] sm:$0x3] }
   0x3   :  { %18 = vst [vmem:[#allocation0 + $0xe8] sm:$0x3] %v318_v2  ;;  %v320_v4 = vld [vmem:[%s580_s0 + $0x36] sm:$0x3]  ;;  %v321_v5 = vld [vmem:[%s580_s0 + $0x34] sm:$0x3] }
   0x4   :  { %23 = vst [vmem:[#allocation0 + $0xe0] sm:$0x3] %v319_v3  ;;  %28 = vst [vmem:[#allocation0 + $0xd8] sm:$0x3] %v320_v4  ;;  %v322_v6 = vld [vmem:[%s580_s0 + $0x32] sm:$0x3] }
   0x5   :  { %33 = vst [vmem:[#allocation0 + $0xd0] sm:$0x3] %v321_v5  ;;  %v323_v7 = vld [vmem:[%s580_s0 + $0x30] sm:$0x3]  ;;  %v324_v8 = vld [vmem:[%s580_s0 + $0x2e] sm:$0x3] }
   0x6   :  { %38 = vst [vmem:[#allocation0 + $0xc8] sm:$0x3] %v322_v6  ;;  %43 = vst [vmem:[#allocation0 + $0xc0] sm:$0x3] %v323_v7  ;;  %v325_v9 = vld [vmem:[%s580_s0 + $0x2c] sm:$0x3] }
   0x7   :  { %48 = vst [vmem:[#allocation0 + $0xb8] sm:$0x3] %v324_v8  ;;  %v326_v10 = vld [vmem:[%s580_s0 + $0x2a] sm:$0x3]  ;;  %v327_v11 = vld [vmem:[%s580_s0 + $0x28] sm:$0x3] }
   0x8   :  { %53 = vst [vmem:[#allocation0 + $0xb0] sm:$0x3] %v325_v9  ;;  %58 = vst [vmem:[#allocation0 + $0xa8] sm:$0x3] %v326_v10  ;;  %v328_v12 = vld [vmem:[%s580_s0 + $0x26] sm:$0x3] }
   0x9   :  { %63 = vst [vmem:[#allocation0 + $0xa0] sm:$0x3] %v327_v11  ;;  %v329_v13 = vld [vmem:[%s580_s0 + $0x24] sm:$0x3]  ;;  %v330_v14 = vld [vmem:[%s580_s0 + $0x22] sm:$0x3] }
   0xa   :  { %68 = vst [vmem:[#allocation0 + $0x98] sm:$0x3] %v328_v12  ;;  %73 = vst [vmem:[#allocation0 + $0x90] sm:$0x3] %v329_v13  ;;  %v331_v15 = vld [vmem:[%s580_s0 + $0x20] sm:$0x3] }
   0xb   :  { %78 = vst [vmem:[#allocation0 + $0x88] sm:$0x3] %v330_v14  ;;  %v332_v16 = vld [vmem:[%s580_s0 + $0x1e] sm:$0x3]  ;;  %v333_v17 = vld [vmem:[%s580_s0 + $0x1c] sm:$0x3] }
   0xc   :  { %83 = vst [vmem:[#allocation0 + $0x80] sm:$0x3] %v331_v15  ;;  %88 = vst [vmem:[#allocation0 + $0x78] sm:$0x3] %v332_v16  ;;  %v334_v18 = vld [vmem:[%s580_s0 + $0x1a] sm:$0x3] }
   0xd   :  { %93 = vst [vmem:[#allocation0 + $0x70] sm:$0x3] %v333_v17  ;;  %v335_v19 = vld [vmem:[%s580_s0 + $0x18] sm:$0x3]  ;;  %v336_v20 = vld [vmem:[%s580_s0 + $0x16] sm:$0x3] }
   0xe   :  { %98 = vst [vmem:[#allocation0 + $0x68] sm:$0x3] %v334_v18  ;;  %103 = vst [vmem:[#allocation0 + $0x60] sm:$0x3] %v335_v19  ;;  %v337_v21 = vld [vmem:[%s580_s0 + $0x14] sm:$0x3] }
   0xf   :  { %108 = vst [vmem:[#allocation0 + $0x58] sm:$0x3] %v336_v20  ;;  %v338_v22 = vld [vmem:[%s580_s0 + $0x12] sm:$0x3]  ;;  %v339_v23 = vld [vmem:[%s580_s0 + $0x10] sm:$0x3] }
  0x10   :  { %113 = vst [vmem:[#allocation0 + $0x50] sm:$0x3] %v337_v21  ;;  %118 = vst [vmem:[#allocation0 + $0x48] sm:$0x3] %v338_v22  ;;  %v340_v24 = vld [vmem:[%s580_s0 + $0xe] sm:$0x3] }
  0x11   :  { %123 = vst [vmem:[#allocation0 + $0x40] sm:$0x3] %v339_v23  ;;  %v341_v25 = vld [vmem:[%s580_s0 + $0xc] sm:$0x3]  ;;  %v342_v26 = vld [vmem:[%s580_s0 + $0xa] sm:$0x3] }
  0x12   :  { %128 = vst [vmem:[#allocation0 + $0x38] sm:$0x3] %v340_v24  ;;  %133 = vst [vmem:[#allocation0 + $0x30] sm:$0x3] %v341_v25  ;;  %v343_v27 = vld [vmem:[%s580_s0 + $0x8] sm:$0x3] }
  0x13   :  { %138 = vst [vmem:[#allocation0 + $0x28] sm:$0x3] %v342_v26  ;;  %v344_v28 = vld [vmem:[%s580_s0 + $0x6] sm:$0x3]  ;;  %v345_v29 = vld [vmem:[%s580_s0 + $0x4] sm:$0x3] }
  0x14   :  { %143 = vst [vmem:[#allocation0 + $0x20] sm:$0x3] %v343_v27  ;;  %148 = vst [vmem:[#allocation0 + $0x18] sm:$0x3] %v344_v28  ;;  %v346_v30 = vld [vmem:[%s580_s0 + $0x2] sm:$0x3] }
  0x15   :  { %153 = vst [vmem:[#allocation0 + $0x10] sm:$0x3] %v345_v29  ;;  %v158_v31 = vld [vmem:[%s580_s0] sm:$0x3]  ;;  %v251_v32 = vld [vmem:[#allocation0 + $0xb8] sm:$0x3]  }
  0x16   :  { %157 = vst [vmem:[#allocation0 + $0x8] sm:$0x3] %v346_v30  ;;  %159 = vst [vmem:[#allocation0] sm:$0x3] %v158_v31  ;;  %v239_v33 = vld [vmem:[#allocation0 + $0xa0] sm:$0x3]  }
  0x17   :  { %v243_v34 = vld [vmem:[#allocation0 + $0xa8] sm:$0x3]   ;;  %v247_v35 = vld [vmem:[#allocation0 + $0xb0] sm:$0x3]   ;;  %v235_v38 = vld [vmem:[#allocation0 + $0x98] sm:$0x3]  }
  0x18   :  { %369 = vst [vmem:[%s581_s1 + $0x33] ss:$8 sm:$0x3] %v251_v32   ;;  %v227_v36 = vld [vmem:[#allocation0 + $0x88] sm:$0x3]  }
  0x19   :  { %v231_v37 = vld [vmem:[#allocation0 + $0x90] sm:$0x3]   ;;  %366 = vst [vmem:[%s581_s1 + $0x22] ss:$8 sm:$0x3] %v239_v33  }
  0x1a   :  { %367 = vst [vmem:[%s581_s1 + $0x32] ss:$8 sm:$0x3] %v243_v34   ;;  %368 = vst [vmem:[%s581_s1 + $0x23] ss:$8 sm:$0x3] %v247_v35  }
  0x1b   :  { %v215_v39 = vld [vmem:[#allocation0 + $0x70] sm:$0x3]   ;;  %v219_v40 = vld [vmem:[#allocation0 + $0x78] sm:$0x3]   ;;  %v223_v41 = vld [vmem:[#allocation0 + $0x80] sm:$0x3]  }
  0x1c   :  { %363 = vst [vmem:[%s581_s1 + $0x30] ss:$8 sm:$0x3] %v227_v36   ;;  %364 = vst [vmem:[%s581_s1 + $0x21] ss:$8 sm:$0x3] %v231_v37  }
  0x1d   :  { %365 = vst [vmem:[%s581_s1 + $0x31] ss:$8 sm:$0x3] %v235_v38   ;;  %v203_v42 = vld [vmem:[#allocation0 + $0x58] sm:$0x3]  }
  0x1e   :  { %v207_v43 = vld [vmem:[#allocation0 + $0x60] sm:$0x3]   ;;  %v211_v44 = vld [vmem:[#allocation0 + $0x68] sm:$0x3]   ;;  %v199_v47 = vld [vmem:[#allocation0 + $0x50] sm:$0x3]  }
  0x1f   :  { %360 = vst [vmem:[%s581_s1 + $0x7] ss:$8 sm:$0x3] %v215_v39   ;;  %361 = vst [vmem:[%s581_s1 + $0x17] ss:$8 sm:$0x3] %v219_v40  }
  0x20   :  { %362 = vst [vmem:[%s581_s1 + $0x20] ss:$8 sm:$0x3] %v223_v41   ;;  %v191_v45 = vld [vmem:[#allocation0 + $0x40] sm:$0x3]  }
  0x21   :  { %v195_v46 = vld [vmem:[#allocation0 + $0x48] sm:$0x3]   ;;  %357 = vst [vmem:[%s581_s1 + $0x15] ss:$8 sm:$0x3] %v203_v42  }
  0x22   :  { %358 = vst [vmem:[%s581_s1 + $0x6] ss:$8 sm:$0x3] %v207_v43   ;;  %359 = vst [vmem:[%s581_s1 + $0x16] ss:$8 sm:$0x3] %v211_v44  }
  0x23   :  { %v179_v48 = vld [vmem:[#allocation0 + $0x28] sm:$0x3]   ;;  %v183_v49 = vld [vmem:[#allocation0 + $0x30] sm:$0x3]   ;;  %v187_v50 = vld [vmem:[#allocation0 + $0x38] sm:$0x3]  }
  0x24   :  { %354 = vst [vmem:[%s581_s1 + $0x4] ss:$8 sm:$0x3] %v191_v45   ;;  %355 = vst [vmem:[%s581_s1 + $0x14] ss:$8 sm:$0x3] %v195_v46  }
  0x25   :  { %356 = vst [vmem:[%s581_s1 + $0x5] ss:$8 sm:$0x3] %v199_v47   ;;  %v167_v51 = vld [vmem:[#allocation0 + $0x10] sm:$0x3]  }
  0x26   :  { %v171_v52 = vld [vmem:[#allocation0 + $0x18] sm:$0x3]   ;;  %v175_v53 = vld [vmem:[#allocation0 + $0x20] sm:$0x3]   ;;  %v163_v55 = vld [vmem:[#allocation0 + $0x8] sm:$0x3]  }
  0x27   :  { %351 = vst [vmem:[%s581_s1 + $0x12] ss:$8 sm:$0x3] %v179_v48   ;;  %352 = vst [vmem:[%s581_s1 + $0x3] ss:$8 sm:$0x3] %v183_v49  }
  0x28   :  { %353 = vst [vmem:[%s581_s1 + $0x13] ss:$8 sm:$0x3] %v187_v50   ;;  %v160_v54 = vld [vmem:[#allocation0] sm:$0x3]  }
  0x29   :  { %348 = vst [vmem:[%s581_s1 + $0x1] ss:$8 sm:$0x3] %v167_v51   ;;  %349 = vst [vmem:[%s581_s1 + $0x11] ss:$8 sm:$0x3] %v171_v52  }
  0x2a   :  { %350 = vst [vmem:[%s581_s1 + $0x2] ss:$8 sm:$0x3] %v175_v53   ;;  %v255_v56 = vld [vmem:[#allocation0 + $0xc0] sm:$0x3]  }
  0x2b   :  { %161 = vst [vmem:[%s581_s1] ss:$8 sm:$0x3] %v160_v54   ;;  %347 = vst [vmem:[%s581_s1 + $0x10] ss:$8 sm:$0x3] %v163_v55  }
  0x2c   :  { %370 = vst [vmem:[%s581_s1 + $0x24] ss:$8 sm:$0x3] %v255_v56   ;;  %v259_v57 = vld [vmem:[#allocation0 + $0xc8] sm:$0x3]  }
  0x2d   :  { %v263_v58 = vld [vmem:[#allocation0 + $0xd0] sm:$0x3]   ;;  %v267_v59 = vld [vmem:[#allocation0 + $0xd8] sm:$0x3]   ;;  %v271_v60 = vld [vmem:[#allocation0 + $0xe0] sm:$0x3]  }
  0x2e   :  { %371 = vst [vmem:[%s581_s1 + $0x34] ss:$8 sm:$0x3] %v259_v57   ;;  %372 = vst [vmem:[%s581_s1 + $0x25] ss:$8 sm:$0x3] %v263_v58  }
  0x2f   :  { %373 = vst [vmem:[%s581_s1 + $0x35] ss:$8 sm:$0x3] %v267_v59   ;;  %v275_v61 = vld [vmem:[#allocation0 + $0xe8] sm:$0x3]  }
  0x30   :  { %v279_v62 = vld [vmem:[#allocation0 + $0xf0] sm:$0x3]   ;;  %374 = vst [vmem:[%s581_s1 + $0x26] ss:$8 sm:$0x3] %v271_v60  }
  0x31   :  { %375 = vst [vmem:[%s581_s1 + $0x36] ss:$8 sm:$0x3] %v275_v61   ;;  %376 = vst [vmem:[%s581_s1 + $0x27] ss:$8 sm:$0x3] %v279_v62  }
  0x32   :  { %v283_v63 = vld [vmem:[#allocation0 + $0xf8] sm:$0x3]  }
  0x33   :  { %377 = vst [vmem:[%s581_s1 + $0x37] ss:$8 sm:$0x3] %v283_v63  }

// kernel: autoencoder_forward.7
= control target key start
LH: loop header
LB: loop body
LE: loop exit
PB: predicated region body
PF: predicated region fallthrough
CT: control target
= control target key end

     0   :  { %v966_v3 = vmov 0   ;;  %vm642_vm0 = vcmask 1043456   ;;  %s1285_s3 = inlined_call_operand.vmem [shape: bf16[128,1024], index: 3, kind: input, shape index: {}]   ;;  %s1286_s0 = inlined_call_operand.vmem [shape: bf16[4,128], index: 0, kind: input, shape index: {}]   ;;  %s1287_s1 = inlined_call_operand.vmem [shape: f32[1,128], index: 1, kind: input, shape index: {}]   ;;  %s1288_s2 = inlined_call_operand.vmem [shape: f32[1,128], index: 2, kind: input, shape index: {}]   ;;  %s1289_s4 = inlined_call_operand.vmem [shape: bf16[4,1024], index: 4, kind: output, shape index: {0}]   ;;  %s1290_s5 = inlined_call_operand.vmem [shape: f32[1,1,1024], index: 5, kind: output, shape index: {1}]   ;;  %s1291_s6 = inlined_call_operand.vmem [shape: f32[1,1,1024], index: 6, kind: output, shape index: {2}]  }
   0x1   :  { %v39_v0 = vld [vmem:[%s1285_s3] sm:$0xff]  ;;  %v40_v2 = vld [vmem:[%s1285_s3 + $0x8] sm:$0xff]  ;;  %456 = vmatprep.mubr.bf16.mxu0 %v966_v3  ;;  %497 = vmatprep.mubr.bf16.mxu1 %v966_v3 }
   0x2   :  { %v43_v1 = vld [vmem:[%s1285_s3 + $0x20] sm:$0xff]  ;;  %v44_v5 = vld [vmem:[%s1285_s3 + $0x28] sm:$0xff] }
   0x3   :  { %v896_v4 = vcombine.high %v39_v0, %v43_v1  ;;  %v895_v6 = vcombine.low %v39_v0, %v43_v1  ;;  %v47_v7 = vld [vmem:[%s1285_s3 + $0x40] sm:$0xff]  ;;  %v898_v9 = vcombine.high %v40_v2, %v44_v5  ;;  %v897_v10 = vcombine.low %v40_v2, %v44_v5  ;;  %v48_v12 = vld [vmem:[%s1285_s3 + $0x48] sm:$0xff]  ;;  %v41_v5 = vld [vmem:[%s1285_s3 + $0x10] sm:$0xff] }
   0x4   :  { %v51_v8 = vld [vmem:[%s1285_s3 + $0x60] sm:$0xff]  ;;  %v52_v13 = vld [vmem:[%s1285_s3 + $0x68] sm:$0xff] }
   0x5   :  { %v904_v11 = vcombine.high %v47_v7, %v51_v8  ;;  %v55_v14 = vld [vmem:[%s1285_s3 + $0x80] sm:$0xff]  ;;  %424 = vmatprep.subr.bf16.mxu0 %v896_v4  ;;  %v906_v15 = vcombine.high %v48_v12, %v52_v13  ;;  %v56_v17 = vld [vmem:[%s1285_s3 + $0x88] sm:$0xff]  ;;  %465 = vmatprep.subr.bf16.mxu1 %v898_v9  ;;  %v903_v19 = vcombine.low %v47_v7, %v51_v8  ;;  %v42_v8 = vld [vmem:[%s1285_s3 + $0x18] sm:$0xff] }
   0x6   :  { %v59_v16 = vld [vmem:[%s1285_s3 + $0xa0] sm:$0xff]  ;;  %v60_v18 = vld [vmem:[%s1285_s3 + $0xa8] sm:$0xff]  ;;  %425 = vmatpush1.bf16.msra.mxu0 %v895_v6  ;;  %466 = vmatpush1.bf16.msra.mxu1 %v897_v10  ;;  %v905_v20 = vcombine.low %v48_v12, %v52_v13  ;;  %v45_v6 = vld [vmem:[%s1285_s3 + $0x30] sm:$0xff] }
   0x7   :  { %426 = vmatprep.subr.bf16.mxu0 %v904_v11  ;;  %v912_v21 = vcombine.high %v55_v14, %v59_v16  ;;  %467 = vmatprep.subr.bf16.mxu1 %v906_v15  ;;  %v914_v22 = vcombine.high %v56_v17, %v60_v18  ;;  %v63_v23 = vld [vmem:[%s1285_s3 + $0xc0] sm:$0xff]  ;;  %v64_v25 = vld [vmem:[%s1285_s3 + $0xc8] sm:$0xff]  ;;  %v911_v27 = vcombine.low %v55_v14, %v59_v16  ;;  %v46_v9 = vld [vmem:[%s1285_s3 + $0x38] sm:$0xff] }
   0x8   :  { %v67_v24 = vld [vmem:[%s1285_s3 + $0xe0] sm:$0xff]  ;;  %v68_v26 = vld [vmem:[%s1285_s3 + $0xe8] sm:$0xff]  ;;  %v913_v28 = vcombine.low %v56_v17, %v60_v18  ;;  %v900_v12 = vcombine.high %v41_v5, %v45_v6  ;;  %v902_v13 = vcombine.high %v42_v8, %v46_v9  ;;  %v49_v14 = vld [vmem:[%s1285_s3 + $0x50] sm:$0xff] }
   0x9   :  { %v920_v29 = vcombine.high %v63_v23, %v67_v24  ;;  %v922_v30 = vcombine.high %v64_v25, %v68_v26  ;;  %v71_v31 = vld [vmem:[%s1285_s3 + $0x100] sm:$0xff]  ;;  %v72_v33 = vld [vmem:[%s1285_s3 + $0x108] sm:$0xff]  ;;  %v919_v35 = vcombine.low %v63_v23, %v67_v24  ;;  %v921_v36 = vcombine.low %v64_v25, %v68_v26  ;;  %v53_v15 = vld [vmem:[%s1285_s3 + $0x70] sm:$0xff] }
   0xa   :  { %427 = vmatpush1.bf16.msra.mxu0 %v903_v19  ;;  %468 = vmatpush1.bf16.msra.mxu1 %v905_v20  ;;  %v75_v32 = vld [vmem:[%s1285_s3 + $0x120] sm:$0xff]  ;;  %v76_v34 = vld [vmem:[%s1285_s3 + $0x128] sm:$0xff]  ;;  %v50_v17 = vld [vmem:[%s1285_s3 + $0x58] sm:$0xff]  ;;  %v899_v19 = vcombine.low %v41_v5, %v45_v6  ;;  %v901_v20 = vcombine.low %v42_v8, %v46_v9  ;;  %v967_v9 = vmov 1983009808  }
   0xb   :  { %428 = vmatprep.subr.bf16.mxu0 %v912_v21  ;;  %469 = vmatprep.subr.bf16.mxu1 %v914_v22  ;;  %v928_v37 = vcombine.high %v71_v31, %v75_v32  ;;  %v930_v38 = vcombine.high %v72_v33, %v76_v34  ;;  %v79_v39 = vld [vmem:[%s1285_s3 + $0x140] sm:$0xff]  ;;  %v80_v41 = vld [vmem:[%s1285_s3 + $0x148] sm:$0xff]  ;;  %v927_v43 = vcombine.low %v71_v31, %v75_v32  ;;  %v54_v18 = vld [vmem:[%s1285_s3 + $0x78] sm:$0xff] }
   0xc   :  { %v83_v40 = vld [vmem:[%s1285_s3 + $0x160] sm:$0xff]  ;;  %v84_v42 = vld [vmem:[%s1285_s3 + $0x168] sm:$0xff]  ;;  %v929_v45 = vcombine.low %v72_v33, %v76_v34  ;;  %v908_v21 = vcombine.high %v49_v14, %v53_v15  ;;  %v910_v22 = vcombine.high %v50_v17, %v54_v18  ;;  %v57_v23 = vld [vmem:[%s1285_s3 + $0x90] sm:$0xff] }
   0xd   :  { %v21_v44 = vld [vmem:[%s1286_s0] sm:$0x3]  ;;  %v936_v46 = vcombine.high %v79_v39, %v83_v40  ;;  %v938_v47 = vcombine.high %v80_v41, %v84_v42  ;;  %v88_v50 = vld [vmem:[%s1285_s3 + $0x188] sm:$0xff]  ;;  %v935_v53 = vcombine.low %v79_v39, %v83_v40  ;;  %v937_v55 = vcombine.low %v80_v41, %v84_v42  ;;  %v61_v24 = vld [vmem:[%s1285_s3 + $0xb0] sm:$0xff] }
   0xe   :  { %429 = vmatpush1.bf16.msra.mxu0 %v911_v27  ;;  %470 = vmatpush1.bf16.msra.mxu1 %v913_v28  ;;  %v87_v48 = vld [vmem:[%s1285_s3 + $0x180] sm:$0xff]  ;;  %v92_v51 = vld [vmem:[%s1285_s3 + $0x1a8] sm:$0xff]  ;;  %v22_v52 = vunpack.c.l.bf16 %v21_v44  ;;  %v58_v25 = vld [vmem:[%s1285_s3 + $0x98] sm:$0xff]  ;;  %v907_v27 = vcombine.low %v49_v14, %v53_v15  ;;  %v909_v28 = vcombine.low %v50_v17, %v54_v18 }
   0xf   :  { %430 = vmatprep.subr.bf16.mxu0 %v920_v29  ;;  %471 = vmatprep.subr.bf16.mxu1 %v922_v30  ;;  %v91_v49 = vld [vmem:[%s1285_s3 + $0x1a0] sm:$0xff]  ;;  %v946_v57 = vcombine.high %v88_v50, %v92_v51  ;;  %v96_v60 = vld [vmem:[%s1285_s3 + $0x1c8] sm:$0xff]  ;;  %v945_v1 = vcombine.low %v88_v50, %v92_v51  ;;  %v62_v26 = vld [vmem:[%s1285_s3 + $0xb8] sm:$0xff]  ;;  %v916_v29 = vcombine.high %v57_v23, %v61_v24 }
  0x10   :  { %v893_v54 = vld [vmem:[%s1287_s1] ss:$0 sm:$0xff]  ;;  %v944_v56 = vcombine.high %v87_v48, %v91_v49  ;;  %v100_v61 = vld [vmem:[%s1285_s3 + $0x1e8] sm:$0xff]  ;;  %v943_v63 = vcombine.low %v87_v48, %v91_v49  ;;  %v918_v30 = vcombine.high %v58_v25, %v62_v26  ;;  %v65_v31 = vld [vmem:[%s1285_s3 + $0xd0] sm:$0xff] }
  0x11   :  { %v95_v58 = vld [vmem:[%s1285_s3 + $0x1c0] sm:$0xff]  ;;  %v30_v62 = vmul.f32 %v893_v54, %v22_v52  ;;  %v954_v4 = vcombine.high %v96_v60, %v100_v61  ;;  %v953_v11 = vcombine.low %v96_v60, %v100_v61  ;;  %v69_v32 = vld [vmem:[%s1285_s3 + $0xf0] sm:$0xff]  ;;  %v66_v33 = vld [vmem:[%s1285_s3 + $0xd8] sm:$0xff] }
  0x12   :  { %431 = vmatpush1.bf16.msra.mxu0 %v919_v35  ;;  %472 = vmatpush1.bf16.msra.mxu1 %v921_v36  ;;  %v99_v59 = vld [vmem:[%s1285_s3 + $0x1e0] sm:$0xff]  ;;  %v70_v34 = vld [vmem:[%s1285_s3 + $0xf8] sm:$0xff]  ;;  %v915_v35 = vcombine.low %v57_v23, %v61_v24  ;;  %v917_v36 = vcombine.low %v58_v25, %v62_v26  ;;  %v73_v39 = vld [vmem:[%s1285_s3 + $0x110] sm:$0xff]  ;;  %v923_v42 = vcombine.low %v65_v31, %v69_v32 }
  0x13   :  { %432 = vmatprep.subr.bf16.mxu0 %v928_v37  ;;  %473 = vmatprep.subr.bf16.mxu1 %v930_v38  ;;  %v894_v0 = vld [vmem:[%s1288_s2] ss:$0 sm:$0xff]  ;;  %v952_v2 = vcombine.high %v95_v58, %v99_v59  ;;  %v951_v10 = vcombine.low %v95_v58, %v99_v59  ;;  %v924_v37 = vcombine.high %v65_v31, %v69_v32  ;;  %v77_v40 = vld [vmem:[%s1285_s3 + $0x130] sm:$0xff]  ;;  %v78_v41 = vld [vmem:[%s1285_s3 + $0x138] sm:$0xff] }
  0x14   :  { %v38_v7 = vadd.f32 %v894_v0, %v30_v62  ;;  %v926_v38 = vcombine.high %v66_v33, %v70_v34  ;;  %v932_v44 = vcombine.high %v73_v39, %v77_v40  ;;  %v82_v48 = vld [vmem:[%s1285_s3 + $0x158] sm:$0xff]  ;;  %v931_v50 = vcombine.low %v73_v39, %v77_v40  ;;  %v89_v54 = vld [vmem:[%s1285_s3 + $0x190] sm:$0xff] }
  0x15   :  { %v86_v49 = vld [vmem:[%s1285_s3 + $0x178] sm:$0xff]  ;;  %v97_v62 = vld [vmem:[%s1285_s3 + $0x1d0] sm:$0xff] }
  0x16   :  { %433 = vmatpush1.bf16.msra.mxu0 %v927_v43  ;;  %474 = vmatpush1.bf16.msra.mxu1 %v929_v45  ;;  %v1129_v16 = vpack.c.bf16 %v38_v7, %v38_v7  ;;  %v925_v43 = vcombine.low %v66_v33, %v70_v34  ;;  %v941_v59 = vcombine.low %v82_v48, %v86_v49  ;;  %v98_v0 = vld [vmem:[%s1285_s3 + $0x1d8] sm:$0xff] }
  0x17   :  { %434 = vmatprep.subr.bf16.mxu0 %v936_v46  ;;  %475 = vmatprep.subr.bf16.mxu1 %v938_v47  ;;  %v81_v46 = vld [vmem:[%s1285_s3 + $0x150] sm:$0xff] }
  0x18   :  { %v85_v47 = vld [vmem:[%s1285_s3 + $0x170] sm:$0xff] }
  0x19   :  { %v940_v52 = vcombine.high %v81_v46, %v85_v47  ;;  %v939_v58 = vcombine.low %v81_v46, %v85_v47 }
  0x1a   :  { %435 = vmatpush1.bf16.msra.mxu0 %v935_v53  ;;  %476 = vmatpush1.bf16.msra.mxu1 %v937_v55  ;;  %v942_v53 = vcombine.high %v82_v48, %v86_v49  ;;  %v93_v55 = vld [vmem:[%s1285_s3 + $0x1b0] sm:$0xff] }
  0x1b   :  { %436 = vmatprep.subr.bf16.mxu0 %v944_v56  ;;  %477 = vmatprep.subr.bf16.mxu1 %v946_v57  ;;  %v90_v56 = vld [vmem:[%s1285_s3 + $0x198] sm:$0xff]  ;;  %v948_v60 = vcombine.high %v89_v54, %v93_v55 }
  0x1c   :  { %v94_v57 = vld [vmem:[%s1285_s3 + $0x1b8] sm:$0xff] }
  0x1d   :  { %v950_v61 = vcombine.high %v90_v56, %v94_v57 }
  0x1e   :  { %437 = vmatpush1.bf16.msra.mxu0 %v943_v63  ;;  %478 = vmatpush1.bf16.msra.mxu1 %v945_v1  ;;  %v101_v63 = vld [vmem:[%s1285_s3 + $0x1f0] sm:$0xff]  ;;  %v102_v1 = vld [vmem:[%s1285_s3 + $0x1f8] sm:$0xff] }
  0x1f   :  { %438 = vmatprep.subr.bf16.mxu0 %v952_v2  ;;  %479 = vmatprep.subr.bf16.mxu1 %v954_v4  ;;  %v947_v2 = vcombine.low %v89_v54, %v93_v55  ;;  %v949_v4 = vcombine.low %v90_v56, %v94_v57  ;;  %v956_v5 = vcombine.high %v97_v62, %v101_v63 }
  0x20   :  { %v958_v6 = vcombine.high %v98_v0, %v102_v1  ;;  %v955_v7 = vcombine.low %v97_v62, %v101_v63  ;;  %v957_v8 = vcombine.low %v98_v0, %v102_v1 }
  0x22   :  { %439 = vmatpush1.bf16.msra.mxu0 %v951_v10  ;;  %480 = vmatpush1.bf16.msra.mxu1 %v953_v11  ;;  %v607_v10 = vunpack.c.l.s4 %v967_v9  ;;  %v609_v11 = vlaneseq }
  0x23   :  { %506 = vmatprep.subr.bf16.mxu0 %v900_v12  ;;  %547 = vmatprep.subr.bf16.mxu1 %v902_v13 }
  0x24   :  { %v608_v12 = vunpack.c.0.s8 %v607_v10  ;;  %v1215_v13 = vshrl.u32 %v609_v11, 7 }
  0x25   :  { %457 = vmatmul.mubr.bf16.vlgmr.msra.gmra.mrb[0].mxu0 %v1129_v16  ;;  %498 = vmatmul.mubr.bf16.vlgmr.msra.gmra.mrb[0].mxu1 %v1129_v16 }
  0x26   :  { %507 = vmatpush1.bf16.msra.mxu0 %v899_v19  ;;  %548 = vmatpush1.bf16.msra.mxu1 %v901_v20  ;;  %v1218_v15 = vsub.s32 %v608_v12, %v1215_v13 }
  0x27   :  { %508 = vmatprep.subr.bf16.mxu0 %v908_v21  ;;  %549 = vmatprep.subr.bf16.mxu1 %v910_v22  ;;  %v968_v21 = vmov 1966171168  }
  0x28   :  { %538 = vmatprep.mubr.bf16.mxu0 %v966_v3  ;;  %579 = vmatprep.mubr.bf16.mxu1 %v966_v3  ;;  %v74_v3 = vld [vmem:[%s1285_s3 + $0x118] sm:$0xff]  ;;  %v712_v22 = vunpack.c.l.s4 %v968_v21 }
  0x29   :  { %v934_v45 = vcombine.high %v74_v3, %v78_v41  ;;  %v933_v51 = vcombine.low %v74_v3, %v78_v41 }
  0x2a   :  { %509 = vmatpush1.bf16.msra.mxu0 %v907_v27  ;;  %550 = vmatpush1.bf16.msra.mxu1 %v909_v28  ;;  %v713_v1 = vunpack.c.0.s8 %v712_v22 }
  0x2b   :  { %510 = vmatprep.subr.bf16.mxu0 %v916_v29  ;;  %551 = vmatprep.subr.bf16.mxu1 %v918_v30 }
  0x2e   :  { %511 = vmatpush1.bf16.msra.mxu0 %v915_v35  ;;  %552 = vmatpush1.bf16.msra.mxu1 %v917_v36 }
  0x2f   :  { %512 = vmatprep.subr.bf16.mxu0 %v924_v37  ;;  %553 = vmatprep.subr.bf16.mxu1 %v926_v38 }
  0x32   :  { %513 = vmatpush1.bf16.msra.mxu0 %v923_v42  ;;  %554 = vmatpush1.bf16.msra.mxu1 %v925_v43 }
  0x33   :  { %514 = vmatprep.subr.bf16.mxu0 %v932_v44  ;;  %555 = vmatprep.subr.bf16.mxu1 %v934_v45 }
  0x36   :  { %515 = vmatpush1.bf16.msra.mxu0 %v931_v50  ;;  %556 = vmatpush1.bf16.msra.mxu1 %v933_v51 }
  0x37   :  { %516 = vmatprep.subr.bf16.mxu0 %v940_v52  ;;  %557 = vmatprep.subr.bf16.mxu1 %v942_v53 }
  0x3a   :  { %517 = vmatpush1.bf16.msra.mxu0 %v939_v58  ;;  %558 = vmatpush1.bf16.msra.mxu1 %v941_v59 }
  0x3b   :  { %518 = vmatprep.subr.bf16.mxu0 %v948_v60  ;;  %559 = vmatprep.subr.bf16.mxu1 %v950_v61 }
  0x3e   :  { %519 = vmatpush1.bf16.msra.mxu0 %v947_v2  ;;  %560 = vmatpush1.bf16.msra.mxu1 %v949_v4 }
  0x3f   :  { %520 = vmatprep.subr.bf16.mxu0 %v956_v5  ;;  %561 = vmatprep.subr.bf16.mxu1 %v958_v6 }
  0x42   :  { %521 = vmatpush1.bf16.msra.mxu0 %v955_v7  ;;  %562 = vmatpush1.bf16.msra.mxu1 %v957_v8 }
  0x45   :  { %539 = vmatmul.mubr.bf16.vlgmr.msra.gmra.mrb[4].mxu0 %v1129_v16  ;;  %580 = vmatmul.mubr.bf16.vlgmr.msra.gmra.mrb[4].mxu1 %v1129_v16 }
  0xf8   :  { %v458_v14 = vpop.f32.mrb[0].mxu0  ;;  %v499_v19 = vpop.f32.mrb[0].mxu1 }
  0xf9   :  { %v643_v17 = vsel %vm642_vm0, %v458_v14, 0.0  ;;  %v758_v18 = vmul.f32 %v458_v14, %v458_v14  ;;  %v460_v20 = vpop.f32.mrb[1].mxu0  ;;  %v657_v16 = vsel %vm642_vm0, %v499_v19, 0.0  ;;  %v760_v24 = vmul.f32 %v499_v19, %v499_v19  ;;  %v501_v26 = vpop.f32.mrb[1].mxu1 }
  0xfa   :  { %v644_v23 = vrot.slane %v643_v17, 4  ;;  %v959_v25 = vpack.c.bf16 %v460_v20, %v458_v14  ;;  %v462_v27 = vpop.f32.mrb[2].mxu0  ;;  %v658_v29 = vrot.slane %v657_v16, 4  ;;  %v650_v30 = vsel %vm642_vm0, %v460_v20, 0.0  ;;  %v503_v32 = vpop.f32.mrb[2].mxu1 }
  0xfb   :  { %v766_v28 = vsel %vm642_vm0, %v758_v18, 0.0  ;;  %v759_v31 = vmul.f32 %v460_v20, %v460_v20  ;;  %v463_v33 = vpop.f32.mrb[3].mxu0  ;;  %v780_v36 = vsel %vm642_vm0, %v760_v24, 0.0  ;;  %v504_v38 = vpop.f32.mrb[3].mxu1  ;;  %v651_v3 = vrot.slane %v650_v30, 4 }
  0xfc   :  { %v645_v34 = vadd.f32 %v644_v23, %v643_v17  ;;  %v767_v35 = vrot.slane %v766_v28, 4  ;;  %v612_v37 = vrot.slane %v959_v25, %v1218_v15  ;;  %v659_v39 = vadd.f32 %v658_v29, %v657_v16 }
  0xfd   :  { %v781_v40 = vrot.slane %v780_v36, 4  ;;  %v773_v41 = vsel %vm642_vm0, %v759_v31, 0.0  ;;  %v960_v45 = vpack.c.bf16 %v501_v26, %v499_v19  ;;  %v652_v48 = vadd.f32 %v651_v3, %v650_v30 }
  0xfe   :  { %v646_v42 = vrot.slane %v645_v34, 2  ;;  %v768_v43 = vadd.f32 %v767_v35, %v766_v28  ;;  %v774_v44 = vrot.slane %v773_v41, 4  ;;  %v660_v46 = vrot.slane %v659_v39, 2 }
  0xff   :  { %v782_v47 = vadd.f32 %v781_v40, %v780_v36  ;;  %v664_v49 = vsel %vm642_vm0, %v501_v26, 0.0  ;;  %v619_v53 = vrot.slane %v960_v45, %v1218_v15  ;;  %v653_v55 = vrot.slane %v652_v48, 2 }
 0x100   :  { %v647_v50 = vadd.f32 %v646_v42, %v645_v34  ;;  %v769_v51 = vrot.slane %v768_v43, 2  ;;  %v775_v52 = vadd.f32 %v774_v44, %v773_v41  ;;  %v661_v54 = vadd.f32 %v660_v46, %v659_v39 }
 0x101   :  { %v665_v56 = vrot.slane %v664_v49, 4  ;;  %v620_v60 = vcombine.low %v612_v37, %v619_v53  ;;  %v783_v61 = vrot.slane %v782_v47, 2  ;;  %v654_v62 = vadd.f32 %v653_v55, %v652_v48 }
 0x102   :  { %v648_v57 = vrot.slane %v647_v50, 1  ;;  %v770_v58 = vadd.f32 %v769_v51, %v768_v43  ;;  %v776_v59 = vrot.slane %v775_v52, 2  ;;  %v761_v4 = vmul.f32 %v501_v26, %v501_v26 }
 0x103   :  { %v666_v63 = vadd.f32 %v665_v56, %v664_v49  ;;  %640 = vst [vmem:[%s1289_s4] sm:$0xff] %v620_v60  ;;  %v662_v6 = vrot.slane %v661_v54, 1  ;;  %v655_v7 = vrot.slane %v654_v62, 1  ;;  %v784_v12 = vadd.f32 %v783_v61, %v782_v47 }
 0x104   :  { %v771_v0 = vrot.slane %v770_v58, 1  ;;  %v777_v2 = vadd.f32 %v776_v59, %v775_v52  ;;  %v649_v5 = vadd.f32 %v648_v57, %v647_v50  ;;  %v787_v11 = vsel %vm642_vm0, %v761_v4, 0.0 }
 0x105   :  { %v667_v8 = vrot.slane %v666_v63, 2  ;;  %v656_v14 = vadd.f32 %v655_v7, %v654_v62  ;;  %v788_v18 = vrot.slane %v787_v11, 4  ;;  %v1234_v19 = vsub.s32 %v713_v1, %v1215_v13 }
 0x106   :  { %v772_v9 = vadd.f32 %v771_v0, %v770_v58  ;;  %v778_v10 = vrot.slane %v777_v2, 1  ;;  %v663_v21 = vadd.f32 %v662_v6, %v661_v54  ;;  %v785_v25 = vrot.slane %v784_v12, 1 }
 0x107   :  { %v668_v17 = vadd.f32 %v667_v8, %v666_v63  ;;  %v707_v22 = vcombine.low %v649_v5, %v656_v14  ;;  %v789_v16 = vadd.f32 %v788_v18, %v787_v11 }
 0x108   :  { %v779_v20 = vadd.f32 %v778_v10, %v777_v2  ;;  %v786_v31 = vadd.f32 %v785_v25, %v784_v12 }
 0x109   :  { %v669_v23 = vrot.slane %v668_v17, 1  ;;  %v790_v27 = vrot.slane %v789_v16, 2  ;;  %v1237_v28 = vrot.slane %v707_v22, %v1234_v19 }
 0x10a   :  { %v830_v24 = vcombine.low %v772_v9, %v779_v20 }
 0x10b   :  { %v670_v26 = vadd.f32 %v669_v23, %v668_v17  ;;  %v791_v30 = vadd.f32 %v790_v27, %v789_v16 }
 0x10c   :  { %v1245_v35 = vrot.slane %v830_v24, %v1234_v19 }
 0x10d   :  { %v708_v29 = vcombine.low %v663_v21, %v670_v26  ;;  %v792_v13 = vrot.slane %v791_v30, 1 }
 0x10f   :  { %v1240_v32 = vrot.slane %v708_v29, %v1234_v19  ;;  %v793_v34 = vadd.f32 %v792_v13, %v791_v30 }
 0x111   :  { %v739_v33 = vcombine.low %v1237_v28, %v1240_v32  ;;  %v831_v36 = vcombine.low %v786_v31, %v793_v34 }
 0x113   :  { %v1248_v37 = vrot.slane %v831_v36, %v1234_v19 }
 0x115   :  { %v862_v38 = vcombine.low %v1245_v35, %v1248_v37 }
 0x118   :  { %v540_v39 = vpop.f32.mrb[4].mxu0  ;;  %v581_v41 = vpop.f32.mrb[4].mxu1 }
 0x119   :  { %v671_v40 = vsel %vm642_vm0, %v540_v39, 0.0  ;;  %v762_v3 = vmul.f32 %v540_v39, %v540_v39  ;;  %v542_v42 = vpop.f32.mrb[5].mxu0  ;;  %v685_v44 = vsel %vm642_vm0, %v581_v41, 0.0  ;;  %v764_v45 = vmul.f32 %v581_v41, %v581_v41  ;;  %v583_v47 = vpop.f32.mrb[5].mxu1 }
 0x11a   :  { %v672_v43 = vrot.slane %v671_v40, 4  ;;  %v961_v46 = vpack.c.bf16 %v542_v42, %v540_v39  ;;  %v544_v48 = vpop.f32.mrb[6].mxu0  ;;  %v686_v50 = vrot.slane %v685_v44, 4  ;;  %v678_v51 = vsel %vm642_vm0, %v542_v42, 0.0  ;;  %v585_v53 = vpop.f32.mrb[6].mxu1 }
 0x11b   :  { %v794_v49 = vsel %vm642_vm0, %v762_v3, 0.0  ;;  %v763_v52 = vmul.f32 %v542_v42, %v542_v42  ;;  %v545_v54 = vpop.f32.mrb[7].mxu0  ;;  %v808_v57 = vsel %vm642_vm0, %v764_v45, 0.0  ;;  %v586_v59 = vpop.f32.mrb[7].mxu1  ;;  %v679_v62 = vrot.slane %v678_v51, 4 }
 0x11c   :  { %v673_v55 = vadd.f32 %v672_v43, %v671_v40  ;;  %v795_v56 = vrot.slane %v794_v49, 4  ;;  %v629_v58 = vrot.slane %v961_v46, %v1218_v15  ;;  %v687_v60 = vadd.f32 %v686_v50, %v685_v44 }
 0x11d   :  { %v809_v61 = vrot.slane %v808_v57, 4  ;;  %v801_v63 = vsel %vm642_vm0, %v763_v52, 0.0  ;;  %v962_v4 = vpack.c.bf16 %v583_v47, %v581_v41  ;;  %v680_v7 = vadd.f32 %v679_v62, %v678_v51 }
 0x11e   :  { %v674_v0 = vrot.slane %v673_v55, 2  ;;  %v796_v1 = vadd.f32 %v795_v56, %v794_v49  ;;  %v802_v2 = vrot.slane %v801_v63, 4  ;;  %v688_v5 = vrot.slane %v687_v60, 2 }
 0x11f   :  { %v810_v6 = vadd.f32 %v809_v61, %v808_v57  ;;  %v692_v8 = vsel %vm642_vm0, %v583_v47, 0.0  ;;  %v636_v12 = vrot.slane %v962_v4, %v1218_v15  ;;  %v681_v17 = vrot.slane %v680_v7, 2 }
 0x120   :  { %v675_v9 = vadd.f32 %v674_v0, %v673_v55  ;;  %v797_v10 = vrot.slane %v796_v1, 2  ;;  %v803_v11 = vadd.f32 %v802_v2, %v801_v63  ;;  %v689_v14 = vadd.f32 %v688_v5, %v687_v60 }
 0x121   :  { %v693_v18 = vrot.slane %v692_v8, 4  ;;  %v637_v23 = vcombine.low %v629_v58, %v636_v12  ;;  %v811_v16 = vrot.slane %v810_v6, 2  ;;  %v682_v24 = vadd.f32 %v681_v17, %v680_v7 }
 0x122   :  { %v676_v20 = vrot.slane %v675_v9, 1  ;;  %v798_v21 = vadd.f32 %v797_v10, %v796_v1  ;;  %v804_v22 = vrot.slane %v803_v11, 2  ;;  %v765_v29 = vmul.f32 %v583_v47, %v583_v47 }
 0x123   :  { %v694_v25 = vadd.f32 %v693_v18, %v692_v8  ;;  %641 = vst [vmem:[%s1289_s4 + $0x8] sm:$0xff] %v637_v23  ;;  %v690_v31 = vrot.slane %v689_v14, 1  ;;  %v683_v15 = vrot.slane %v682_v24, 1  ;;  %v812_v40 = vadd.f32 %v811_v16, %v810_v6 }
 0x124   :  { %v799_v26 = vrot.slane %v798_v21, 1  ;;  %v805_v27 = vadd.f32 %v804_v22, %v803_v11  ;;  %v677_v30 = vadd.f32 %v676_v20, %v675_v9  ;;  %v815_v39 = vsel %vm642_vm0, %v765_v29, 0.0 }
 0x125   :  { %v695_v13 = vrot.slane %v694_v25, 2  ;;  %v684_v3 = vadd.f32 %v683_v15, %v682_v24  ;;  %v816_v42 = vrot.slane %v815_v39, 4  ;;  %v691_v44 = vadd.f32 %v690_v31, %v689_v14 }
 0x126   :  { %v800_v34 = vadd.f32 %v799_v26, %v798_v21  ;;  %v806_v36 = vrot.slane %v805_v27, 1  ;;  %v813_v50 = vrot.slane %v812_v40, 1  ;;  %v747_v60 = vrot.slane %v739_v33, %v1234_v19 }
 0x127   :  { %v696_v41 = vadd.f32 %v695_v13, %v694_v25  ;;  %v709_v45 = vcombine.low %v677_v30, %v684_v3  ;;  %v817_v48 = vadd.f32 %v816_v42, %v815_v39  ;;  %v870_v4 = vrot.slane %v862_v38, %v1234_v19 }
 0x128   :  { %v807_v43 = vadd.f32 %v806_v36, %v805_v27  ;;  %v814_v55 = vadd.f32 %v813_v50, %v812_v40 }
 0x129   :  { %v697_v46 = vrot.slane %v696_v41, 1  ;;  %v818_v51 = vrot.slane %v817_v48, 2  ;;  %v731_v52 = vrot.slane %v709_v45, %v1234_v19 }
 0x12a   :  { %v832_v49 = vcombine.low %v800_v34, %v807_v43 }
 0x12b   :  { %v698_v47 = vadd.f32 %v697_v46, %v696_v41  ;;  %v819_v54 = vadd.f32 %v818_v51, %v817_v48 }
 0x12c   :  { %v854_v61 = vrot.slane %v832_v49, %v1234_v19 }
 0x12d   :  { %v710_v53 = vcombine.low %v691_v44, %v698_v47  ;;  %v820_v57 = vrot.slane %v819_v54, 1 }
 0x12f   :  { %v738_v56 = vrot.slane %v710_v53, %v1234_v19  ;;  %v821_v59 = vadd.f32 %v820_v57, %v819_v54 }
 0x131   :  { %v740_v58 = vcombine.low %v731_v52, %v738_v56  ;;  %v833_v63 = vcombine.low %v814_v55, %v821_v59 }
 0x133   :  { %v754_v62 = vrot.slane %v740_v58, %v1234_v19  ;;  %v861_v1 = vrot.slane %v833_v63, %v1234_v19 }
 0x135   :  { %v755_v0 = vcombine.low %v747_v60, %v754_v62  ;;  %v863_v2 = vcombine.low %v854_v61, %v861_v1 }
 0x137   :  { %757 = vst [vmem:[%s1290_s5] sm:$0xff] %v755_v0  ;;  %v877_v28 = vrot.slane %v863_v2, %v1234_v19 }
 0x139   :  { %v878_v32 = vcombine.low %v870_v4, %v877_v28 }
 0x13b   :  { %880 = vst [vmem:[%s1291_s6] sm:$0xff] %v878_v32 }

// kernel: autoencoder_forward.8
= control target key start
LH: loop header
LB: loop body
LE: loop exit
PB: predicated region body
PF: predicated region fallthrough
CT: control target
= control target key end

     0   :  { %s663_s21 = smov 0   ;;  %s728_s0 = inlined_call_operand.vmem [shape: bf16[32,128], index: 0, kind: input, shape index: {}]   ;;  %s729_s1 = inlined_call_operand.vmem [shape: f32[1,128], index: 1, kind: input, shape index: {}]   ;;  %s730_s2 = inlined_call_operand.vmem [shape: f32[1,128], index: 2, kind: input, shape index: {}]   ;;  %s731_s3 = inlined_call_operand.vmem [shape: bf16[128,128], index: 3, kind: input, shape index: {}]   ;;  %s732_s4 = inlined_call_operand.vmem [shape: bf16[32,128], index: 4, kind: output, shape index: {0}]   ;;  %s733_s5 = inlined_call_operand.vmem [shape: f32[2,1,128], index: 5, kind: output, shape index: {1}]   ;;  %s734_s6 = inlined_call_operand.vmem [shape: f32[2,1,128], index: 6, kind: output, shape index: {2}]  }
   0x1 LB: > { %s669_s22 = sadd.s32 4294967295, %s624_s21   ;;  %p541_p0 = scmp.ge.s32.totalorder %s624_s21, 1  ;;  %s624_s21 = sphi %s663_s21, %s17_s21  }
   0x2   : > { %p218_p1 = scmp.lt.s32.totalorder %s624_s21, 3 }
   0x4   : > { %p219_p2 = pnand %p541_p0, %p218_p1 }
   0x5   : > { %v610_v0 = vld [vmem:[%s731_s3] sm:$0xff] (!%p219_p2)   ;;  %v626_v1 = vmov (!%p219_p2), 0.0   ;;  %v611_v2 = vld [vmem:[%s731_s3 + $0x8] sm:$0xff] (!%p219_p2)   ;;  %vm627_vm0 = vmmov (!%p219_p2), 0   ;;  %s542_s27 = sshll.u32 (!%p219_p2), %s669_s22, 1  ;;  %v612_v3 = vld [vmem:[%s731_s3 + $0x10] sm:$0xff] (!%p219_p2)  }
   0x6   : > { %222 = sbr.rel (%p219_p2) target bundleno = 269 (0x10d), region = 36  ;;  %580 = vmatprep.subr.bf16.mxu0 (!%p219_p2), %v626_v1  ;;  %596 = vmatprep.mubr.msk.bf16.mxu0 (!%p219_p2), %vm627_vm0, %v626_v1  ;;  %p255_p3 = scmp.lt.s32.totalorder (!%p219_p2), %s542_s27, 3  ;;  %v613_v4 = vld [vmem:[%s731_s3 + $0x18] sm:$0xff] (!%p219_p2)   ;;  %v614_v8 = vld [vmem:[%s731_s3 + $0x20] sm:$0xff] (!%p219_p2)   ;;  %v615_v12 = vld [vmem:[%s731_s3 + $0x28] sm:$0xff] (!%p219_p2)  }
   0x7   : > { %581 = vmatpush3.bf16.msra.mxu0 (!%p219_p2), %v610_v0  ;;  %v546_v9 = vld [vmem:[%s729_s1] ss:$0 sm:$0xff] (!%p219_p2)  ;;  %v616_v16 = vld [vmem:[%s731_s3 + $0x30] sm:$0xff] (!%p219_p2)   ;;  %v617_v19 = vld [vmem:[%s731_s3 + $0x38] sm:$0xff] (!%p219_p2)   ;;  %p266_p4 = scmp.lt.s32.totalorder (!%p219_p2), %s669_s22, 1 }
   0x8   : > { %582 = vmatprep.subr.bf16.mxu0 (!%p219_p2), %v626_v1  ;;  %v547_v13 = vld [vmem:[%s730_s2] ss:$0 sm:$0xff] (!%p219_p2) }
   0xb   : > { %583 = vmatpush3.bf16.msra.mxu0 (!%p219_p2), %v611_v2 }
   0xc   : > { %584 = vmatprep.subr.bf16.mxu0 (!%p219_p2), %v626_v1 }
   0xd   : > { %s736_s27 = smov (!%p255_p3, %s542_s27), 3  ;;  %s738_s22 = smov (!%p266_p4, %s669_s22), 1 }
   0xe   : > { %s543_s30 = sshll.u32 %s736_s27, 2  ;;  %s268_s7 = scalar_lea.vmem %s733_s5, %s738_s22 }
   0xf   : > { %s258_s9 = scalar_lea.vmem %s728_s0, %s543_s30  ;;  %585 = vmatpush3.bf16.msra.mxu0 %v612_v3  ;;  %s264_s29 = scalar_lea.vmem %s732_s4, %s543_s30 }
  0x10   : > { %v563_v5 = vld [vmem:[%s258_s9] sm:$0xff]   ;;  %586 = vmatprep.subr.bf16.mxu0 %v626_v1  ;;  %s271_s10 = scalar_lea.vmem %s734_s6, %s738_s22 }
  0x11   : > { %v564_v6 = vunpack.c.l.bf16 %v563_v5  ;;  %v565_v7 = vunpack.c.h.bf16 %v563_v5 }
  0x13   : > { %587 = vmatpush3.bf16.msra.mxu0 %v613_v4  ;;  %v284_v10 = vmul.f32 %v564_v6, %v546_v9  ;;  %v285_v11 = vmul.f32 %v565_v7, %v546_v9 }
  0x14   : > { %588 = vmatprep.subr.bf16.mxu0 %v626_v1 }
  0x15   : > { %v293_v14 = vadd.f32 %v547_v13, %v284_v10  ;;  %v294_v15 = vadd.f32 %v547_v13, %v285_v11 }
  0x17   : > { %589 = vmatpush3.bf16.msra.mxu0 %v614_v8  ;;  %v295_v17 = vmax.f32 %v293_v14, 0.0  ;;  %v296_v18 = vmax.f32 %v294_v15, 0.0 }
  0x18   : > { %590 = vmatprep.subr.bf16.mxu0 %v626_v1 }
  0x19   : > { %v313_v20 = vpack.c.bf16 %v296_v18, %v295_v17 }
  0x1b   : > { %591 = vmatpush3.bf16.msra.mxu0 %v615_v12 }
  0x1c   : > { %592 = vmatprep.subr.bf16.mxu0 %v626_v1 }
  0x1f   : > { %593 = vmatpush3.bf16.msra.mxu0 %v616_v16 }
  0x20   : > { %594 = vmatprep.subr.bf16.mxu0 %v626_v1 }
  0x23   : > { %595 = vmatpush3.bf16.msra.mxu0 %v617_v19 }
  0x26   : > { %597 = vmatmul.mubr.bf16.vlgmr.msra.gmra.mrb[0].mxu0 %v313_v20 }
  0xf9   : > { %v396_v21 = vpop.f32.mrb[0].mxu0 }
  0xfa   : > { %v598_v22 = vpop.f32.mrb[1].mxu0  ;;  %v421_v24 = vmul.f32 %v396_v21, %v396_v21 }
  0xfb   : > { %v399_v23 = vpop.f32.mrb[2].mxu0 }
  0xfc   : > { %v569_v25 = vpack.c.bf16 %v399_v23, %v396_v21  ;;  %v413_v26 = vadd.f32 %v399_v23, %v396_v21  ;;  %v422_v27 = vmul.f32 %v399_v23, %v399_v23  ;;  %v599_v28 = vpop.f32.mrb[3].mxu0 }
  0xfe   : > { %570 = vst [vmem:[%s264_s29] sm:$0xff] %v569_v25   ;;  %v414_v29 = vrot.slane %v413_v26, 4  ;;  %v423_v30 = vadd.f32 %v422_v27, %v421_v24 }
 0x100   : > { %v415_v31 = vadd.f32 %v414_v29, %v413_v26  ;;  %v424_v32 = vrot.slane %v423_v30, 4 }
 0x102   : > { %v416_v33 = vrot.slane %v415_v31, 2  ;;  %v425_v34 = vadd.f32 %v424_v32, %v423_v30 }
 0x104   : > { %v417_v35 = vadd.f32 %v416_v33, %v415_v31  ;;  %v426_v36 = vrot.slane %v425_v34, 2 }
 0x106   : > { %v418_v37 = vrot.slane %v417_v35, 1  ;;  %v427_v38 = vadd.f32 %v426_v36, %v425_v34 }
 0x108   : > { %v419_v39 = vadd.f32 %v418_v37, %v417_v35  ;;  %v428_v40 = vrot.slane %v427_v38, 1 }
 0x10a   : > { %420 = vst [vmem:[%s268_s7] sm:$0x1] %v419_v39  ;;  %v429_v41 = vadd.f32 %v428_v40, %v427_v38 }
 0x10c   : > { %430 = vst [vmem:[%s271_s10] sm:$0x1] %v429_v41 }
 0x10d PF: > { %s17_s21 = sadd.s32 1, %s624_s21  }
 0x10e   : > { %p14_p5 = scmp.ge.s32.totalorder %s17_s21, 4  }
 0x110   :  { %16 = sbr.rel (!%p14_p5) target bundleno = 1 (0x1), region = 90 }

// kernel: tile.63
= control target key start
LH: loop header
LB: loop body
LE: loop exit
PB: predicated region body
PF: predicated region fallthrough
CT: control target
= control target key end

     0   :  { %s22_s0 = inlined_call_operand.vmem [shape: f32[16], index: 0, kind: input, shape index: {}]   ;;  %s23_s1 = inlined_call_operand.vmem [shape: f32[8,16], index: 1, kind: output, shape index: {}]  }
   0x1   :  { %v4_v0 = vld [vmem:[%s22_s0] ss:$0 sm:$0xff] }
   0x2   :  { %5 = vst [vmem:[%s23_s1] sm:$0xff] %v4_v0 }

// kernel: tile.68
= control target key start
LH: loop header
LB: loop body
LE: loop exit
PB: predicated region body
PF: predicated region fallthrough
CT: control target
= control target key end

     0   :  { %s67_s10 = smov 112   ;;  %s68_s11 = smov 80   ;;  %vm3_vm0 = vcmask 130048   ;;  %vm9_vm1 = vcmask 1048448   ;;  %vm15_vm2 = vcmask 917248   ;;  %vm21_vm3 = vcmask 786048   ;;  %s111_s0 = inlined_call_operand.vmem [shape: f32[8,16], index: 0, kind: input, shape index: {}]   ;;  %s112_s1 = inlined_call_operand.vmem [shape: f32[1,128], index: 1, kind: output, shape index: {}]  }
   0x1   :  { %v53_v0 = vld [vmem:[%s111_s0 + $0x7] sm:$0x1]   ;;  %v55_v1 = vld [vmem:[%s111_s0 + $0x5] sm:$0x1]   ;;  %v54_v2 = vld [vmem:[%s111_s0 + $0x6] sm:$0x1]  }
   0x2   :  { %7 = vrot.lane.b32.xlu0 %v53_v0, %s67_s10  ;;  %19 = vrot.lane.b32.xlu1 %v55_v1, %s68_s11  ;;  %v56_v3 = vld [vmem:[%s111_s0 + $0x4] sm:$0x1]   ;;  %v2_v4 = vld [vmem:[%s111_s0] sm:$0x1]   ;;  %s69_s18 = smov 96   ;;  %s70_s19 = smov 64  }
   0x3   :  { %4 = vst.msk [vmem:[#allocation0] sm:$0x1] %vm3_vm0, %v2_v4   ;;  %v57_v5 = vld [vmem:[%s111_s0 + $0x3] sm:$0x1]   ;;  %v58_v6 = vld [vmem:[%s111_s0 + $0x2] sm:$0x1]  }
   0x4   :  { %s71_s24 = smov 48   ;;  %s72_s25 = smov 32   ;;  %v59_v7 = vld [vmem:[%s111_s0 + $0x1] sm:$0x1]   ;;  %vm27_vm4 = vcmask 654848   ;;  %vm33_vm5 = vcmask 523648  }
   0x5   :  { %s73_s0 = smov 16   ;;  %vm39_vm6 = vcmask 392448   ;;  %vm45_vm7 = vcmask 261248  }
   0x6   :  { %13 = vrot.lane.b32.xlu0 %v54_v2, %s69_s18  ;;  %25 = vrot.lane.b32.xlu1 %v56_v3, %s70_s19 }
   0xa   :  { %31 = vrot.lane.b32.xlu0 %v57_v5, %s71_s24  ;;  %37 = vrot.lane.b32.xlu1 %v58_v6, %s72_s25 }
   0xe   :  { %43 = vrot.lane.b32.xlu0 %v59_v7, %s73_s0 }
  0x74   :  { %v8_v8 = vpop.permute.xlu0 %7   ;;  %v20_v9 = vpop.permute.xlu1 %19  }
  0x75   :  { %10 = vst.msk [vmem:[#allocation0] sm:$0x1] %vm9_vm1, %v8_v8  }
  0x78   :  { %v14_v10 = vpop.permute.xlu0 %13   ;;  %v26_v11 = vpop.permute.xlu1 %25  }
  0x79   :  { %16 = vst.msk [vmem:[#allocation0] sm:$0x1] %vm15_vm2, %v14_v10  }
  0x7a   :  { %22 = vst.msk [vmem:[#allocation0] sm:$0x1] %vm21_vm3, %v20_v9  }
  0x7b   :  { %28 = vst.msk [vmem:[#allocation0] sm:$0x1] %vm27_vm4, %v26_v11  }
  0x7c   :  { %v32_v12 = vpop.permute.xlu0 %31   ;;  %v38_v13 = vpop.permute.xlu1 %37  }
  0x7d   :  { %34 = vst.msk [vmem:[#allocation0] sm:$0x1] %vm33_vm5, %v32_v12  }
  0x7e   :  { %40 = vst.msk [vmem:[#allocation0] sm:$0x1] %vm39_vm6, %v38_v13  }
  0x80   :  { %v44_v14 = vpop.permute.xlu0 %43  }
  0x81   :  { %46 = vst.msk [vmem:[#allocation0] sm:$0x1] %vm45_vm7, %v44_v14  }
  0x88   :  { %v50_v15 = vld [vmem:[#allocation0] sm:$0x1] }
  0x89   :  { %52 = vst [vmem:[%s112_s1] sm:$0x1] %v50_v15 }

// kernel: mul.32
= control target key start
LH: loop header
LB: loop body
LE: loop exit
PB: predicated region body
PF: predicated region fallthrough
CT: control target
= control target key end

     0   :  { %s580_s0 = inlined_call_operand.vmem [shape: f32[16,2,2,128], index: 0, kind: input, shape index: {}]   ;;  %s581_s1 = inlined_call_operand.vmem [shape: f32[16,512], index: 1, kind: output, shape index: {}]  }
   0x1   :  { %v316_v0 = vld [vmem:[%s580_s0 + $0x3e] sm:$0x3]  ;;  %v317_v1 = vld [vmem:[%s580_s0 + $0x3c] sm:$0x3]  ;;  %v318_v2 = vld [vmem:[%s580_s0 + $0x3a] sm:$0x3] }
   0x2   :  { %8 = vst [vmem:[#allocation0 + $0xf8] sm:$0x3] %v316_v0  ;;  %13 = vst [vmem:[#allocation0 + $0xf0] sm:$0x3] %v317_v1  ;;  %v319_v3 = vld [vmem:[%s580_s0 + $0x38] sm:$0x3] }
   0x3   :  { %18 = vst [vmem:[#allocation0 + $0xe8] sm:$0x3] %v318_v2  ;;  %v320_v4 = vld [vmem:[%s580_s0 + $0x36] sm:$0x3]  ;;  %v321_v5 = vld [vmem:[%s580_s0 + $0x34] sm:$0x3] }
   0x4   :  { %23 = vst [vmem:[#allocation0 + $0xe0] sm:$0x3] %v319_v3  ;;  %28 = vst [vmem:[#allocation0 + $0xd8] sm:$0x3] %v320_v4  ;;  %v322_v6 = vld [vmem:[%s580_s0 + $0x32] sm:$0x3] }
   0x5   :  { %33 = vst [vmem:[#allocation0 + $0xd0] sm:$0x3] %v321_v5  ;;  %v323_v7 = vld [vmem:[%s580_s0 + $0x30] sm:$0x3]  ;;  %v324_v8 = vld [vmem:[%s580_s0 + $0x2e] sm:$0x3] }
   0x6   :  { %38 = vst [vmem:[#allocation0 + $0xc8] sm:$0x3] %v322_v6  ;;  %43 = vst [vmem:[#allocation0 + $0xc0] sm:$0x3] %v323_v7  ;;  %v325_v9 = vld [vmem:[%s580_s0 + $0x2c] sm:$0x3] }
   0x7   :  { %48 = vst [vmem:[#allocation0 + $0xb8] sm:$0x3] %v324_v8  ;;  %v326_v10 = vld [vmem:[%s580_s0 + $0x2a] sm:$0x3]  ;;  %v327_v11 = vld [vmem:[%s580_s0 + $0x28] sm:$0x3] }
   0x8   :  { %53 = vst [vmem:[#allocation0 + $0xb0] sm:$0x3] %v325_v9  ;;  %58 = vst [vmem:[#allocation0 + $0xa8] sm:$0x3] %v326_v10  ;;  %v328_v12 = vld [vmem:[%s580_s0 + $0x26] sm:$0x3] }
   0x9   :  { %63 = vst [vmem:[#allocation0 + $0xa0] sm:$0x3] %v327_v11  ;;  %v329_v13 = vld [vmem:[%s580_s0 + $0x24] sm:$0x3]  ;;  %v330_v14 = vld [vmem:[%s580_s0 + $0x22] sm:$0x3] }
   0xa   :  { %68 = vst [vmem:[#allocation0 + $0x98] sm:$0x3] %v328_v12  ;;  %73 = vst [vmem:[#allocation0 + $0x90] sm:$0x3] %v329_v13  ;;  %v331_v15 = vld [vmem:[%s580_s0 + $0x20] sm:$0x3] }
   0xb   :  { %78 = vst [vmem:[#allocation0 + $0x88] sm:$0x3] %v330_v14  ;;  %v332_v16 = vld [vmem:[%s580_s0 + $0x1e] sm:$0x3]  ;;  %v333_v17 = vld [vmem:[%s580_s0 + $0x1c] sm:$0x3] }
   0xc   :  { %83 = vst [vmem:[#allocation0 + $0x80] sm:$0x3] %v331_v15  ;;  %88 = vst [vmem:[#allocation0 + $0x78] sm:$0x3] %v332_v16  ;;  %v334_v18 = vld [vmem:[%s580_s0 + $0x1a] sm:$0x3] }
   0xd   :  { %93 = vst [vmem:[#allocation0 + $0x70] sm:$0x3] %v333_v17  ;;  %v335_v19 = vld [vmem:[%s580_s0 + $0x18] sm:$0x3]  ;;  %v336_v20 = vld [vmem:[%s580_s0 + $0x16] sm:$0x3] }
   0xe   :  { %98 = vst [vmem:[#allocation0 + $0x68] sm:$0x3] %v334_v18  ;;  %103 = vst [vmem:[#allocation0 + $0x60] sm:$0x3] %v335_v19  ;;  %v337_v21 = vld [vmem:[%s580_s0 + $0x14] sm:$0x3] }
   0xf   :  { %108 = vst [vmem:[#allocation0 + $0x58] sm:$0x3] %v336_v20  ;;  %v338_v22 = vld [vmem:[%s580_s0 + $0x12] sm:$0x3]  ;;  %v339_v23 = vld [vmem:[%s580_s0 + $0x10] sm:$0x3] }
  0x10   :  { %113 = vst [vmem:[#allocation0 + $0x50] sm:$0x3] %v337_v21  ;;  %118 = vst [vmem:[#allocation0 + $0x48] sm:$0x3] %v338_v22  ;;  %v340_v24 = vld [vmem:[%s580_s0 + $0xe] sm:$0x3] }
  0x11   :  { %123 = vst [vmem:[#allocation0 + $0x40] sm:$0x3] %v339_v23  ;;  %v341_v25 = vld [vmem:[%s580_s0 + $0xc] sm:$0x3]  ;;  %v342_v26 = vld [vmem:[%s580_s0 + $0xa] sm:$0x3] }
  0x12   :  { %128 = vst [vmem:[#allocation0 + $0x38] sm:$0x3] %v340_v24  ;;  %133 = vst [vmem:[#allocation0 + $0x30] sm:$0x3] %v341_v25  ;;  %v343_v27 = vld [vmem:[%s580_s0 + $0x8] sm:$0x3] }
  0x13   :  { %138 = vst [vmem:[#allocation0 + $0x28] sm:$0x3] %v342_v26  ;;  %v344_v28 = vld [vmem:[%s580_s0 + $0x6] sm:$0x3]  ;;  %v345_v29 = vld [vmem:[%s580_s0 + $0x4] sm:$0x3] }
  0x14   :  { %143 = vst [vmem:[#allocation0 + $0x20] sm:$0x3] %v343_v27  ;;  %148 = vst [vmem:[#allocation0 + $0x18] sm:$0x3] %v344_v28  ;;  %v346_v30 = vld [vmem:[%s580_s0 + $0x2] sm:$0x3] }
  0x15   :  { %153 = vst [vmem:[#allocation0 + $0x10] sm:$0x3] %v345_v29  ;;  %v158_v31 = vld [vmem:[%s580_s0] sm:$0x3]  ;;  %v251_v32 = vld [vmem:[#allocation0 + $0xb8] sm:$0x3]  }
  0x16   :  { %157 = vst [vmem:[#allocation0 + $0x8] sm:$0x3] %v346_v30  ;;  %159 = vst [vmem:[#allocation0] sm:$0x3] %v158_v31  ;;  %v239_v33 = vld [vmem:[#allocation0 + $0xa0] sm:$0x3]  }
  0x17   :  { %v243_v34 = vld [vmem:[#allocation0 + $0xa8] sm:$0x3]   ;;  %v247_v35 = vld [vmem:[#allocation0 + $0xb0] sm:$0x3]   ;;  %v235_v38 = vld [vmem:[#allocation0 + $0x98] sm:$0x3]  }
  0x18   :  { %369 = vst [vmem:[%s581_s1 + $0x33] ss:$8 sm:$0x3] %v251_v32   ;;  %v227_v36 = vld [vmem:[#allocation0 + $0x88] sm:$0x3]  }
  0x19   :  { %v231_v37 = vld [vmem:[#allocation0 + $0x90] sm:$0x3]   ;;  %366 = vst [vmem:[%s581_s1 + $0x22] ss:$8 sm:$0x3] %v239_v33  }
  0x1a   :  { %367 = vst [vmem:[%s581_s1 + $0x32] ss:$8 sm:$0x3] %v243_v34   ;;  %368 = vst [vmem:[%s581_s1 + $0x23] ss:$8 sm:$0x3] %v247_v35  }
  0x1b   :  { %v215_v39 = vld [vmem:[#allocation0 + $0x70] sm:$0x3]   ;;  %v219_v40 = vld [vmem:[#allocation0 + $0x78] sm:$0x3]   ;;  %v223_v41 = vld [vmem:[#allocation0 + $0x80] sm:$0x3]  }
  0x1c   :  { %363 = vst [vmem:[%s581_s1 + $0x30] ss:$8 sm:$0x3] %v227_v36   ;;  %364 = vst [vmem:[%s581_s1 + $0x21] ss:$8 sm:$0x3] %v231_v37  }
  0x1d   :  { %365 = vst [vmem:[%s581_s1 + $0x31] ss:$8 sm:$0x3] %v235_v38   ;;  %v203_v42 = vld [vmem:[#allocation0 + $0x58] sm:$0x3]  }
  0x1e   :  { %v207_v43 = vld [vmem:[#allocation0 + $0x60] sm:$0x3]   ;;  %v211_v44 = vld [vmem:[#allocation0 + $0x68] sm:$0x3]   ;;  %v199_v47 = vld [vmem:[#allocation0 + $0x50] sm:$0x3]  }
  0x1f   :  { %360 = vst [vmem:[%s581_s1 + $0x7] ss:$8 sm:$0x3] %v215_v39   ;;  %361 = vst [vmem:[%s581_s1 + $0x17] ss:$8 sm:$0x3] %v219_v40  }
  0x20   :  { %362 = vst [vmem:[%s581_s1 + $0x20] ss:$8 sm:$0x3] %v223_v41   ;;  %v191_v45 = vld [vmem:[#allocation0 + $0x40] sm:$0x3]  }
  0x21   :  { %v195_v46 = vld [vmem:[#allocation0 + $0x48] sm:$0x3]   ;;  %357 = vst [vmem:[%s581_s1 + $0x15] ss:$8 sm:$0x3] %v203_v42  }
  0x22   :  { %358 = vst [vmem:[%s581_s1 + $0x6] ss:$8 sm:$0x3] %v207_v43   ;;  %359 = vst [vmem:[%s581_s1 + $0x16] ss:$8 sm:$0x3] %v211_v44  }
  0x23   :  { %v179_v48 = vld [vmem:[#allocation0 + $0x28] sm:$0x3]   ;;  %v183_v49 = vld [vmem:[#allocation0 + $0x30] sm:$0x3]   ;;  %v187_v50 = vld [vmem:[#allocation0 + $0x38] sm:$0x3]  }
  0x24   :  { %354 = vst [vmem:[%s581_s1 + $0x4] ss:$8 sm:$0x3] %v191_v45   ;;  %355 = vst [vmem:[%s581_s1 + $0x14] ss:$8 sm:$0x3] %v195_v46  }
  0x25   :  { %356 = vst [vmem:[%s581_s1 + $0x5] ss:$8 sm:$0x3] %v199_v47   ;;  %v167_v51 = vld [vmem:[#allocation0 + $0x10] sm:$0x3]  }
  0x26   :  { %v171_v52 = vld [vmem:[#allocation0 + $0x18] sm:$0x3]   ;;  %v175_v53 = vld [vmem:[#allocation0 + $0x20] sm:$0x3]   ;;  %v163_v55 = vld [vmem:[#allocation0 + $0x8] sm:$0x3]  }
  0x27   :  { %351 = vst [vmem:[%s581_s1 + $0x12] ss:$8 sm:$0x3] %v179_v48   ;;  %352 = vst [vmem:[%s581_s1 + $0x3] ss:$8 sm:$0x3] %v183_v49  }
  0x28   :  { %353 = vst [vmem:[%s581_s1 + $0x13] ss:$8 sm:$0x3] %v187_v50   ;;  %v160_v54 = vld [vmem:[#allocation0] sm:$0x3]  }
  0x29   :  { %348 = vst [vmem:[%s581_s1 + $0x1] ss:$8 sm:$0x3] %v167_v51   ;;  %349 = vst [vmem:[%s581_s1 + $0x11] ss:$8 sm:$0x3] %v171_v52  }
  0x2a   :  { %350 = vst [vmem:[%s581_s1 + $0x2] ss:$8 sm:$0x3] %v175_v53   ;;  %v255_v56 = vld [vmem:[#allocation0 + $0xc0] sm:$0x3]  }
  0x2b   :  { %161 = vst [vmem:[%s581_s1] ss:$8 sm:$0x3] %v160_v54   ;;  %347 = vst [vmem:[%s581_s1 + $0x10] ss:$8 sm:$0x3] %v163_v55  }
  0x2c   :  { %370 = vst [vmem:[%s581_s1 + $0x24] ss:$8 sm:$0x3] %v255_v56   ;;  %v259_v57 = vld [vmem:[#allocation0 + $0xc8] sm:$0x3]  }
  0x2d   :  { %v263_v58 = vld [vmem:[#allocation0 + $0xd0] sm:$0x3]   ;;  %v267_v59 = vld [vmem:[#allocation0 + $0xd8] sm:$0x3]   ;;  %v271_v60 = vld [vmem:[#allocation0 + $0xe0] sm:$0x3]  }
  0x2e   :  { %371 = vst [vmem:[%s581_s1 + $0x34] ss:$8 sm:$0x3] %v259_v57   ;;  %372 = vst [vmem:[%s581_s1 + $0x25] ss:$8 sm:$0x3] %v263_v58  }
  0x2f   :  { %373 = vst [vmem:[%s581_s1 + $0x35] ss:$8 sm:$0x3] %v267_v59   ;;  %v275_v61 = vld [vmem:[#allocation0 + $0xe8] sm:$0x3]  }
  0x30   :  { %v279_v62 = vld [vmem:[#allocation0 + $0xf0] sm:$0x3]   ;;  %374 = vst [vmem:[%s581_s1 + $0x26] ss:$8 sm:$0x3] %v271_v60  }
  0x31   :  { %375 = vst [vmem:[%s581_s1 + $0x36] ss:$8 sm:$0x3] %v275_v61   ;;  %376 = vst [vmem:[%s581_s1 + $0x27] ss:$8 sm:$0x3] %v279_v62  }
  0x32   :  { %v283_v63 = vld [vmem:[#allocation0 + $0xf8] sm:$0x3]  }
  0x33   :  { %377 = vst [vmem:[%s581_s1 + $0x37] ss:$8 sm:$0x3] %v283_v63  }

// kernel: autoencoder_forward.9
= control target key start
LH: loop header
LB: loop body
LE: loop exit
PB: predicated region body
PF: predicated region fallthrough
CT: control target
= control target key end

     0   :  { %v3979_v22 = vmov 857870592   ;;  %v44_v24 = vlaneseq  ;;  %v3980_v25 = vmov 2003195204   ;;  %vm3090_vm0 = vcmask 1040384   ;;  %s4916_s3 = inlined_call_operand.vmem [shape: bf16[4096,128], index: 3, kind: input, shape index: {}]   ;;  %s4917_s0 = inlined_call_operand.vmem [shape: bf16[1,4096], index: 0, kind: input, shape index: {}]   ;;  %s4918_s1 = inlined_call_operand.vmem [shape: f32[1,4096], index: 1, kind: input, shape index: {}]   ;;  %s4919_s2 = inlined_call_operand.vmem [shape: f32[1,4096], index: 2, kind: input, shape index: {}]   ;;  %s4920_s4 = inlined_call_operand.vmem [shape: bf16[1,128], index: 4, kind: output, shape index: {0}]   ;;  %s4921_s5 = inlined_call_operand.vmem [shape: f32[1,1,128], index: 5, kind: output, shape index: {1}]   ;;  %s4922_s6 = inlined_call_operand.vmem [shape: f32[1,1,128], index: 6, kind: output, shape index: {2}]  }
   0x1   :  { %v3723_v0 = vld [vmem:[%s4916_s3 + $0x40] sm:$0xff]   ;;  %v3727_v4 = vld [vmem:[%s4916_s3 + $0x48] sm:$0xff]   ;;  %v3731_v8 = vld [vmem:[%s4916_s3 + $0x50] sm:$0xff]   ;;  %v42_v23 = vunpack.c.l.s4 %v3979_v22  ;;  %v49_v26 = vunpack.c.l.s4 %v3980_v25  ;;  %vm3091_vm1 = vsmask.f32 256 }
   0x2   :  { %v3724_v1 = vld [vmem:[%s4916_s3 + $0xc0] sm:$0xff]   ;;  %3369 = vmatprep.subr.bf16.mxu0 %v3723_v0  ;;  %v3728_v5 = vld [vmem:[%s4916_s3 + $0xc8] sm:$0xff]   ;;  %v3732_v9 = vld [vmem:[%s4916_s3 + $0xd0] sm:$0xff]   ;;  %v45_v32 = vshrl.u32 %v44_v24, 7 }
   0x3   :  { %v3725_v2 = vld [vmem:[%s4916_s3] sm:$0xff]   ;;  %3391 = vmatprep.subr.bf16.mxu1 %v3724_v1  ;;  %v3729_v6 = vld [vmem:[%s4916_s3 + $0x8] sm:$0xff]   ;;  %v3733_v10 = vld [vmem:[%s4916_s3 + $0x10] sm:$0xff]   ;;  %v43_v31 = vunpack.c.0.s8 %v42_v23  ;;  %v50_v33 = vunpack.c.0.s8 %v49_v26 }
   0x4   :  { %v3726_v3 = vld [vmem:[%s4916_s3 + $0x80] sm:$0xff]   ;;  %3370 = vmatpush3.bf16.msra.mxu0 %v3725_v2  ;;  %v3730_v7 = vld [vmem:[%s4916_s3 + $0x88] sm:$0xff]   ;;  %v3734_v11 = vld [vmem:[%s4916_s3 + $0x90] sm:$0xff]   ;;  %v4135_v55 = vsub.s32 2, %v45_v32  ;;  %v4137_v56 = vsub.s32 6, %v45_v32  ;;  %v4139_v58 = vsub.s32 0, %v45_v32 }
   0x5   :  { %3392 = vmatpush3.bf16.msra.mxu1 %v3726_v3  ;;  %3371 = vmatprep.subr.bf16.mxu0 %v3727_v4  ;;  %v3735_v12 = vld [vmem:[%s4916_s3 + $0x58] sm:$0xff]   ;;  %v3739_v16 = vld [vmem:[%s4916_s3 + $0x60] sm:$0xff]   ;;  %v3743_v20 = vld [vmem:[%s4916_s3 + $0x68] sm:$0xff]   ;;  %v4106_v38 = vsub.s32 %v43_v31, %v45_v32  ;;  %v4108_v39 = vsub.s32 %v50_v33, %v45_v32  ;;  %v4141_v59 = vsub.s32 4, %v45_v32 }
   0x6   :  { %3393 = vmatprep.subr.bf16.mxu1 %v3728_v5  ;;  %v3736_v13 = vld [vmem:[%s4916_s3 + $0xd8] sm:$0xff]   ;;  %v3740_v17 = vld [vmem:[%s4916_s3 + $0xe0] sm:$0xff]   ;;  %v3744_v21 = vld [vmem:[%s4916_s3 + $0xe8] sm:$0xff]  }
   0x7   :  { %v3737_v14 = vld [vmem:[%s4916_s3 + $0x18] sm:$0xff]   ;;  %v3741_v18 = vld [vmem:[%s4916_s3 + $0x20] sm:$0xff]   ;;  %v3745_v27 = vld [vmem:[%s4916_s3 + $0x28] sm:$0xff]  }
   0x8   :  { %3372 = vmatpush3.bf16.msra.mxu0 %v3729_v6  ;;  %v3738_v15 = vld [vmem:[%s4916_s3 + $0x98] sm:$0xff]   ;;  %v3742_v19 = vld [vmem:[%s4916_s3 + $0xa0] sm:$0xff]   ;;  %v3746_v28 = vld [vmem:[%s4916_s3 + $0xa8] sm:$0xff]  }
   0x9   :  { %3394 = vmatpush3.bf16.msra.mxu1 %v3730_v7  ;;  %3373 = vmatprep.subr.bf16.mxu0 %v3731_v8  ;;  %v3747_v29 = vld [vmem:[%s4916_s3 + $0x70] sm:$0xff]   ;;  %v3751_v36 = vld [vmem:[%s4916_s3 + $0x78] sm:$0xff]   ;;  %v21_v42 = vld [vmem:[%s4917_s0] sm:$0xff] }
   0xa   :  { %3395 = vmatprep.subr.bf16.mxu1 %v3732_v9  ;;  %v3748_v30 = vld [vmem:[%s4916_s3 + $0xf0] sm:$0xff]   ;;  %v3752_v37 = vld [vmem:[%s4916_s3 + $0xf8] sm:$0xff]   ;;  %v33_v43 = vld [vmem:[%s4918_s1] sm:$0xff]  ;;  %v25_v45 = vunpack.c.l.bf16 %v21_v42  ;;  %v26_v46 = vunpack.c.h.bf16 %v21_v42 }
   0xb   :  { %v3749_v34 = vld [vmem:[%s4916_s3 + $0x30] sm:$0xff]   ;;  %v3753_v40 = vld [vmem:[%s4916_s3 + $0x38] sm:$0xff]   ;;  %v113_v44 = vld [vmem:[%s4919_s2] sm:$0xff]  ;;  %v47_v47 = vrot.slane %v33_v43, %v4106_v38  ;;  %v54_v48 = vrot.slane %v33_v43, %v4108_v39 }
   0xc   :  { %3374 = vmatpush3.bf16.msra.mxu0 %v3733_v10  ;;  %v3750_v35 = vld [vmem:[%s4916_s3 + $0xb0] sm:$0xff]   ;;  %v3754_v41 = vld [vmem:[%s4916_s3 + $0xb8] sm:$0xff]   ;;  %v3755_v49 = vld [vmem:[%s4916_s3 + $0x140] sm:$0xff]   ;;  %v127_v50 = vrot.slane %v113_v44, %v4106_v38  ;;  %v134_v51 = vrot.slane %v113_v44, %v4108_v39 }
   0xd   :  { %3396 = vmatpush3.bf16.msra.mxu1 %v3734_v11  ;;  %3375 = vmatprep.subr.bf16.mxu0 %v3735_v12  ;;  %v3756_v52 = vld [vmem:[%s4916_s3 + $0x1c0] sm:$0xff]   ;;  %v105_v53 = vmul.f32 %v47_v47, %v25_v45  ;;  %v106_v54 = vmul.f32 %v54_v48, %v26_v46  ;;  %v3759_v11 = vld [vmem:[%s4916_s3 + $0x148] sm:$0xff]   ;;  %v3768_v22 = vld [vmem:[%s4916_s3 + $0x1d8] sm:$0xff]  }
   0xe   :  { %3397 = vmatprep.subr.bf16.mxu1 %v3736_v13  ;;  %v3757_v3 = vld [vmem:[%s4916_s3 + $0x100] sm:$0xff]   ;;  %v3760_v12 = vld [vmem:[%s4916_s3 + $0x1c8] sm:$0xff]   ;;  %v3769_v23 = vld [vmem:[%s4916_s3 + $0x118] sm:$0xff]  }
   0xf   :  { %v185_v57 = vadd.f32 %v127_v50, %v105_v53  ;;  %v186_v60 = vadd.f32 %v134_v51, %v106_v54  ;;  %v3758_v4 = vld [vmem:[%s4916_s3 + $0x180] sm:$0xff]   ;;  %v3761_v13 = vld [vmem:[%s4916_s3 + $0x108] sm:$0xff]   ;;  %v3770_v24 = vld [vmem:[%s4916_s3 + $0x198] sm:$0xff]  }
  0x10   :  { %3376 = vmatpush3.bf16.msra.mxu0 %v3737_v14  ;;  %v3771_v25 = vld [vmem:[%s4916_s3 + $0x160] sm:$0xff]   ;;  %v3777_v31 = vld [vmem:[%s4916_s3 + $0x128] sm:$0xff]   ;;  %v3779_v33 = vld [vmem:[%s4916_s3 + $0x170] sm:$0xff]  }
  0x11   :  { %3398 = vmatpush3.bf16.msra.mxu1 %v3738_v15  ;;  %3377 = vmatprep.subr.bf16.mxu0 %v3739_v16  ;;  %v193_v61 = vmax.f32 %v185_v57, 0.0  ;;  %v4143_v62 = vmax.f32 %v186_v60, 0.0  ;;  %v3762_v16 = vld [vmem:[%s4916_s3 + $0x188] sm:$0xff]   ;;  %v3772_v26 = vld [vmem:[%s4916_s3 + $0x1e0] sm:$0xff]   ;;  %v3786_v42 = vld [vmem:[%s4916_s3 + $0x1b8] sm:$0xff]  }
  0x12   :  { %3399 = vmatprep.subr.bf16.mxu1 %v3740_v17  ;;  %v3763_v17 = vld [vmem:[%s4916_s3 + $0x150] sm:$0xff]   ;;  %v3778_v32 = vld [vmem:[%s4916_s3 + $0x1a8] sm:$0xff]   ;;  %v3787_v45 = vld [vmem:[%s4916_s3 + $0x240] sm:$0xff]  }
  0x13   :  { %v728_v63 = vrot.slane %v193_v61, %v4135_v55  ;;  %v736_v0 = vrot.slane %v193_v61, %v4137_v56  ;;  %v724_v1 = vrot.slane %v193_v61, %v4139_v58  ;;  %v732_v2 = vrot.slane %v193_v61, %v4141_v59  ;;  %v3788_v46 = vld [vmem:[%s4916_s3 + $0x2c0] sm:$0xff]   ;;  %v3791_v51 = vld [vmem:[%s4916_s3 + $0x248] sm:$0xff]   ;;  %v3795_v57 = vld [vmem:[%s4916_s3 + $0x250] sm:$0xff]  }
  0x14   :  { %3378 = vmatpush3.bf16.msra.mxu0 %v3741_v18  ;;  %v744_v5 = vrot.slane %v4143_v62, %v4135_v55  ;;  %v752_v6 = vrot.slane %v4143_v62, %v4137_v56  ;;  %v3764_v18 = vld [vmem:[%s4916_s3 + $0x1d0] sm:$0xff]   ;;  %v740_v43 = vrot.slane %v4143_v62, %v4139_v58  ;;  %v748_v44 = vrot.slane %v4143_v62, %v4141_v59  ;;  %v3789_v47 = vld [vmem:[%s4916_s3 + $0x200] sm:$0xff]   ;;  %v3793_v53 = vld [vmem:[%s4916_s3 + $0x208] sm:$0xff]  }
  0x15   :  { %3400 = vmatpush3.bf16.msra.mxu1 %v3742_v19  ;;  %3379 = vmatprep.subr.bf16.mxu0 %v3743_v20  ;;  %v882_v7 = vpack.c.bf16 %v728_v63, %v728_v63  ;;  %v884_v8 = vpack.c.bf16 %v736_v0, %v736_v0  ;;  %v881_v9 = vpack.c.bf16 %v724_v1, %v724_v1  ;;  %v3765_v19 = vld [vmem:[%s4916_s3 + $0x110] sm:$0xff]   ;;  %v3790_v50 = vld [vmem:[%s4916_s3 + $0x280] sm:$0xff]   ;;  %v3794_v54 = vld [vmem:[%s4916_s3 + $0x288] sm:$0xff]  }
  0x16   :  { %3401 = vmatprep.subr.bf16.mxu1 %v3744_v21  ;;  %v883_v10 = vpack.c.bf16 %v732_v2, %v732_v2  ;;  %v886_v14 = vpack.c.bf16 %v744_v5, %v744_v5  ;;  %v888_v15 = vpack.c.bf16 %v752_v6, %v752_v6  ;;  %v3766_v20 = vld [vmem:[%s4916_s3 + $0x190] sm:$0xff]   ;;  %v3767_v21 = vld [vmem:[%s4916_s3 + $0x158] sm:$0xff]   ;;  %v885_v48 = vpack.c.bf16 %v740_v43, %v740_v43  ;;  %v3805_v5 = vld [vmem:[%s4916_s3 + $0x220] sm:$0xff]  }
  0x17   :  { %2481 = vmatprep.mubr.bf16.mxu0 %v882_v7  ;;  %2521 = vmatprep.mubr.bf16.mxu1 %v884_v8  ;;  %v3796_v60 = vld [vmem:[%s4916_s3 + $0x2d0] sm:$0xff]   ;;  %v3799_v63 = vld [vmem:[%s4916_s3 + $0x258] sm:$0xff]   ;;  %v3806_v6 = vld [vmem:[%s4916_s3 + $0x2a0] sm:$0xff]  }
  0x18   :  { %3380 = vmatpush3.bf16.msra.mxu0 %v3745_v27  ;;  %v3773_v27 = vld [vmem:[%s4916_s3 + $0x120] sm:$0xff]   ;;  %v3797_v61 = vld [vmem:[%s4916_s3 + $0x210] sm:$0xff]   ;;  %v3800_v0 = vld [vmem:[%s4916_s3 + $0x2d8] sm:$0xff]  }
  0x19   :  { %3402 = vmatpush3.bf16.msra.mxu1 %v3746_v28  ;;  %3381 = vmatprep.subr.bf16.mxu0 %v3747_v29  ;;  %v3774_v28 = vld [vmem:[%s4916_s3 + $0x1a0] sm:$0xff]   ;;  %v3775_v29 = vld [vmem:[%s4916_s3 + $0x168] sm:$0xff]   ;;  %v3798_v62 = vld [vmem:[%s4916_s3 + $0x290] sm:$0xff]  }
  0x1a   :  { %3403 = vmatprep.subr.bf16.mxu1 %v3748_v30  ;;  %v3776_v30 = vld [vmem:[%s4916_s3 + $0x1e8] sm:$0xff]   ;;  %v3801_v1 = vld [vmem:[%s4916_s3 + $0x218] sm:$0xff]   ;;  %v3822_v43 = vld [vmem:[%s4916_s3 + $0x380] sm:$0xff]  }
  0x1b   :  { %v3802_v2 = vld [vmem:[%s4916_s3 + $0x298] sm:$0xff]   ;;  %v3807_v7 = vld [vmem:[%s4916_s3 + $0x268] sm:$0xff]   ;;  %vm3092_vm2 = vmand %vm3090_vm0, %vm3091_vm1 }
  0x1c   :  { %3382 = vmatpush3.bf16.msra.mxu0 %v3749_v34  ;;  %v3780_v34 = vld [vmem:[%s4916_s3 + $0x1f0] sm:$0xff]   ;;  %v3808_v8 = vld [vmem:[%s4916_s3 + $0x2e8] sm:$0xff]  }
  0x1d   :  { %3404 = vmatpush3.bf16.msra.mxu1 %v3750_v35  ;;  %3383 = vmatprep.subr.bf16.mxu0 %v3751_v36  ;;  %v3781_v35 = vld [vmem:[%s4916_s3 + $0x130] sm:$0xff]  }
  0x1e   :  { %3405 = vmatprep.subr.bf16.mxu1 %v3752_v37  ;;  %v3782_v36 = vld [vmem:[%s4916_s3 + $0x1b0] sm:$0xff]   ;;  %v3783_v37 = vld [vmem:[%s4916_s3 + $0x178] sm:$0xff]  }
  0x20   :  { %3384 = vmatpush3.bf16.msra.mxu0 %v3753_v40  ;;  %v3784_v40 = vld [vmem:[%s4916_s3 + $0x1f8] sm:$0xff]  }
  0x21   :  { %3406 = vmatpush3.bf16.msra.mxu1 %v3754_v41  ;;  %3413 = vmatprep.subr.bf16.mxu0 %v3755_v49  ;;  %v3785_v41 = vld [vmem:[%s4916_s3 + $0x138] sm:$0xff]   ;;  %v887_v49 = vpack.c.bf16 %v748_v44, %v748_v44 }
  0x22   :  { %3435 = vmatprep.subr.bf16.mxu1 %v3756_v52  ;;  %v3792_v52 = vld [vmem:[%s4916_s3 + $0x2c8] sm:$0xff]  }
  0x23   :  { %2482 = vmatmul.mubr.bf16.vlgmr.msra.gmra.mrb[0].mxu0 %v881_v9  ;;  %v3809_v9 = vld [vmem:[%s4916_s3 + $0x228] sm:$0xff]  }
  0x24   :  { %2522 = vmatmul.mubr.bf16.vlgmr.msra.gmra.mrb[0].mxu1 %v883_v10  ;;  %3414 = vmatpush3.bf16.msra.mxu0 %v3757_v3  ;;  %v3803_v3 = vld [vmem:[%s4916_s3 + $0x260] sm:$0xff]   ;;  %v3810_v10 = vld [vmem:[%s4916_s3 + $0x2a8] sm:$0xff]  }
  0x25   :  { %3436 = vmatpush3.bf16.msra.mxu1 %v3758_v4  ;;  %3415 = vmatprep.subr.bf16.mxu0 %v3759_v11  ;;  %v3804_v4 = vld [vmem:[%s4916_s3 + $0x2e0] sm:$0xff]   ;;  %v3811_v11 = vld [vmem:[%s4916_s3 + $0x270] sm:$0xff]  }
  0x26   :  { %3437 = vmatprep.subr.bf16.mxu1 %v3760_v12  ;;  %2561 = vmatprep.mubr.bf16.mxu0 %v886_v14  ;;  %v3812_v12 = vld [vmem:[%s4916_s3 + $0x2f0] sm:$0xff]   ;;  %v22_v14 = vld [vmem:[%s4917_s0 + $0x8] sm:$0xff] }
  0x27   :  { %2601 = vmatprep.mubr.bf16.mxu1 %v888_v15  ;;  %v34_v15 = vld [vmem:[%s4918_s1 + $0x8] sm:$0xff] }
  0x28   :  { %3416 = vmatpush3.bf16.msra.mxu0 %v3761_v13  ;;  %v3813_v13 = vld [vmem:[%s4916_s3 + $0x230] sm:$0xff]  }
  0x29   :  { %3438 = vmatpush3.bf16.msra.mxu1 %v3762_v16  ;;  %3417 = vmatprep.subr.bf16.mxu0 %v3763_v17  ;;  %v114_v16 = vld [vmem:[%s4919_s2 + $0x8] sm:$0xff]  ;;  %v3814_v17 = vld [vmem:[%s4916_s3 + $0x2b0] sm:$0xff]  }
  0x2a   :  { %3439 = vmatprep.subr.bf16.mxu1 %v3764_v18  ;;  %v27_v18 = vunpack.c.l.bf16 %v22_v14 }
  0x2c   :  { %3418 = vmatpush3.bf16.msra.mxu0 %v3765_v19  ;;  %v61_v19 = vrot.slane %v34_v15, %v4106_v38 }
  0x2d   :  { %3440 = vmatpush3.bf16.msra.mxu1 %v3766_v20  ;;  %3419 = vmatprep.subr.bf16.mxu0 %v3767_v21  ;;  %v141_v20 = vrot.slane %v114_v16, %v4106_v38  ;;  %v28_v21 = vunpack.c.h.bf16 %v22_v14  ;;  %v3845_v14 = vld [vmem:[%s4916_s3 + $0x330] sm:$0xff]  }
  0x2e   :  { %3441 = vmatprep.subr.bf16.mxu1 %v3768_v22  ;;  %v3815_v22 = vld [vmem:[%s4916_s3 + $0x278] sm:$0xff]  }
  0x30   :  { %3420 = vmatpush3.bf16.msra.mxu0 %v3769_v23  ;;  %v68_v23 = vrot.slane %v34_v15, %v4108_v39  ;;  %v3846_v15 = vld [vmem:[%s4916_s3 + $0x3b0] sm:$0xff]  }
  0x31   :  { %3442 = vmatpush3.bf16.msra.mxu1 %v3770_v24  ;;  %3421 = vmatprep.subr.bf16.mxu0 %v3771_v25  ;;  %v148_v24 = vrot.slane %v114_v16, %v4108_v39  ;;  %v3816_v25 = vld [vmem:[%s4916_s3 + $0x2f8] sm:$0xff]  }
  0x32   :  { %3443 = vmatprep.subr.bf16.mxu1 %v3772_v26  ;;  %v107_v26 = vmul.f32 %v61_v19, %v27_v18  ;;  %v3847_v16 = vld [vmem:[%s4916_s3 + $0x378] sm:$0xff]  }
  0x33   :  { %v3849_v18 = vld [vmem:[%s4916_s3 + $0x338] sm:$0xff]  }
  0x34   :  { %3422 = vmatpush3.bf16.msra.mxu0 %v3773_v27  ;;  %v108_v27 = vmul.f32 %v68_v23, %v28_v21  ;;  %v3850_v19 = vld [vmem:[%s4916_s3 + $0x3b8] sm:$0xff]   ;;  %v3852_v23 = vld [vmem:[%s4916_s3 + $0x4c0] sm:$0xff]  }
  0x35   :  { %3444 = vmatpush3.bf16.msra.mxu1 %v3774_v28  ;;  %3423 = vmatprep.subr.bf16.mxu0 %v3775_v29  ;;  %v3817_v28 = vld [vmem:[%s4916_s3 + $0x238] sm:$0xff]   ;;  %v187_v29 = vadd.f32 %v141_v20, %v107_v26 }
  0x36   :  { %3445 = vmatprep.subr.bf16.mxu1 %v3776_v30  ;;  %v3818_v30 = vld [vmem:[%s4916_s3 + $0x2b8] sm:$0xff]  }
  0x38   :  { %3424 = vmatpush3.bf16.msra.mxu0 %v3777_v31  ;;  %v188_v31 = vadd.f32 %v148_v24, %v108_v27  ;;  %v3853_v24 = vld [vmem:[%s4916_s3 + $0x400] sm:$0xff]  }
  0x39   :  { %3446 = vmatpush3.bf16.msra.mxu1 %v3778_v32  ;;  %3425 = vmatprep.subr.bf16.mxu0 %v3779_v33  ;;  %v195_v32 = vmax.f32 %v187_v29, 0.0  ;;  %v3819_v33 = vld [vmem:[%s4916_s3 + $0x340] sm:$0xff]   ;;  %v3856_v29 = vld [vmem:[%s4916_s3 + $0x4c8] sm:$0xff]  }
  0x3a   :  { %3447 = vmatprep.subr.bf16.mxu1 %v3780_v34  ;;  %v3820_v34 = vld [vmem:[%s4916_s3 + $0x3c0] sm:$0xff]  }
  0x3b   :  { %v3854_v27 = vld [vmem:[%s4916_s3 + $0x480] sm:$0xff]  }
  0x3c   :  { %3426 = vmatpush3.bf16.msra.mxu0 %v3781_v35  ;;  %v4362_v35 = vmax.f32 %v188_v31, 0.0  ;;  %v3858_v31 = vld [vmem:[%s4916_s3 + $0x488] sm:$0xff]  }
  0x3d   :  { %3448 = vmatpush3.bf16.msra.mxu1 %v3782_v36  ;;  %3427 = vmatprep.subr.bf16.mxu0 %v3783_v37  ;;  %v760_v36 = vrot.slane %v195_v32, %v4135_v55  ;;  %v768_v37 = vrot.slane %v195_v32, %v4137_v56 }
  0x3e   :  { %3449 = vmatprep.subr.bf16.mxu1 %v3784_v40  ;;  %v756_v40 = vrot.slane %v195_v32, %v4139_v58  ;;  %v776_v44 = vrot.slane %v4362_v35, %v4135_v55  ;;  %v772_v20 = vrot.slane %v4362_v35, %v4139_v58  ;;  %v780_v21 = vrot.slane %v4362_v35, %v4141_v59 }
  0x40   :  { %3428 = vmatpush3.bf16.msra.mxu0 %v3785_v41  ;;  %v764_v41 = vrot.slane %v195_v32, %v4141_v59  ;;  %v895_v26 = vpack.c.bf16 %v780_v21, %v780_v21  ;;  %v3859_v32 = vld [vmem:[%s4916_s3 + $0x450] sm:$0xff]  }
  0x41   :  { %3450 = vmatpush3.bf16.msra.mxu1 %v3786_v42  ;;  %3457 = vmatprep.subr.bf16.mxu0 %v3787_v45  ;;  %v3821_v42 = vld [vmem:[%s4916_s3 + $0x300] sm:$0xff]   ;;  %v784_v45 = vrot.slane %v4362_v35, %v4137_v56  ;;  %v3862_v35 = vld [vmem:[%s4916_s3 + $0x490] sm:$0xff]  }
  0x42   :  { %3479 = vmatprep.subr.bf16.mxu1 %v3788_v46  ;;  %v890_v46 = vpack.c.bf16 %v760_v36, %v760_v36  ;;  %v3863_v36 = vld [vmem:[%s4916_s3 + $0x458] sm:$0xff]  }
  0x43   :  { %2562 = vmatmul.mubr.bf16.vlgmr.msra.gmra.mrb[4].mxu0 %v885_v48  ;;  %v889_v48 = vpack.c.bf16 %v756_v40, %v756_v40  ;;  %v3865_v40 = vld [vmem:[%s4916_s3 + $0x418] sm:$0xff]  }
  0x44   :  { %2602 = vmatmul.mubr.bf16.vlgmr.msra.gmra.mrb[4].mxu1 %v887_v49  ;;  %3458 = vmatpush3.bf16.msra.mxu0 %v3789_v47  ;;  %v892_v47 = vpack.c.bf16 %v768_v37, %v768_v37  ;;  %v891_v49 = vpack.c.bf16 %v764_v41, %v764_v41  ;;  %v3864_v37 = vld [vmem:[%s4916_s3 + $0x4d8] sm:$0xff]  }
  0x45   :  { %3480 = vmatpush3.bf16.msra.mxu1 %v3790_v50  ;;  %3459 = vmatprep.subr.bf16.mxu0 %v3791_v51  ;;  %v3823_v50 = vld [vmem:[%s4916_s3 + $0x348] sm:$0xff]   ;;  %v3866_v41 = vld [vmem:[%s4916_s3 + $0x498] sm:$0xff]  }
  0x46   :  { %3481 = vmatprep.subr.bf16.mxu1 %v3792_v52  ;;  %v3824_v51 = vld [vmem:[%s4916_s3 + $0x3c8] sm:$0xff]   ;;  %2641 = vmatprep.mubr.bf16.mxu0 %v890_v46 }
  0x47   :  { %2681 = vmatprep.mubr.bf16.mxu1 %v892_v47  ;;  %v3825_v52 = vld [vmem:[%s4916_s3 + $0x308] sm:$0xff]  }
  0x48   :  { %3460 = vmatpush3.bf16.msra.mxu0 %v3793_v53  ;;  %v894_v53 = vpack.c.bf16 %v776_v44, %v776_v44  ;;  %v3869_v44 = vld [vmem:[%s4916_s3 + $0x420] sm:$0xff]   ;;  %v3871_v46 = vld [vmem:[%s4916_s3 + $0x468] sm:$0xff]  }
  0x49   :  { %3482 = vmatpush3.bf16.msra.mxu1 %v3794_v54  ;;  %3461 = vmatprep.subr.bf16.mxu0 %v3795_v57  ;;  %v896_v54 = vpack.c.bf16 %v784_v45, %v784_v45  ;;  %v3826_v57 = vld [vmem:[%s4916_s3 + $0x388] sm:$0xff]   ;;  %v3870_v45 = vld [vmem:[%s4916_s3 + $0x4a0] sm:$0xff]  }
  0x4a   :  { %3483 = vmatprep.subr.bf16.mxu1 %v3796_v60  ;;  %v3827_v60 = vld [vmem:[%s4916_s3 + $0x350] sm:$0xff]   ;;  %v3872_v47 = vld [vmem:[%s4916_s3 + $0x4e8] sm:$0xff]  }
  0x4c   :  { %3462 = vmatpush3.bf16.msra.mxu0 %v3797_v61  ;;  %v3828_v61 = vld [vmem:[%s4916_s3 + $0x3d0] sm:$0xff]  }
  0x4d   :  { %3484 = vmatpush3.bf16.msra.mxu1 %v3798_v62  ;;  %3463 = vmatprep.subr.bf16.mxu0 %v3799_v63  ;;  %v3829_v62 = vld [vmem:[%s4916_s3 + $0x310] sm:$0xff]  }
  0x4e   :  { %3485 = vmatprep.subr.bf16.mxu1 %v3800_v0  ;;  %v3830_v63 = vld [vmem:[%s4916_s3 + $0x390] sm:$0xff]   ;;  %v3831_v0 = vld [vmem:[%s4916_s3 + $0x358] sm:$0xff]  }
  0x50   :  { %3464 = vmatpush3.bf16.msra.mxu0 %v3801_v1  ;;  %v3832_v1 = vld [vmem:[%s4916_s3 + $0x3d8] sm:$0xff]  }
  0x51   :  { %3486 = vmatpush3.bf16.msra.mxu1 %v3802_v2  ;;  %3465 = vmatprep.subr.bf16.mxu0 %v3803_v3  ;;  %v3833_v2 = vld [vmem:[%s4916_s3 + $0x318] sm:$0xff]  }
  0x52   :  { %3487 = vmatprep.subr.bf16.mxu1 %v3804_v4  ;;  %v3834_v3 = vld [vmem:[%s4916_s3 + $0x398] sm:$0xff]   ;;  %v3835_v4 = vld [vmem:[%s4916_s3 + $0x360] sm:$0xff]  }
  0x54   :  { %3466 = vmatpush3.bf16.msra.mxu0 %v3805_v5  ;;  %v3836_v5 = vld [vmem:[%s4916_s3 + $0x3e0] sm:$0xff]  }
  0x55   :  { %3488 = vmatpush3.bf16.msra.mxu1 %v3806_v6  ;;  %3467 = vmatprep.subr.bf16.mxu0 %v3807_v7  ;;  %v3837_v6 = vld [vmem:[%s4916_s3 + $0x320] sm:$0xff]  }
  0x56   :  { %3489 = vmatprep.subr.bf16.mxu1 %v3808_v8  ;;  %v3838_v7 = vld [vmem:[%s4916_s3 + $0x3a0] sm:$0xff]   ;;  %v3839_v8 = vld [vmem:[%s4916_s3 + $0x368] sm:$0xff]  }
  0x58   :  { %3468 = vmatpush3.bf16.msra.mxu0 %v3809_v9  ;;  %v3840_v9 = vld [vmem:[%s4916_s3 + $0x3e8] sm:$0xff]  }
  0x59   :  { %3490 = vmatpush3.bf16.msra.mxu1 %v3810_v10  ;;  %3469 = vmatprep.subr.bf16.mxu0 %v3811_v11  ;;  %v3841_v10 = vld [vmem:[%s4916_s3 + $0x328] sm:$0xff]  }
  0x5a   :  { %3491 = vmatprep.subr.bf16.mxu1 %v3812_v12  ;;  %v3842_v11 = vld [vmem:[%s4916_s3 + $0x3a8] sm:$0xff]   ;;  %v3843_v12 = vld [vmem:[%s4916_s3 + $0x370] sm:$0xff]  }
  0x5c   :  { %3470 = vmatpush3.bf16.msra.mxu0 %v3813_v13  ;;  %v3844_v13 = vld [vmem:[%s4916_s3 + $0x3f0] sm:$0xff]  }
  0x5d   :  { %3492 = vmatpush3.bf16.msra.mxu1 %v3814_v17  ;;  %3471 = vmatprep.subr.bf16.mxu0 %v3815_v22  ;;  %v3848_v17 = vld [vmem:[%s4916_s3 + $0x3f8] sm:$0xff]   ;;  %v3851_v22 = vld [vmem:[%s4916_s3 + $0x440] sm:$0xff]  }
  0x5e   :  { %3493 = vmatprep.subr.bf16.mxu1 %v3816_v25  ;;  %v893_v25 = vpack.c.bf16 %v772_v20, %v772_v20  ;;  %v3886_v20 = vld [vmem:[%s4916_s3 + $0x580] sm:$0xff]  }
  0x60   :  { %3472 = vmatpush3.bf16.msra.mxu0 %v3817_v28  ;;  %v3855_v28 = vld [vmem:[%s4916_s3 + $0x448] sm:$0xff]  }
  0x61   :  { %3494 = vmatpush3.bf16.msra.mxu1 %v3818_v30  ;;  %3501 = vmatprep.subr.bf16.mxu0 %v3819_v33  ;;  %v3857_v30 = vld [vmem:[%s4916_s3 + $0x408] sm:$0xff]   ;;  %v3860_v33 = vld [vmem:[%s4916_s3 + $0x4d0] sm:$0xff]  }
  0x62   :  { %3523 = vmatprep.subr.bf16.mxu1 %v3820_v34  ;;  %v3861_v34 = vld [vmem:[%s4916_s3 + $0x410] sm:$0xff]  }
  0x63   :  { %2642 = vmatmul.mubr.bf16.vlgmr.msra.gmra.mrb[8].mxu0 %v889_v48  ;;  %v3873_v48 = vld [vmem:[%s4916_s3 + $0x428] sm:$0xff]  }
  0x64   :  { %2682 = vmatmul.mubr.bf16.vlgmr.msra.gmra.mrb[8].mxu1 %v891_v49  ;;  %3502 = vmatpush3.bf16.msra.mxu0 %v3821_v42  ;;  %v3867_v42 = vld [vmem:[%s4916_s3 + $0x460] sm:$0xff]   ;;  %v3874_v49 = vld [vmem:[%s4916_s3 + $0x4a8] sm:$0xff]  }
  0x65   :  { %3524 = vmatpush3.bf16.msra.mxu1 %v3822_v43  ;;  %3503 = vmatprep.subr.bf16.mxu0 %v3823_v50  ;;  %v3868_v43 = vld [vmem:[%s4916_s3 + $0x4e0] sm:$0xff]   ;;  %v3875_v50 = vld [vmem:[%s4916_s3 + $0x470] sm:$0xff]  }
  0x66   :  { %3525 = vmatprep.subr.bf16.mxu1 %v3824_v51  ;;  %2721 = vmatprep.mubr.bf16.mxu0 %v894_v53  ;;  %v3876_v51 = vld [vmem:[%s4916_s3 + $0x4f0] sm:$0xff]  }
  0x67   :  { %2761 = vmatprep.mubr.bf16.mxu1 %v896_v54  ;;  %v23_v53 = vld [vmem:[%s4917_s0 + $0x10] sm:$0xff] }
  0x68   :  { %3504 = vmatpush3.bf16.msra.mxu0 %v3825_v52  ;;  %v3877_v52 = vld [vmem:[%s4916_s3 + $0x430] sm:$0xff]  }
  0x69   :  { %3526 = vmatpush3.bf16.msra.mxu1 %v3826_v57  ;;  %3505 = vmatprep.subr.bf16.mxu0 %v3827_v60  ;;  %v35_v54 = vld [vmem:[%s4918_s1 + $0x10] sm:$0xff] }
  0x6a   :  { %3527 = vmatprep.subr.bf16.mxu1 %v3828_v61  ;;  %v115_v57 = vld [vmem:[%s4919_s2 + $0x10] sm:$0xff]  ;;  %v29_v61 = vunpack.c.l.bf16 %v23_v53 }
  0x6b   :  { %v3878_v60 = vld [vmem:[%s4916_s3 + $0x4b0] sm:$0xff]  }
  0x6c   :  { %3506 = vmatpush3.bf16.msra.mxu0 %v3829_v62  ;;  %v75_v62 = vrot.slane %v35_v54, %v4106_v38 }
  0x6d   :  { %3528 = vmatpush3.bf16.msra.mxu1 %v3830_v63  ;;  %3507 = vmatprep.subr.bf16.mxu0 %v3831_v0  ;;  %v155_v63 = vrot.slane %v115_v57, %v4106_v38  ;;  %v30_v0 = vunpack.c.h.bf16 %v23_v53  ;;  %v3909_v53 = vld [vmem:[%s4916_s3 + $0x530] sm:$0xff]  }
  0x6e   :  { %3529 = vmatprep.subr.bf16.mxu1 %v3832_v1  ;;  %v3879_v1 = vld [vmem:[%s4916_s3 + $0x478] sm:$0xff]  }
  0x70   :  { %3508 = vmatpush3.bf16.msra.mxu0 %v3833_v2  ;;  %v82_v2 = vrot.slane %v35_v54, %v4108_v39  ;;  %v3910_v54 = vld [vmem:[%s4916_s3 + $0x5b0] sm:$0xff]  }
  0x71   :  { %3530 = vmatpush3.bf16.msra.mxu1 %v3834_v3  ;;  %3509 = vmatprep.subr.bf16.mxu0 %v3835_v4  ;;  %v162_v3 = vrot.slane %v115_v57, %v4108_v39  ;;  %v3880_v4 = vld [vmem:[%s4916_s3 + $0x4f8] sm:$0xff]  }
  0x72   :  { %3531 = vmatprep.subr.bf16.mxu1 %v3836_v5  ;;  %v109_v5 = vmul.f32 %v75_v62, %v29_v61  ;;  %v3911_v57 = vld [vmem:[%s4916_s3 + $0x578] sm:$0xff]  }
  0x73   :  { %v3913_v61 = vld [vmem:[%s4916_s3 + $0x538] sm:$0xff]  }
  0x74   :  { %3510 = vmatpush3.bf16.msra.mxu0 %v3837_v6  ;;  %v110_v6 = vmul.f32 %v82_v2, %v30_v0  ;;  %v3914_v62 = vld [vmem:[%s4916_s3 + $0x5b8] sm:$0xff]   ;;  %v3916_v2 = vld [vmem:[%s4916_s3 + $0x6c0] sm:$0xff]  }
  0x75   :  { %3532 = vmatpush3.bf16.msra.mxu1 %v3838_v7  ;;  %3511 = vmatprep.subr.bf16.mxu0 %v3839_v8  ;;  %v3881_v7 = vld [vmem:[%s4916_s3 + $0x438] sm:$0xff]   ;;  %v189_v8 = vadd.f32 %v155_v63, %v109_v5 }
  0x76   :  { %3533 = vmatprep.subr.bf16.mxu1 %v3840_v9  ;;  %v3882_v9 = vld [vmem:[%s4916_s3 + $0x4b8] sm:$0xff]  }
  0x78   :  { %3512 = vmatpush3.bf16.msra.mxu0 %v3841_v10  ;;  %v190_v10 = vadd.f32 %v162_v3, %v110_v6  ;;  %v3917_v3 = vld [vmem:[%s4916_s3 + $0x600] sm:$0xff]  }
  0x79   :  { %3534 = vmatpush3.bf16.msra.mxu1 %v3842_v11  ;;  %3513 = vmatprep.subr.bf16.mxu0 %v3843_v12  ;;  %v197_v11 = vmax.f32 %v189_v8, 0.0  ;;  %v3883_v12 = vld [vmem:[%s4916_s3 + $0x540] sm:$0xff]   ;;  %v3920_v8 = vld [vmem:[%s4916_s3 + $0x6c8] sm:$0xff]  }
  0x7a   :  { %3535 = vmatprep.subr.bf16.mxu1 %v3844_v13  ;;  %v3884_v13 = vld [vmem:[%s4916_s3 + $0x5c0] sm:$0xff]  }
  0x7b   :  { %v3918_v6 = vld [vmem:[%s4916_s3 + $0x680] sm:$0xff]  }
  0x7c   :  { %3514 = vmatpush3.bf16.msra.mxu0 %v3845_v14  ;;  %v4581_v14 = vmax.f32 %v190_v10, 0.0  ;;  %v3922_v10 = vld [vmem:[%s4916_s3 + $0x688] sm:$0xff]  }
  0x7d   :  { %3536 = vmatpush3.bf16.msra.mxu1 %v3846_v15  ;;  %3515 = vmatprep.subr.bf16.mxu0 %v3847_v16  ;;  %v792_v15 = vrot.slane %v197_v11, %v4135_v55  ;;  %v800_v16 = vrot.slane %v197_v11, %v4137_v56 }
  0x7e   :  { %3537 = vmatprep.subr.bf16.mxu1 %v3848_v17  ;;  %v788_v17 = vrot.slane %v197_v11, %v4139_v58  ;;  %v808_v21 = vrot.slane %v4581_v14, %v4135_v55  ;;  %v804_v63 = vrot.slane %v4581_v14, %v4139_v58  ;;  %v812_v0 = vrot.slane %v4581_v14, %v4141_v59 }
  0x80   :  { %3516 = vmatpush3.bf16.msra.mxu0 %v3849_v18  ;;  %v796_v18 = vrot.slane %v197_v11, %v4141_v59  ;;  %v903_v5 = vpack.c.bf16 %v812_v0, %v812_v0  ;;  %v3923_v11 = vld [vmem:[%s4916_s3 + $0x650] sm:$0xff]  }
  0x81   :  { %3538 = vmatpush3.bf16.msra.mxu1 %v3850_v19  ;;  %3545 = vmatprep.subr.bf16.mxu0 %v3851_v22  ;;  %v3885_v19 = vld [vmem:[%s4916_s3 + $0x500] sm:$0xff]   ;;  %v816_v22 = vrot.slane %v4581_v14, %v4137_v56  ;;  %v3926_v14 = vld [vmem:[%s4916_s3 + $0x690] sm:$0xff]  }
  0x82   :  { %3567 = vmatprep.subr.bf16.mxu1 %v3852_v23  ;;  %v898_v23 = vpack.c.bf16 %v792_v15, %v792_v15  ;;  %v3927_v15 = vld [vmem:[%s4916_s3 + $0x658] sm:$0xff]  }
  0x83   :  { %2722 = vmatmul.mubr.bf16.vlgmr.msra.gmra.mrb[12].mxu0 %v893_v25  ;;  %v897_v25 = vpack.c.bf16 %v788_v17, %v788_v17  ;;  %v3929_v17 = vld [vmem:[%s4916_s3 + $0x618] sm:$0xff]  }
  0x84   :  { %2762 = vmatmul.mubr.bf16.vlgmr.msra.gmra.mrb[12].mxu1 %v895_v26  ;;  %3546 = vmatpush3.bf16.msra.mxu0 %v3853_v24  ;;  %v900_v24 = vpack.c.bf16 %v800_v16, %v800_v16  ;;  %v899_v26 = vpack.c.bf16 %v796_v18, %v796_v18  ;;  %v3928_v16 = vld [vmem:[%s4916_s3 + $0x6d8] sm:$0xff]  }
  0x85   :  { %3568 = vmatpush3.bf16.msra.mxu1 %v3854_v27  ;;  %3547 = vmatprep.subr.bf16.mxu0 %v3855_v28  ;;  %v3887_v27 = vld [vmem:[%s4916_s3 + $0x548] sm:$0xff]   ;;  %v3930_v18 = vld [vmem:[%s4916_s3 + $0x698] sm:$0xff]  }
  0x86   :  { %3569 = vmatprep.subr.bf16.mxu1 %v3856_v29  ;;  %v3888_v28 = vld [vmem:[%s4916_s3 + $0x5c8] sm:$0xff]   ;;  %2801 = vmatprep.mubr.bf16.mxu0 %v898_v23 }
  0x87   :  { %2841 = vmatprep.mubr.bf16.mxu1 %v900_v24  ;;  %v3889_v29 = vld [vmem:[%s4916_s3 + $0x508] sm:$0xff]  }
  0x88   :  { %3548 = vmatpush3.bf16.msra.mxu0 %v3857_v30  ;;  %v902_v30 = vpack.c.bf16 %v808_v21, %v808_v21  ;;  %v3933_v21 = vld [vmem:[%s4916_s3 + $0x620] sm:$0xff]   ;;  %v3935_v23 = vld [vmem:[%s4916_s3 + $0x668] sm:$0xff]  }
  0x89   :  { %3570 = vmatpush3.bf16.msra.mxu1 %v3858_v31  ;;  %3549 = vmatprep.subr.bf16.mxu0 %v3859_v32  ;;  %v904_v31 = vpack.c.bf16 %v816_v22, %v816_v22  ;;  %v3890_v32 = vld [vmem:[%s4916_s3 + $0x588] sm:$0xff]   ;;  %v3934_v22 = vld [vmem:[%s4916_s3 + $0x6a0] sm:$0xff]  }
  0x8a   :  { %3571 = vmatprep.subr.bf16.mxu1 %v3860_v33  ;;  %v3891_v33 = vld [vmem:[%s4916_s3 + $0x550] sm:$0xff]   ;;  %v3936_v24 = vld [vmem:[%s4916_s3 + $0x6e8] sm:$0xff]  }
  0x8c   :  { %3550 = vmatpush3.bf16.msra.mxu0 %v3861_v34  ;;  %v3892_v34 = vld [vmem:[%s4916_s3 + $0x5d0] sm:$0xff]  }
  0x8d   :  { %3572 = vmatpush3.bf16.msra.mxu1 %v3862_v35  ;;  %3551 = vmatprep.subr.bf16.mxu0 %v3863_v36  ;;  %v3893_v35 = vld [vmem:[%s4916_s3 + $0x510] sm:$0xff]  }
  0x8e   :  { %3573 = vmatprep.subr.bf16.mxu1 %v3864_v37  ;;  %v3894_v36 = vld [vmem:[%s4916_s3 + $0x590] sm:$0xff]   ;;  %v3895_v37 = vld [vmem:[%s4916_s3 + $0x558] sm:$0xff]  }
  0x90   :  { %3552 = vmatpush3.bf16.msra.mxu0 %v3865_v40  ;;  %v3896_v40 = vld [vmem:[%s4916_s3 + $0x5d8] sm:$0xff]  }
  0x91   :  { %3574 = vmatpush3.bf16.msra.mxu1 %v3866_v41  ;;  %3553 = vmatprep.subr.bf16.mxu0 %v3867_v42  ;;  %v3897_v41 = vld [vmem:[%s4916_s3 + $0x518] sm:$0xff]  }
  0x92   :  { %3575 = vmatprep.subr.bf16.mxu1 %v3868_v43  ;;  %v3898_v42 = vld [vmem:[%s4916_s3 + $0x598] sm:$0xff]   ;;  %v3899_v43 = vld [vmem:[%s4916_s3 + $0x560] sm:$0xff]  }
  0x94   :  { %3554 = vmatpush3.bf16.msra.mxu0 %v3869_v44  ;;  %v3900_v44 = vld [vmem:[%s4916_s3 + $0x5e0] sm:$0xff]  }
  0x95   :  { %3576 = vmatpush3.bf16.msra.mxu1 %v3870_v45  ;;  %3555 = vmatprep.subr.bf16.mxu0 %v3871_v46  ;;  %v3901_v45 = vld [vmem:[%s4916_s3 + $0x520] sm:$0xff]  }
  0x96   :  { %3577 = vmatprep.subr.bf16.mxu1 %v3872_v47  ;;  %v3902_v46 = vld [vmem:[%s4916_s3 + $0x5a0] sm:$0xff]   ;;  %v3903_v47 = vld [vmem:[%s4916_s3 + $0x568] sm:$0xff]  }
  0x98   :  { %3556 = vmatpush3.bf16.msra.mxu0 %v3873_v48  ;;  %v3904_v48 = vld [vmem:[%s4916_s3 + $0x5e8] sm:$0xff]  }
  0x99   :  { %3578 = vmatpush3.bf16.msra.mxu1 %v3874_v49  ;;  %3557 = vmatprep.subr.bf16.mxu0 %v3875_v50  ;;  %v3905_v49 = vld [vmem:[%s4916_s3 + $0x528] sm:$0xff]  }
  0x9a   :  { %3579 = vmatprep.subr.bf16.mxu1 %v3876_v51  ;;  %v3906_v50 = vld [vmem:[%s4916_s3 + $0x5a8] sm:$0xff]   ;;  %v3907_v51 = vld [vmem:[%s4916_s3 + $0x570] sm:$0xff]  }
  0x9c   :  { %3558 = vmatpush3.bf16.msra.mxu0 %v3877_v52  ;;  %v3908_v52 = vld [vmem:[%s4916_s3 + $0x5f0] sm:$0xff]  }
  0x9d   :  { %3580 = vmatpush3.bf16.msra.mxu1 %v3878_v60  ;;  %3559 = vmatprep.subr.bf16.mxu0 %v3879_v1  ;;  %v3912_v60 = vld [vmem:[%s4916_s3 + $0x5f8] sm:$0xff]   ;;  %v3915_v1 = vld [vmem:[%s4916_s3 + $0x640] sm:$0xff]  }
  0x9e   :  { %3581 = vmatprep.subr.bf16.mxu1 %v3880_v4  ;;  %v901_v4 = vpack.c.bf16 %v804_v63, %v804_v63 }
  0xa0   :  { %3560 = vmatpush3.bf16.msra.mxu0 %v3881_v7  ;;  %v3919_v7 = vld [vmem:[%s4916_s3 + $0x648] sm:$0xff]  }
  0xa1   :  { %3582 = vmatpush3.bf16.msra.mxu1 %v3882_v9  ;;  %3589 = vmatprep.subr.bf16.mxu0 %v3883_v12  ;;  %v3921_v9 = vld [vmem:[%s4916_s3 + $0x608] sm:$0xff]   ;;  %v3924_v12 = vld [vmem:[%s4916_s3 + $0x6d0] sm:$0xff]  }
  0xa2   :  { %3611 = vmatprep.subr.bf16.mxu1 %v3884_v13  ;;  %v3925_v13 = vld [vmem:[%s4916_s3 + $0x610] sm:$0xff]  }
  0xa3   :  { %2802 = vmatmul.mubr.bf16.vlgmr.msra.gmra.mrb[16].mxu0 %v897_v25  ;;  %v3937_v25 = vld [vmem:[%s4916_s3 + $0x628] sm:$0xff]  }
  0xa4   :  { %2842 = vmatmul.mubr.bf16.vlgmr.msra.gmra.mrb[16].mxu1 %v899_v26  ;;  %3590 = vmatpush3.bf16.msra.mxu0 %v3885_v19  ;;  %v3931_v19 = vld [vmem:[%s4916_s3 + $0x660] sm:$0xff]   ;;  %v3938_v26 = vld [vmem:[%s4916_s3 + $0x6a8] sm:$0xff]  }
  0xa5   :  { %3612 = vmatpush3.bf16.msra.mxu1 %v3886_v20  ;;  %3591 = vmatprep.subr.bf16.mxu0 %v3887_v27  ;;  %v3932_v20 = vld [vmem:[%s4916_s3 + $0x6e0] sm:$0xff]   ;;  %v3939_v27 = vld [vmem:[%s4916_s3 + $0x670] sm:$0xff]  }
  0xa6   :  { %3613 = vmatprep.subr.bf16.mxu1 %v3888_v28  ;;  %2881 = vmatprep.mubr.bf16.mxu0 %v902_v30  ;;  %v3940_v28 = vld [vmem:[%s4916_s3 + $0x6f0] sm:$0xff]   ;;  %v24_v30 = vld [vmem:[%s4917_s0 + $0x18] sm:$0xff] }
  0xa7   :  { %2921 = vmatprep.mubr.bf16.mxu1 %v904_v31  ;;  %v36_v31 = vld [vmem:[%s4918_s1 + $0x18] sm:$0xff] }
  0xa8   :  { %3592 = vmatpush3.bf16.msra.mxu0 %v3889_v29  ;;  %v3941_v29 = vld [vmem:[%s4916_s3 + $0x630] sm:$0xff]  }
  0xa9   :  { %3614 = vmatpush3.bf16.msra.mxu1 %v3890_v32  ;;  %3593 = vmatprep.subr.bf16.mxu0 %v3891_v33  ;;  %v116_v32 = vld [vmem:[%s4919_s2 + $0x18] sm:$0xff]  ;;  %v3942_v33 = vld [vmem:[%s4916_s3 + $0x6b0] sm:$0xff]  }
  0xaa   :  { %3615 = vmatprep.subr.bf16.mxu1 %v3892_v34  ;;  %v31_v34 = vunpack.c.l.bf16 %v24_v30 }
  0xac   :  { %3594 = vmatpush3.bf16.msra.mxu0 %v3893_v35  ;;  %v89_v35 = vrot.slane %v36_v31, %v4106_v38 }
  0xad   :  { %3616 = vmatpush3.bf16.msra.mxu1 %v3894_v36  ;;  %3595 = vmatprep.subr.bf16.mxu0 %v3895_v37  ;;  %v169_v36 = vrot.slane %v116_v32, %v4106_v38  ;;  %v32_v37 = vunpack.c.h.bf16 %v24_v30  ;;  %v3945_v38 = vld [vmem:[%s4916_s3 + $0x638] sm:$0xff]  }
  0xae   :  { %3617 = vmatprep.subr.bf16.mxu1 %v3896_v40  ;;  %v3943_v40 = vld [vmem:[%s4916_s3 + $0x678] sm:$0xff]  }
  0xb0   :  { %3596 = vmatpush3.bf16.msra.mxu0 %v3897_v41  ;;  %v96_v41 = vrot.slane %v36_v31, %v4108_v39 }
  0xb1   :  { %3618 = vmatpush3.bf16.msra.mxu1 %v3898_v42  ;;  %3597 = vmatprep.subr.bf16.mxu0 %v3899_v43  ;;  %v176_v42 = vrot.slane %v116_v32, %v4108_v39  ;;  %v3944_v43 = vld [vmem:[%s4916_s3 + $0x6f8] sm:$0xff]  }
  0xb2   :  { %3619 = vmatprep.subr.bf16.mxu1 %v3900_v44  ;;  %v111_v44 = vmul.f32 %v89_v35, %v31_v34 }
  0xb4   :  { %3598 = vmatpush3.bf16.msra.mxu0 %v3901_v45  ;;  %v112_v45 = vmul.f32 %v96_v41, %v32_v37  ;;  %v3973_v37 = vld [vmem:[%s4916_s3 + $0x730] sm:$0xff]   ;;  %v3975_v41 = vld [vmem:[%s4916_s3 + $0x778] sm:$0xff]  }
  0xb5   :  { %3620 = vmatpush3.bf16.msra.mxu1 %v3902_v46  ;;  %3599 = vmatprep.subr.bf16.mxu0 %v3903_v47  ;;  %v191_v46 = vadd.f32 %v169_v36, %v111_v44  ;;  %v3946_v47 = vld [vmem:[%s4916_s3 + $0x6b8] sm:$0xff]  }
  0xb6   :  { %3621 = vmatprep.subr.bf16.mxu1 %v3904_v48  ;;  %v192_v39 = vadd.f32 %v176_v42, %v112_v45  ;;  %v3976_v42 = vld [vmem:[%s4916_s3 + $0x7f8] sm:$0xff]  }
  0xb7   :  { %v199_v48 = vmax.f32 %v191_v46, 0.0  ;;  %v3977_v45 = vld [vmem:[%s4916_s3 + $0x738] sm:$0xff]  }
  0xb8   :  { %3600 = vmatpush3.bf16.msra.mxu0 %v3905_v49  ;;  %v3947_v49 = vld [vmem:[%s4916_s3 + $0x740] sm:$0xff]  }
  0xb9   :  { %3622 = vmatpush3.bf16.msra.mxu1 %v3906_v50  ;;  %3601 = vmatprep.subr.bf16.mxu0 %v3907_v51  ;;  %v3948_v50 = vld [vmem:[%s4916_s3 + $0x7c0] sm:$0xff]   ;;  %v4800_v51 = vmax.f32 %v192_v39, 0.0 }
  0xba   :  { %3623 = vmatprep.subr.bf16.mxu1 %v3908_v52  ;;  %v824_v52 = vrot.slane %v199_v48, %v4135_v55 }
  0xbb   :  { %v848_v63 = vrot.slane %v4800_v51, %v4137_v56  ;;  %v844_v44 = vrot.slane %v4800_v51, %v4141_v59 }
  0xbc   :  { %3602 = vmatpush3.bf16.msra.mxu0 %v3909_v53  ;;  %v832_v53 = vrot.slane %v199_v48, %v4137_v56  ;;  %v906_v0 = vpack.c.bf16 %v824_v52, %v824_v52 }
  0xbd   :  { %3624 = vmatpush3.bf16.msra.mxu1 %v3910_v54  ;;  %3603 = vmatprep.subr.bf16.mxu0 %v3911_v57  ;;  %v820_v54 = vrot.slane %v199_v48, %v4139_v58  ;;  %v828_v57 = vrot.slane %v199_v48, %v4141_v59 }
  0xbe   :  { %3625 = vmatprep.subr.bf16.mxu1 %v3912_v60  ;;  %v3949_v60 = vld [vmem:[%s4916_s3 + $0x700] sm:$0xff]  }
  0xc0   :  { %3604 = vmatpush3.bf16.msra.mxu0 %v3913_v61  ;;  %v3950_v61 = vld [vmem:[%s4916_s3 + $0x780] sm:$0xff]  }
  0xc1   :  { %3626 = vmatpush3.bf16.msra.mxu1 %v3914_v62  ;;  %3633 = vmatprep.subr.bf16.mxu0 %v3915_v1  ;;  %v840_v62 = vrot.slane %v4800_v51, %v4135_v55  ;;  %v908_v1 = vpack.c.bf16 %v832_v53, %v832_v53  ;;  %v3953_v55 = vld [vmem:[%s4916_s3 + $0x708] sm:$0xff]  }
  0xc2   :  { %3655 = vmatprep.subr.bf16.mxu1 %v3916_v2  ;;  %v905_v2 = vpack.c.bf16 %v820_v54, %v820_v54 }
  0xc3   :  { %2882 = vmatmul.mubr.bf16.vlgmr.msra.gmra.mrb[20].mxu0 %v901_v4  ;;  %v3951_v4 = vld [vmem:[%s4916_s3 + $0x748] sm:$0xff]   ;;  %v910_v56 = vpack.c.bf16 %v840_v62, %v840_v62 }
  0xc4   :  { %2922 = vmatmul.mubr.bf16.vlgmr.msra.gmra.mrb[20].mxu1 %v903_v5  ;;  %3634 = vmatpush3.bf16.msra.mxu0 %v3917_v3  ;;  %v907_v3 = vpack.c.bf16 %v828_v57, %v828_v57  ;;  %v3952_v5 = vld [vmem:[%s4916_s3 + $0x7c8] sm:$0xff]  }
  0xc5   :  { %3656 = vmatpush3.bf16.msra.mxu1 %v3918_v6  ;;  %3635 = vmatprep.subr.bf16.mxu0 %v3919_v7  ;;  %v912_v6 = vpack.c.bf16 %v848_v63, %v848_v63  ;;  %v3954_v7 = vld [vmem:[%s4916_s3 + $0x788] sm:$0xff]  }
  0xc6   :  { %3657 = vmatprep.subr.bf16.mxu1 %v3920_v8  ;;  %2961 = vmatprep.mubr.bf16.mxu0 %v906_v0  ;;  %v3955_v8 = vld [vmem:[%s4916_s3 + $0x750] sm:$0xff]  }
  0xc7   :  { %3001 = vmatprep.mubr.bf16.mxu1 %v908_v1 }
  0xc8   :  { %3636 = vmatpush3.bf16.msra.mxu0 %v3921_v9  ;;  %v3956_v9 = vld [vmem:[%s4916_s3 + $0x7d0] sm:$0xff]  }
  0xc9   :  { %3658 = vmatpush3.bf16.msra.mxu1 %v3922_v10  ;;  %3637 = vmatprep.subr.bf16.mxu0 %v3923_v11  ;;  %v3957_v10 = vld [vmem:[%s4916_s3 + $0x710] sm:$0xff]  }
  0xca   :  { %3659 = vmatprep.subr.bf16.mxu1 %v3924_v12  ;;  %v3958_v11 = vld [vmem:[%s4916_s3 + $0x790] sm:$0xff]   ;;  %v3959_v12 = vld [vmem:[%s4916_s3 + $0x758] sm:$0xff]  }
  0xcc   :  { %3638 = vmatpush3.bf16.msra.mxu0 %v3925_v13  ;;  %v3960_v13 = vld [vmem:[%s4916_s3 + $0x7d8] sm:$0xff]  }
  0xcd   :  { %3660 = vmatpush3.bf16.msra.mxu1 %v3926_v14  ;;  %3639 = vmatprep.subr.bf16.mxu0 %v3927_v15  ;;  %v3961_v14 = vld [vmem:[%s4916_s3 + $0x718] sm:$0xff]  }
  0xce   :  { %3661 = vmatprep.subr.bf16.mxu1 %v3928_v16  ;;  %v3962_v15 = vld [vmem:[%s4916_s3 + $0x798] sm:$0xff]   ;;  %v3963_v16 = vld [vmem:[%s4916_s3 + $0x760] sm:$0xff]  }
  0xd0   :  { %3640 = vmatpush3.bf16.msra.mxu0 %v3929_v17  ;;  %v3964_v17 = vld [vmem:[%s4916_s3 + $0x7e0] sm:$0xff]  }
  0xd1   :  { %3662 = vmatpush3.bf16.msra.mxu1 %v3930_v18  ;;  %3641 = vmatprep.subr.bf16.mxu0 %v3931_v19  ;;  %v3965_v18 = vld [vmem:[%s4916_s3 + $0x720] sm:$0xff]  }
  0xd2   :  { %3663 = vmatprep.subr.bf16.mxu1 %v3932_v20  ;;  %v3966_v19 = vld [vmem:[%s4916_s3 + $0x7a0] sm:$0xff]   ;;  %v3967_v20 = vld [vmem:[%s4916_s3 + $0x768] sm:$0xff]  }
  0xd4   :  { %3642 = vmatpush3.bf16.msra.mxu0 %v3933_v21  ;;  %v3968_v21 = vld [vmem:[%s4916_s3 + $0x7e8] sm:$0xff]  }
  0xd5   :  { %3664 = vmatpush3.bf16.msra.mxu1 %v3934_v22  ;;  %3643 = vmatprep.subr.bf16.mxu0 %v3935_v23  ;;  %v3969_v22 = vld [vmem:[%s4916_s3 + $0x728] sm:$0xff]  }
  0xd6   :  { %3665 = vmatprep.subr.bf16.mxu1 %v3936_v24  ;;  %v3970_v23 = vld [vmem:[%s4916_s3 + $0x7a8] sm:$0xff]  }
  0xd8   :  { %3644 = vmatpush3.bf16.msra.mxu0 %v3937_v25 }
  0xd9   :  { %3666 = vmatpush3.bf16.msra.mxu1 %v3938_v26  ;;  %3645 = vmatprep.subr.bf16.mxu0 %v3939_v27 }
  0xda   :  { %3667 = vmatprep.subr.bf16.mxu1 %v3940_v28  ;;  %v3971_v28 = vld [vmem:[%s4916_s3 + $0x770] sm:$0xff]  }
  0xdc   :  { %3646 = vmatpush3.bf16.msra.mxu0 %v3941_v29  ;;  %v3972_v29 = vld [vmem:[%s4916_s3 + $0x7f0] sm:$0xff]  }
  0xdd   :  { %3668 = vmatpush3.bf16.msra.mxu1 %v3942_v33  ;;  %3647 = vmatprep.subr.bf16.mxu0 %v3943_v40  ;;  %v3974_v40 = vld [vmem:[%s4916_s3 + $0x7b0] sm:$0xff]  }
  0xde   :  { %3669 = vmatprep.subr.bf16.mxu1 %v3944_v43  ;;  %v836_v43 = vrot.slane %v4800_v51, %v4139_v58 }
  0xe0   :  { %3648 = vmatpush3.bf16.msra.mxu0 %v3945_v38  ;;  %v3978_v38 = vld [vmem:[%s4916_s3 + $0x7b8] sm:$0xff]   ;;  %v909_v46 = vpack.c.bf16 %v836_v43, %v836_v43 }
  0xe1   :  { %3670 = vmatpush3.bf16.msra.mxu1 %v3946_v47  ;;  %3677 = vmatprep.subr.bf16.mxu0 %v3947_v49  ;;  %v911_v47 = vpack.c.bf16 %v844_v44, %v844_v44 }
  0xe2   :  { %3699 = vmatprep.subr.bf16.mxu1 %v3948_v50 }
  0xe3   :  { %2962 = vmatmul.mubr.bf16.vlgmr.msra.gmra.mrb[24].mxu0 %v905_v2 }
  0xe4   :  { %3002 = vmatmul.mubr.bf16.vlgmr.msra.gmra.mrb[24].mxu1 %v907_v3  ;;  %3678 = vmatpush3.bf16.msra.mxu0 %v3949_v60 }
  0xe5   :  { %3700 = vmatpush3.bf16.msra.mxu1 %v3950_v61  ;;  %3679 = vmatprep.subr.bf16.mxu0 %v3951_v4 }
  0xe6   :  { %3701 = vmatprep.subr.bf16.mxu1 %v3952_v5  ;;  %3041 = vmatprep.mubr.bf16.mxu0 %v910_v56 }
  0xe7   :  { %3081 = vmatprep.mubr.bf16.mxu1 %v912_v6 }
  0xe8   :  { %3680 = vmatpush3.bf16.msra.mxu0 %v3953_v55 }
  0xe9   :  { %3702 = vmatpush3.bf16.msra.mxu1 %v3954_v7  ;;  %3681 = vmatprep.subr.bf16.mxu0 %v3955_v8 }
  0xea   :  { %3703 = vmatprep.subr.bf16.mxu1 %v3956_v9 }
  0xec   :  { %3682 = vmatpush3.bf16.msra.mxu0 %v3957_v10 }
  0xed   :  { %3704 = vmatpush3.bf16.msra.mxu1 %v3958_v11  ;;  %3683 = vmatprep.subr.bf16.mxu0 %v3959_v12 }
  0xee   :  { %3705 = vmatprep.subr.bf16.mxu1 %v3960_v13 }
  0xf0   :  { %3684 = vmatpush3.bf16.msra.mxu0 %v3961_v14 }
  0xf1   :  { %3706 = vmatpush3.bf16.msra.mxu1 %v3962_v15  ;;  %3685 = vmatprep.subr.bf16.mxu0 %v3963_v16 }
  0xf2   :  { %3707 = vmatprep.subr.bf16.mxu1 %v3964_v17 }
  0xf4   :  { %3686 = vmatpush3.bf16.msra.mxu0 %v3965_v18 }
  0xf5   :  { %3708 = vmatpush3.bf16.msra.mxu1 %v3966_v19  ;;  %3687 = vmatprep.subr.bf16.mxu0 %v3967_v20 }
  0xf6   :  { %v3385_v24 = vpop.f32.mrb[0].mxu0  ;;  %3709 = vmatprep.subr.bf16.mxu1 %v3968_v21 }
  0xf7   :  { %v3407_v25 = vpop.f32.mrb[0].mxu1  ;;  %v3386_v26 = vpop.f32.mrb[1].mxu0 }
  0xf8   :  { %v3408_v27 = vpop.f32.mrb[1].mxu1  ;;  %v3387_v30 = vadd.f32 %v3386_v26, %v3385_v24  ;;  %v3388_v32 = vpop.f32.mrb[2].mxu0  ;;  %3688 = vmatpush3.bf16.msra.mxu0 %v3969_v22 }
  0xf9   :  { %v3409_v31 = vadd.f32 %v3408_v27, %v3407_v25  ;;  %v3410_v33 = vpop.f32.mrb[2].mxu1  ;;  %v3389_v34 = vpop.f32.mrb[3].mxu0  ;;  %3710 = vmatpush3.bf16.msra.mxu1 %v3970_v23  ;;  %3689 = vmatprep.subr.bf16.mxu0 %v3971_v28 }
  0xfa   :  { %v3411_v35 = vpop.f32.mrb[3].mxu1  ;;  %3711 = vmatprep.subr.bf16.mxu1 %v3972_v29 }
  0xfb   :  { %v2524_v36 = vadd.f32 %v3409_v31, %v3387_v30 }
  0xfc   :  { %3690 = vmatpush3.bf16.msra.mxu0 %v3973_v37 }
  0xfd   :  { %3712 = vmatpush3.bf16.msra.mxu1 %v3974_v40  ;;  %3691 = vmatprep.subr.bf16.mxu0 %v3975_v41 }
  0xfe   :  { %3713 = vmatprep.subr.bf16.mxu1 %v3976_v42 }
 0x100   :  { %3692 = vmatpush3.bf16.msra.mxu0 %v3977_v45 }
 0x101   :  { %3714 = vmatpush3.bf16.msra.mxu1 %v3978_v38 }
 0x103   :  { %3042 = vmatmul.mubr.bf16.vlgmr.msra.gmra.mrb[28].mxu0 %v909_v46 }
 0x104   :  { %3082 = vmatmul.mubr.bf16.vlgmr.msra.gmra.mrb[28].mxu1 %v911_v47 }
 0x116   :  { %v3429_v58 = vpop.f32.mrb[4].mxu0 }
 0x117   :  { %v3451_v59 = vpop.f32.mrb[4].mxu1  ;;  %v3430_v39 = vpop.f32.mrb[5].mxu0 }
 0x118   :  { %v3452_v48 = vpop.f32.mrb[5].mxu1  ;;  %v3431_v49 = vadd.f32 %v3430_v39, %v3429_v58  ;;  %v3432_v51 = vpop.f32.mrb[6].mxu0 }
 0x119   :  { %v3453_v50 = vadd.f32 %v3452_v48, %v3451_v59  ;;  %v3454_v52 = vpop.f32.mrb[6].mxu1  ;;  %v3433_v53 = vpop.f32.mrb[7].mxu0 }
 0x11a   :  { %v3455_v54 = vpop.f32.mrb[7].mxu1  ;;  %v2564_v57 = vadd.f32 %v3431_v49, %v2524_v36 }
 0x11c   :  { %v2604_v60 = vadd.f32 %v3453_v50, %v2564_v57 }
 0x136   :  { %v3473_v61 = vpop.f32.mrb[8].mxu0 }
 0x137   :  { %v3495_v62 = vpop.f32.mrb[8].mxu1  ;;  %v3474_v63 = vpop.f32.mrb[9].mxu0 }
 0x138   :  { %v3496_v0 = vpop.f32.mrb[9].mxu1  ;;  %v3475_v1 = vadd.f32 %v3474_v63, %v3473_v61  ;;  %v3476_v3 = vpop.f32.mrb[10].mxu0 }
 0x139   :  { %v3497_v2 = vadd.f32 %v3496_v0, %v3495_v62  ;;  %v3498_v4 = vpop.f32.mrb[10].mxu1  ;;  %v3477_v5 = vpop.f32.mrb[11].mxu0 }
 0x13a   :  { %v3499_v55 = vpop.f32.mrb[11].mxu1  ;;  %v2644_v56 = vadd.f32 %v3475_v1, %v2604_v60  ;;  %v3093_v5 = vld [vmem:[%s4920_s4] sm:$0x1] }
 0x13c   :  { %v2684_v6 = vadd.f32 %v3497_v2, %v2644_v56 }
 0x156   :  { %v3517_v7 = vpop.f32.mrb[12].mxu0 }
 0x157   :  { %v3539_v8 = vpop.f32.mrb[12].mxu1  ;;  %v3518_v9 = vpop.f32.mrb[13].mxu0 }
 0x158   :  { %v3540_v10 = vpop.f32.mrb[13].mxu1  ;;  %v3519_v11 = vadd.f32 %v3518_v9, %v3517_v7  ;;  %v3520_v13 = vpop.f32.mrb[14].mxu0 }
 0x159   :  { %v3541_v12 = vadd.f32 %v3540_v10, %v3539_v8  ;;  %v3542_v14 = vpop.f32.mrb[14].mxu1  ;;  %v3521_v15 = vpop.f32.mrb[15].mxu0 }
 0x15a   :  { %v3543_v16 = vpop.f32.mrb[15].mxu1  ;;  %v2724_v17 = vadd.f32 %v3519_v11, %v2684_v6 }
 0x15c   :  { %v2764_v18 = vadd.f32 %v3541_v12, %v2724_v17 }
 0x176   :  { %v3561_v19 = vpop.f32.mrb[16].mxu0 }
 0x177   :  { %v3583_v20 = vpop.f32.mrb[16].mxu1  ;;  %v3562_v21 = vpop.f32.mrb[17].mxu0 }
 0x178   :  { %v3584_v22 = vpop.f32.mrb[17].mxu1  ;;  %v3563_v23 = vadd.f32 %v3562_v21, %v3561_v19  ;;  %v3564_v25 = vpop.f32.mrb[18].mxu0 }
 0x179   :  { %v3585_v24 = vadd.f32 %v3584_v22, %v3583_v20  ;;  %v3586_v26 = vpop.f32.mrb[18].mxu1  ;;  %v3565_v27 = vpop.f32.mrb[19].mxu0 }
 0x17a   :  { %v3587_v28 = vpop.f32.mrb[19].mxu1  ;;  %v2804_v29 = vadd.f32 %v3563_v23, %v2764_v18 }
 0x17c   :  { %v2844_v30 = vadd.f32 %v3585_v24, %v2804_v29 }
 0x196   :  { %v3605_v31 = vpop.f32.mrb[20].mxu0 }
 0x197   :  { %v3627_v32 = vpop.f32.mrb[20].mxu1  ;;  %v3606_v33 = vpop.f32.mrb[21].mxu0 }
 0x198   :  { %v3628_v34 = vpop.f32.mrb[21].mxu1  ;;  %v3607_v35 = vadd.f32 %v3606_v33, %v3605_v31  ;;  %v3608_v37 = vpop.f32.mrb[22].mxu0 }
 0x199   :  { %v3629_v36 = vadd.f32 %v3628_v34, %v3627_v32  ;;  %v3630_v40 = vpop.f32.mrb[22].mxu1  ;;  %v3609_v41 = vpop.f32.mrb[23].mxu0 }
 0x19a   :  { %v3631_v42 = vpop.f32.mrb[23].mxu1  ;;  %v2884_v43 = vadd.f32 %v3607_v35, %v2844_v30 }
 0x19c   :  { %v2924_v44 = vadd.f32 %v3629_v36, %v2884_v43 }
 0x1b6   :  { %v3649_v45 = vpop.f32.mrb[24].mxu0 }
 0x1b7   :  { %v3671_v38 = vpop.f32.mrb[24].mxu1  ;;  %v3650_v46 = vpop.f32.mrb[25].mxu0 }
 0x1b8   :  { %v3672_v47 = vpop.f32.mrb[25].mxu1  ;;  %v3651_v58 = vadd.f32 %v3650_v46, %v3649_v45  ;;  %v3652_v39 = vpop.f32.mrb[26].mxu0 }
 0x1b9   :  { %v3673_v59 = vadd.f32 %v3672_v47, %v3671_v38  ;;  %v3674_v48 = vpop.f32.mrb[26].mxu1  ;;  %v3653_v49 = vpop.f32.mrb[27].mxu0 }
 0x1ba   :  { %v3675_v50 = vpop.f32.mrb[27].mxu1  ;;  %v2964_v51 = vadd.f32 %v3651_v58, %v2924_v44 }
 0x1bc   :  { %v3004_v52 = vadd.f32 %v3673_v59, %v2964_v51 }
 0x1d6   :  { %v3693_v53 = vpop.f32.mrb[28].mxu0 }
 0x1d7   :  { %v3715_v54 = vpop.f32.mrb[28].mxu1  ;;  %v3694_v57 = vpop.f32.mrb[29].mxu0 }
 0x1d8   :  { %v3716_v60 = vpop.f32.mrb[29].mxu1  ;;  %v3695_v61 = vadd.f32 %v3694_v57, %v3693_v53  ;;  %v3696_v63 = vpop.f32.mrb[30].mxu0 }
 0x1d9   :  { %v3717_v62 = vadd.f32 %v3716_v60, %v3715_v54  ;;  %v3718_v0 = vpop.f32.mrb[30].mxu1  ;;  %v3697_v1 = vpop.f32.mrb[31].mxu0 }
 0x1da   :  { %v3719_v2 = vpop.f32.mrb[31].mxu1  ;;  %v3044_v3 = vadd.f32 %v3695_v61, %v3004_v52 }
 0x1dc   :  { %v3084_v4 = vadd.f32 %v3717_v62, %v3044_v3 }
 0x1de   :  { %v3089_v55 = vpack.c.bf16 %v3084_v4, %v3084_v4  ;;  %3097 = vst [vmem:[%s4921_s5] sm:$0x1] %v3084_v4  ;;  %v3098_v56 = vmul.f32 %v3084_v4, %v3084_v4 }
 0x1e0   :  { %v3094_v6 = vsel %vm3092_vm2, %v3089_v55, %v3093_v5  ;;  %3100 = vst [vmem:[%s4922_s6] sm:$0x1] %v3098_v56 }
 0x1e1   :  { %3095 = vst [vmem:[%s4920_s4] sm:$0x1] %v3094_v6 }

// kernel: tile.73
= control target key start
LH: loop header
LB: loop body
LE: loop exit
PB: predicated region body
PF: predicated region fallthrough
CT: control target
= control target key end

     0   :  { %s40_s0 = inlined_call_operand.vmem [shape: f32[32], index: 0, kind: input, shape index: {}]   ;;  %s41_s1 = inlined_call_operand.vmem [shape: f32[32,32], index: 1, kind: output, shape index: {}]  }
   0x1   :  { %v4_v0 = vld [vmem:[%s40_s0] ss:$0 sm:$0xff] }
   0x2   :  { %5 = vst [vmem:[%s41_s1] sm:$0xff] %v4_v0  ;;  %12 = vst [vmem:[%s41_s1 + $0x8] sm:$0xff] %v4_v0 }
   0x3   :  { %13 = vst [vmem:[%s41_s1 + $0x10] sm:$0xff] %v4_v0  ;;  %14 = vst [vmem:[%s41_s1 + $0x18] sm:$0xff] %v4_v0 }

// kernel: tile.78
= control target key start
LH: loop header
LB: loop body
LE: loop exit
PB: predicated region body
PF: predicated region fallthrough
CT: control target
= control target key end

     0   :  { %s93_s8 = smov 96   ;;  %vm3_vm0 = vcmask 261120   ;;  %s95_s15 = smov 64   ;;  %vm10_vm1 = vcmask 1048320   ;;  %vm17_vm2 = vcmask 785920   ;;  %vm24_vm3 = vcmask 523520   ;;  %s142_s0 = inlined_call_operand.vmem [shape: f32[32,32], index: 0, kind: input, shape index: {}]   ;;  %s143_s1 = inlined_call_operand.vmem [shape: f32[1,1024], index: 1, kind: output, shape index: {}]  }
   0x1   :  { %v80_v0 = vld [vmem:[%s142_s0 + $0x3] ss:$4 sm:$0xff]   ;;  %v82_v1 = vld [vmem:[%s142_s0 + $0x1] ss:$4 sm:$0xff]   ;;  %v2_v2 = vld [vmem:[%s142_s0] ss:$4 sm:$0xff]  }
   0x2   :  { %8 = vrot.lane.b32.xlu0 %v80_v0, %s93_s8  ;;  %v81_v3 = vld [vmem:[%s142_s0 + $0x2] ss:$4 sm:$0xff]   ;;  %s94_s0 = smov 32   ;;  %4 = vst.msk [vmem:[#allocation0] ss:$8 sm:$0xf] %vm3_vm0, %v2_v2  }
   0x3   :  { %22 = vrot.lane.b32.xlu1 %v82_v1, %s94_s0  ;;  %5 = vst.msk [vmem:[#allocation0] ss:$8 sm:$0xf0] %vm3_vm0, %v2_v2  }
   0x6   :  { %15 = vrot.lane.b32.xlu0 %v81_v3, %s95_s15 }
  0x74   :  { %v9_v4 = vpop.permute.xlu0 %8  }
  0x75   :  { %11 = vst.msk [vmem:[#allocation0] ss:$8 sm:$0xf] %vm10_vm1, %v9_v4   ;;  %12 = vst.msk [vmem:[#allocation0] ss:$8 sm:$0xf0] %vm10_vm1, %v9_v4   ;;  %v23_v5 = vpop.permute.xlu1 %22  }
  0x78   :  { %v16_v6 = vpop.permute.xlu0 %15  }
  0x79   :  { %18 = vst.msk [vmem:[#allocation0] ss:$8 sm:$0xf] %vm17_vm2, %v16_v6   ;;  %19 = vst.msk [vmem:[#allocation0] ss:$8 sm:$0xf0] %vm17_vm2, %v16_v6  }
  0x7a   :  { %25 = vst.msk [vmem:[#allocation0] ss:$8 sm:$0xf] %vm24_vm3, %v23_v5   ;;  %26 = vst.msk [vmem:[#allocation0] ss:$8 sm:$0xf0] %vm24_vm3, %v23_v5  }
  0x81   :  { %v30_v7 = vld [vmem:[#allocation0] sm:$0x1]  ;;  %v34_v8 = vld [vmem:[#allocation0 + $0x8] sm:$0x1]  ;;  %v39_v9 = vld [vmem:[#allocation0 + $0x10] sm:$0x1] }
  0x82   :  { %32 = vst [vmem:[%s143_s1] sm:$0x1] %v30_v7  ;;  %83 = vst [vmem:[%s143_s1 + $0x1] sm:$0x1] %v34_v8  ;;  %v45_v10 = vld [vmem:[#allocation0 + $0x18] sm:$0x1] }
  0x83   :  { %84 = vst [vmem:[%s143_s1 + $0x2] sm:$0x1] %v39_v9  ;;  %v51_v11 = vld [vmem:[#allocation0 + $0x20] sm:$0x1]  ;;  %v57_v12 = vld [vmem:[#allocation0 + $0x28] sm:$0x1] }
  0x84   :  { %85 = vst [vmem:[%s143_s1 + $0x3] sm:$0x1] %v45_v10  ;;  %86 = vst [vmem:[%s143_s1 + $0x4] sm:$0x1] %v51_v11  ;;  %v63_v13 = vld [vmem:[#allocation0 + $0x30] sm:$0x1] }
  0x85   :  { %87 = vst [vmem:[%s143_s1 + $0x5] sm:$0x1] %v57_v12  ;;  %v69_v14 = vld [vmem:[#allocation0 + $0x38] sm:$0x1]  ;;  %88 = vst [vmem:[%s143_s1 + $0x6] sm:$0x1] %v63_v13 }
  0x86   :  { %89 = vst [vmem:[%s143_s1 + $0x7] sm:$0x1] %v69_v14 }

// kernel: autoencoder_forward.10
= control target key start
LH: loop header
LB: loop body
LE: loop exit
PB: predicated region body
PF: predicated region fallthrough
CT: control target
= control target key end

     0   :  { %v3382_v3 = vmov 0   ;;  %vm2485_vm0 = vcmask 1040384   ;;  %vm2486_vm1 = vsmask.f32 256  ;;  %vm2488_vm2 = vcmask 1041409   ;;  %s4415_s3 = inlined_call_operand.vmem [shape: bf16[128,4096], index: 3, kind: input, shape index: {}]   ;;  %s4416_s0 = inlined_call_operand.vmem [shape: bf16[1,128], index: 0, kind: input, shape index: {}]   ;;  %s4417_s1 = inlined_call_operand.vmem [shape: f32[1,128], index: 1, kind: input, shape index: {}]   ;;  %s4418_s2 = inlined_call_operand.vmem [shape: f32[1,128], index: 2, kind: input, shape index: {}]   ;;  %s4419_s4 = inlined_call_operand.vmem [shape: bf16[1,4096], index: 4, kind: output, shape index: {0}]   ;;  %s4420_s5 = inlined_call_operand.vmem [shape: f32[1,1,4096], index: 5, kind: output, shape index: {1}]   ;;  %s4421_s6 = inlined_call_operand.vmem [shape: f32[1,1,4096], index: 6, kind: output, shape index: {2}]  }
   0x1   :  { %v28_v0 = vld [vmem:[%s4415_s3] sm:$0xff]  ;;  %v29_v2 = vld [vmem:[%s4415_s3 + $0x8] sm:$0xff]  ;;  %1597 = vmatprep.mubr.bf16.mxu0 %v3382_v3  ;;  %1638 = vmatprep.mubr.bf16.mxu1 %v3382_v3  ;;  %vm2489_vm3 = vsmask.f32 1280  ;;  %vm2487_vm4 = vmand %vm2485_vm0, %vm2486_vm1  ;;  %vm2492_vm6 = vcmask 1042434   ;;  %vm2496_vm10 = vcmask 1043459  }
   0x2   :  { %v44_v1 = vld [vmem:[%s4415_s3 + $0x80] sm:$0xff]  ;;  %v45_v5 = vld [vmem:[%s4415_s3 + $0x88] sm:$0xff]  ;;  %vm2490_vm5 = vmand %vm2488_vm2, %vm2489_vm3  ;;  %vm2493_vm7 = vsmask.f32 2304  ;;  %vm2497_vm11 = vsmask.f32 3328 }
   0x3   :  { %v3109_v4 = vcombine.high %v28_v0, %v44_v1  ;;  %v3108_v6 = vcombine.low %v28_v0, %v44_v1  ;;  %v60_v7 = vld [vmem:[%s4415_s3 + $0x100] sm:$0xff]  ;;  %v3111_v9 = vcombine.high %v29_v2, %v45_v5  ;;  %v3110_v10 = vcombine.low %v29_v2, %v45_v5  ;;  %v61_v12 = vld [vmem:[%s4415_s3 + $0x108] sm:$0xff]  ;;  %vm2491_vm8 = vmor %vm2490_vm5, %vm2487_vm4 }
   0x4   :  { %v76_v8 = vld [vmem:[%s4415_s3 + $0x180] sm:$0xff]  ;;  %v77_v13 = vld [vmem:[%s4415_s3 + $0x188] sm:$0xff]  ;;  %vm2494_vm9 = vmand %vm2492_vm6, %vm2493_vm7  ;;  %vm2500_vm14 = vcmask 1044484   ;;  %vm2501_vm15 = vsmask.f32 4352  ;;  %vm2504_vm2 = vcmask 1045509  }
   0x5   :  { %v3141_v11 = vcombine.high %v60_v7, %v76_v8  ;;  %v92_v14 = vld [vmem:[%s4415_s3 + $0x200] sm:$0xff]  ;;  %1565 = vmatprep.subr.bf16.mxu0 %v3109_v4  ;;  %v3143_v15 = vcombine.high %v61_v12, %v77_v13  ;;  %v93_v17 = vld [vmem:[%s4415_s3 + $0x208] sm:$0xff]  ;;  %1606 = vmatprep.subr.bf16.mxu1 %v3111_v9  ;;  %v3140_v19 = vcombine.low %v60_v7, %v76_v8  ;;  %v46_v7 = vld [vmem:[%s4415_s3 + $0x90] sm:$0xff]  ;;  %vm2505_vm3 = vsmask.f32 5376 }
   0x6   :  { %v108_v16 = vld [vmem:[%s4415_s3 + $0x280] sm:$0xff]  ;;  %v109_v18 = vld [vmem:[%s4415_s3 + $0x288] sm:$0xff]  ;;  %1566 = vmatpush1.bf16.msra.mxu0 %v3108_v6  ;;  %1607 = vmatpush1.bf16.msra.mxu1 %v3110_v10  ;;  %v3142_v20 = vcombine.low %v61_v12, %v77_v13  ;;  %v30_v6 = vld [vmem:[%s4415_s3 + $0x10] sm:$0xff]  ;;  %vm2508_vm6 = vcmask 1046534   ;;  %vm2509_vm7 = vsmask.f32 6400 }
   0x7   :  { %1567 = vmatprep.subr.bf16.mxu0 %v3141_v11  ;;  %v3173_v21 = vcombine.high %v92_v14, %v108_v16  ;;  %1608 = vmatprep.subr.bf16.mxu1 %v3143_v15  ;;  %v3175_v22 = vcombine.high %v93_v17, %v109_v18  ;;  %v124_v23 = vld [vmem:[%s4415_s3 + $0x300] sm:$0xff]  ;;  %v125_v25 = vld [vmem:[%s4415_s3 + $0x308] sm:$0xff]  ;;  %v3172_v27 = vcombine.low %v92_v14, %v108_v16  ;;  %v31_v9 = vld [vmem:[%s4415_s3 + $0x18] sm:$0xff] }
   0x8   :  { %v140_v24 = vld [vmem:[%s4415_s3 + $0x380] sm:$0xff]  ;;  %v141_v26 = vld [vmem:[%s4415_s3 + $0x388] sm:$0xff]  ;;  %v3174_v28 = vcombine.low %v93_v17, %v109_v18  ;;  %v47_v10 = vld [vmem:[%s4415_s3 + $0x98] sm:$0xff]  ;;  %v3113_v13 = vcombine.high %v30_v6, %v46_v7 }
   0x9   :  { %v3205_v29 = vcombine.high %v124_v23, %v140_v24  ;;  %v3207_v30 = vcombine.high %v125_v25, %v141_v26  ;;  %v156_v31 = vld [vmem:[%s4415_s3 + $0x400] sm:$0xff]  ;;  %v157_v33 = vld [vmem:[%s4415_s3 + $0x408] sm:$0xff]  ;;  %v3204_v35 = vcombine.low %v124_v23, %v140_v24  ;;  %v3206_v37 = vcombine.low %v125_v25, %v141_v26  ;;  %v62_v15 = vld [vmem:[%s4415_s3 + $0x110] sm:$0xff] }
   0xa   :  { %1568 = vmatpush1.bf16.msra.mxu0 %v3140_v19  ;;  %1609 = vmatpush1.bf16.msra.mxu1 %v3142_v20  ;;  %v172_v32 = vld [vmem:[%s4415_s3 + $0x480] sm:$0xff]  ;;  %v173_v34 = vld [vmem:[%s4415_s3 + $0x488] sm:$0xff]  ;;  %v3115_v14 = vcombine.high %v31_v9, %v47_v10  ;;  %v78_v16 = vld [vmem:[%s4415_s3 + $0x190] sm:$0xff]  ;;  %v3112_v20 = vcombine.low %v30_v6, %v46_v7 }
   0xb   :  { %1569 = vmatprep.subr.bf16.mxu0 %v3173_v21  ;;  %1610 = vmatprep.subr.bf16.mxu1 %v3175_v22  ;;  %v21_v36 = vld [vmem:[%s4416_s0] sm:$0x1]  ;;  %v3237_v38 = vcombine.high %v156_v31, %v172_v32  ;;  %v3239_v39 = vcombine.high %v157_v33, %v173_v34  ;;  %v189_v42 = vld [vmem:[%s4415_s3 + $0x508] sm:$0xff]  ;;  %v3236_v45 = vcombine.low %v156_v31, %v172_v32  ;;  %v63_v18 = vld [vmem:[%s4415_s3 + $0x118] sm:$0xff] }
   0xc   :  { %v188_v40 = vld [vmem:[%s4415_s3 + $0x500] sm:$0xff]  ;;  %v205_v43 = vld [vmem:[%s4415_s3 + $0x588] sm:$0xff]  ;;  %v22_v44 = vunpack.c.l.bf16 %v21_v36  ;;  %v3238_v47 = vcombine.low %v157_v33, %v173_v34  ;;  %v79_v19 = vld [vmem:[%s4415_s3 + $0x198] sm:$0xff]  ;;  %v3114_v21 = vcombine.low %v31_v9, %v47_v10  ;;  %v3145_v22 = vcombine.high %v62_v15, %v78_v16 }
   0xd   :  { %v204_v41 = vld [vmem:[%s4415_s3 + $0x580] sm:$0xff]  ;;  %v3271_v49 = vcombine.high %v189_v42, %v205_v43  ;;  %v221_v52 = vld [vmem:[%s4415_s3 + $0x608] sm:$0xff]  ;;  %v3270_v57 = vcombine.low %v189_v42, %v205_v43  ;;  %v3147_v23 = vcombine.high %v63_v18, %v79_v19  ;;  %v94_v24 = vld [vmem:[%s4415_s3 + $0x210] sm:$0xff] }
   0xe   :  { %1570 = vmatpush1.bf16.msra.mxu0 %v3172_v27  ;;  %1611 = vmatpush1.bf16.msra.mxu1 %v3174_v28  ;;  %v23_v46 = vld [vmem:[%s4417_s1] sm:$0x1]  ;;  %v3269_v48 = vcombine.high %v188_v40, %v204_v41  ;;  %v237_v53 = vld [vmem:[%s4415_s3 + $0x688] sm:$0xff]  ;;  %v3268_v55 = vcombine.low %v188_v40, %v204_v41  ;;  %v110_v25 = vld [vmem:[%s4415_s3 + $0x290] sm:$0xff]  ;;  %v3144_v28 = vcombine.low %v62_v15, %v78_v16 }
   0xf   :  { %1571 = vmatprep.subr.bf16.mxu0 %v3205_v29  ;;  %1612 = vmatprep.subr.bf16.mxu1 %v3207_v30  ;;  %v220_v50 = vld [vmem:[%s4415_s3 + $0x600] sm:$0xff]  ;;  %v24_v54 = vmul.f32 %v23_v46, %v22_v44  ;;  %v3303_v59 = vcombine.high %v221_v52, %v237_v53  ;;  %v253_v62 = vld [vmem:[%s4415_s3 + $0x708] sm:$0xff]  ;;  %v3302_v2 = vcombine.low %v221_v52, %v237_v53  ;;  %v95_v26 = vld [vmem:[%s4415_s3 + $0x218] sm:$0xff] }
  0x10   :  { %v236_v51 = vld [vmem:[%s4415_s3 + $0x680] sm:$0xff]  ;;  %v269_v63 = vld [vmem:[%s4415_s3 + $0x788] sm:$0xff]  ;;  %v111_v27 = vld [vmem:[%s4415_s3 + $0x298] sm:$0xff]  ;;  %v3146_v29 = vcombine.low %v63_v18, %v79_v19  ;;  %v3177_v30 = vcombine.high %v94_v24, %v110_v25  ;;  %v3176_v36 = vcombine.low %v94_v24, %v110_v25 }
  0x11   :  { %v25_v56 = vld [vmem:[%s4418_s2] sm:$0x1]  ;;  %v3301_v58 = vcombine.high %v220_v50, %v236_v51  ;;  %v3300_v1 = vcombine.low %v220_v50, %v236_v51  ;;  %v3335_v5 = vcombine.high %v253_v62, %v269_v63  ;;  %v3334_v12 = vcombine.low %v253_v62, %v269_v63  ;;  %v126_v32 = vld [vmem:[%s4415_s3 + $0x310] sm:$0xff]  ;;  %v127_v34 = vld [vmem:[%s4415_s3 + $0x318] sm:$0xff] }
  0x12   :  { %1572 = vmatpush1.bf16.msra.mxu0 %v3204_v35  ;;  %1613 = vmatpush1.bf16.msra.mxu1 %v3206_v37  ;;  %v252_v60 = vld [vmem:[%s4415_s3 + $0x700] sm:$0xff]  ;;  %v26_v0 = vadd.f32 %v25_v56, %v24_v54  ;;  %v3179_v31 = vcombine.high %v95_v26, %v111_v27  ;;  %v142_v33 = vld [vmem:[%s4415_s3 + $0x390] sm:$0xff]  ;;  %v143_v35 = vld [vmem:[%s4415_s3 + $0x398] sm:$0xff]  ;;  %v3178_v37 = vcombine.low %v95_v26, %v111_v27 }
  0x13   :  { %1573 = vmatprep.subr.bf16.mxu0 %v3237_v38  ;;  %1614 = vmatprep.subr.bf16.mxu1 %v3239_v39  ;;  %v268_v61 = vld [vmem:[%s4415_s3 + $0x780] sm:$0xff]  ;;  %v3209_v38 = vcombine.high %v126_v32, %v142_v33  ;;  %v3211_v39 = vcombine.high %v127_v34, %v143_v35  ;;  %v158_v40 = vld [vmem:[%s4415_s3 + $0x410] sm:$0xff]  ;;  %v159_v42 = vld [vmem:[%s4415_s3 + $0x418] sm:$0xff]  ;;  %v3208_v44 = vcombine.low %v126_v32, %v142_v33 }
  0x14   :  { %v3333_v4 = vcombine.high %v252_v60, %v268_v61  ;;  %v27_v8 = vmax.f32 %v26_v0, 0.0  ;;  %v3332_v11 = vcombine.low %v252_v60, %v268_v61  ;;  %v174_v41 = vld [vmem:[%s4415_s3 + $0x490] sm:$0xff]  ;;  %v175_v43 = vld [vmem:[%s4415_s3 + $0x498] sm:$0xff]  ;;  %v32_v9 = vld [vmem:[%s4415_s3 + $0x20] sm:$0xff] }
  0x15   :  { %v3241_v46 = vcombine.high %v158_v40, %v174_v41  ;;  %v191_v50 = vld [vmem:[%s4415_s3 + $0x518] sm:$0xff]  ;;  %v3240_v52 = vcombine.low %v158_v40, %v174_v41  ;;  %v3242_v53 = vcombine.low %v159_v42, %v175_v43  ;;  %v222_v56 = vld [vmem:[%s4415_s3 + $0x610] sm:$0xff]  ;;  %v48_v10 = vld [vmem:[%s4415_s3 + $0xa0] sm:$0xff] }
  0x16   :  { %1574 = vmatpush1.bf16.msra.mxu0 %v3236_v45  ;;  %1615 = vmatpush1.bf16.msra.mxu1 %v3238_v47  ;;  %v3544_v17 = vpack.c.bf16 %v27_v8, %v27_v8  ;;  %v3210_v45 = vcombine.low %v127_v34, %v143_v35  ;;  %v3243_v47 = vcombine.high %v159_v42, %v175_v43  ;;  %v207_v51 = vld [vmem:[%s4415_s3 + $0x598] sm:$0xff]  ;;  %v254_v0 = vld [vmem:[%s4415_s3 + $0x710] sm:$0xff]  ;;  %v64_v18 = vld [vmem:[%s4415_s3 + $0x120] sm:$0xff] }
  0x17   :  { %1575 = vmatprep.subr.bf16.mxu0 %v3269_v48  ;;  %1616 = vmatprep.subr.bf16.mxu1 %v3271_v49  ;;  %v190_v48 = vld [vmem:[%s4415_s3 + $0x510] sm:$0xff]  ;;  %v3274_v61 = vcombine.low %v191_v50, %v207_v51  ;;  %v3117_v15 = vcombine.high %v32_v9, %v48_v10  ;;  %v80_v19 = vld [vmem:[%s4415_s3 + $0x1a0] sm:$0xff]  ;;  %vm2495_vm12 = vmor %vm2494_vm9, %vm2491_vm8 }
  0x18   :  { %v206_v49 = vld [vmem:[%s4415_s3 + $0x590] sm:$0xff]  ;;  %v3149_v24 = vcombine.high %v64_v18, %v80_v19  ;;  %v96_v26 = vld [vmem:[%s4415_s3 + $0x220] sm:$0xff]  ;;  %vm2498_vm13 = vmand %vm2496_vm10, %vm2497_vm11  ;;  %vm2512_vm10 = vcmask 1047559   ;;  %vm2513_vm11 = vsmask.f32 7424 }
  0x19   :  { %v3273_v54 = vcombine.high %v190_v48, %v206_v49  ;;  %v3272_v60 = vcombine.low %v190_v48, %v206_v49  ;;  %v112_v27 = vld [vmem:[%s4415_s3 + $0x2a0] sm:$0xff]  ;;  %vm2499_vm0 = vmor %vm2498_vm13, %vm2495_vm12 }
  0x1a   :  { %1576 = vmatpush1.bf16.msra.mxu0 %v3268_v55  ;;  %1617 = vmatpush1.bf16.msra.mxu1 %v3270_v57  ;;  %v3275_v55 = vcombine.high %v191_v50, %v207_v51  ;;  %v238_v57 = vld [vmem:[%s4415_s3 + $0x690] sm:$0xff]  ;;  %v3181_v32 = vcombine.high %v96_v26, %v112_v27  ;;  %v128_v34 = vld [vmem:[%s4415_s3 + $0x320] sm:$0xff]  ;;  %vm2502_vm1 = vmand %vm2500_vm14, %vm2501_vm15 }
  0x1b   :  { %1577 = vmatprep.subr.bf16.mxu0 %v3301_v58  ;;  %1618 = vmatprep.subr.bf16.mxu1 %v3303_v59  ;;  %v223_v58 = vld [vmem:[%s4415_s3 + $0x618] sm:$0xff]  ;;  %v3305_v62 = vcombine.high %v222_v56, %v238_v57  ;;  %v144_v35 = vld [vmem:[%s4415_s3 + $0x3a0] sm:$0xff]  ;;  %vm4256_vm4 = vmor %vm2502_vm1, %vm2499_vm0 }
  0x1c   :  { %v239_v59 = vld [vmem:[%s4415_s3 + $0x698] sm:$0xff]  ;;  %v3213_v40 = vcombine.high %v128_v34, %v144_v35  ;;  %v160_v42 = vld [vmem:[%s4415_s3 + $0x420] sm:$0xff]  ;;  %vm4260_vm5 = vmand %vm2504_vm2, %vm2505_vm3 }
  0x1d   :  { %v3307_v63 = vcombine.high %v223_v58, %v239_v59  ;;  %v3306_v6 = vcombine.low %v223_v58, %v239_v59  ;;  %v176_v43 = vld [vmem:[%s4415_s3 + $0x4a0] sm:$0xff]  ;;  %vm2507_vm8 = vmor %vm4260_vm5, %vm4256_vm4 }
  0x1e   :  { %1578 = vmatpush1.bf16.msra.mxu0 %v3300_v1  ;;  %1619 = vmatpush1.bf16.msra.mxu1 %v3302_v2  ;;  %v270_v1 = vld [vmem:[%s4415_s3 + $0x790] sm:$0xff]  ;;  %v255_v2 = vld [vmem:[%s4415_s3 + $0x718] sm:$0xff]  ;;  %v3245_v48 = vcombine.high %v160_v42, %v176_v43  ;;  %v192_v50 = vld [vmem:[%s4415_s3 + $0x520] sm:$0xff] }
  0x1f   :  { %1579 = vmatprep.subr.bf16.mxu0 %v3333_v4  ;;  %1620 = vmatprep.subr.bf16.mxu1 %v3335_v5  ;;  %v271_v4 = vld [vmem:[%s4415_s3 + $0x798] sm:$0xff]  ;;  %v3304_v5 = vcombine.low %v222_v56, %v238_v57  ;;  %v3337_v7 = vcombine.high %v254_v0, %v270_v1  ;;  %v208_v51 = vld [vmem:[%s4415_s3 + $0x5a0] sm:$0xff]  ;;  %vm4268_vm9 = vmand %vm2508_vm6, %vm2509_vm7 }
  0x20   :  { %v3339_v8 = vcombine.high %v255_v2, %v271_v4  ;;  %v3277_v56 = vcombine.high %v192_v50, %v208_v51  ;;  %v224_v58 = vld [vmem:[%s4415_s3 + $0x620] sm:$0xff]  ;;  %vm2511_vm12 = vmor %vm4268_vm9, %vm2507_vm8 }
  0x21   :  { %v240_v59 = vld [vmem:[%s4415_s3 + $0x6a0] sm:$0xff]  ;;  %vm2514_vm13 = vmand %vm2512_vm10, %vm2513_vm11 }
  0x22   :  { %1580 = vmatpush1.bf16.msra.mxu0 %v3332_v11  ;;  %1621 = vmatpush1.bf16.msra.mxu1 %v3334_v12  ;;  %v33_v11 = vld [vmem:[%s4415_s3 + $0x28] sm:$0xff]  ;;  %vm4296_vm14 = vmor %vm2514_vm13, %vm2511_vm12 }
  0x23   :  { %1647 = vmatprep.subr.bf16.mxu0 %v3113_v13  ;;  %1688 = vmatprep.subr.bf16.mxu1 %v3115_v14  ;;  %v49_v12 = vld [vmem:[%s4415_s3 + $0xa8] sm:$0xff]  ;;  %v3336_v13 = vcombine.low %v254_v0, %v270_v1  ;;  %v3338_v14 = vcombine.low %v255_v2, %v271_v4  ;;  %v3309_v0 = vcombine.high %v224_v58, %v240_v59  ;;  %v256_v2 = vld [vmem:[%s4415_s3 + $0x720] sm:$0xff] }
  0x24   :  { %v3119_v16 = vcombine.high %v33_v11, %v49_v12  ;;  %v272_v4 = vld [vmem:[%s4415_s3 + $0x7a0] sm:$0xff] }
  0x25   :  { %1598 = vmatmul.mubr.bf16.vlgmr.msra.gmra.mrb[0].mxu0 %v3544_v17  ;;  %1639 = vmatmul.mubr.bf16.vlgmr.msra.gmra.mrb[0].mxu1 %v3544_v17 }
  0x26   :  { %1648 = vmatpush1.bf16.msra.mxu0 %v3112_v20  ;;  %1689 = vmatpush1.bf16.msra.mxu1 %v3114_v21  ;;  %v65_v20 = vld [vmem:[%s4415_s3 + $0x128] sm:$0xff] }
  0x27   :  { %1649 = vmatprep.subr.bf16.mxu0 %v3145_v22  ;;  %1690 = vmatprep.subr.bf16.mxu1 %v3147_v23  ;;  %v81_v21 = vld [vmem:[%s4415_s3 + $0x1a8] sm:$0xff]  ;;  %v3116_v22 = vcombine.low %v32_v9, %v48_v10  ;;  %v3118_v23 = vcombine.low %v33_v11, %v49_v12  ;;  %v3341_v9 = vcombine.high %v256_v2, %v272_v4  ;;  %v34_v11 = vld [vmem:[%s4415_s3 + $0x30] sm:$0xff] }
  0x28   :  { %1679 = vmatprep.mubr.bf16.mxu0 %v3382_v3  ;;  %1720 = vmatprep.mubr.bf16.mxu1 %v3382_v3  ;;  %v3151_v25 = vcombine.high %v65_v20, %v81_v21  ;;  %v50_v12 = vld [vmem:[%s4415_s3 + $0xb0] sm:$0xff] }
  0x2a   :  { %1650 = vmatpush1.bf16.msra.mxu0 %v3144_v28  ;;  %1691 = vmatpush1.bf16.msra.mxu1 %v3146_v29  ;;  %v97_v28 = vld [vmem:[%s4415_s3 + $0x228] sm:$0xff] }
  0x2b   :  { %1651 = vmatprep.subr.bf16.mxu0 %v3177_v30  ;;  %1692 = vmatprep.subr.bf16.mxu1 %v3179_v31  ;;  %v113_v29 = vld [vmem:[%s4415_s3 + $0x2a8] sm:$0xff]  ;;  %v3148_v30 = vcombine.low %v64_v18, %v80_v19  ;;  %v3150_v31 = vcombine.low %v65_v20, %v81_v21  ;;  %v3121_v18 = vcombine.high %v34_v11, %v50_v12  ;;  %v66_v20 = vld [vmem:[%s4415_s3 + $0x130] sm:$0xff] }
  0x2c   :  { %v3183_v33 = vcombine.high %v97_v28, %v113_v29  ;;  %v82_v21 = vld [vmem:[%s4415_s3 + $0x1b0] sm:$0xff] }
  0x2e   :  { %1652 = vmatpush1.bf16.msra.mxu0 %v3176_v36  ;;  %1693 = vmatpush1.bf16.msra.mxu1 %v3178_v37  ;;  %v129_v36 = vld [vmem:[%s4415_s3 + $0x328] sm:$0xff] }
  0x2f   :  { %1653 = vmatprep.subr.bf16.mxu0 %v3209_v38  ;;  %1694 = vmatprep.subr.bf16.mxu1 %v3211_v39  ;;  %v145_v37 = vld [vmem:[%s4415_s3 + $0x3a8] sm:$0xff]  ;;  %v3180_v38 = vcombine.low %v96_v26, %v112_v27  ;;  %v3182_v39 = vcombine.low %v97_v28, %v113_v29  ;;  %v3153_v26 = vcombine.high %v66_v20, %v82_v21  ;;  %v98_v28 = vld [vmem:[%s4415_s3 + $0x230] sm:$0xff] }
  0x30   :  { %v3215_v41 = vcombine.high %v129_v36, %v145_v37  ;;  %v114_v29 = vld [vmem:[%s4415_s3 + $0x2b0] sm:$0xff] }
  0x32   :  { %1654 = vmatpush1.bf16.msra.mxu0 %v3208_v44  ;;  %1695 = vmatpush1.bf16.msra.mxu1 %v3210_v45  ;;  %v161_v44 = vld [vmem:[%s4415_s3 + $0x428] sm:$0xff] }
  0x33   :  { %1655 = vmatprep.subr.bf16.mxu0 %v3241_v46  ;;  %1696 = vmatprep.subr.bf16.mxu1 %v3243_v47  ;;  %v177_v45 = vld [vmem:[%s4415_s3 + $0x4a8] sm:$0xff]  ;;  %v3212_v46 = vcombine.low %v128_v34, %v144_v35  ;;  %v3214_v47 = vcombine.low %v129_v36, %v145_v37  ;;  %v3185_v34 = vcombine.high %v98_v28, %v114_v29  ;;  %v130_v36 = vld [vmem:[%s4415_s3 + $0x330] sm:$0xff] }
  0x34   :  { %v3247_v49 = vcombine.high %v161_v44, %v177_v45  ;;  %v146_v37 = vld [vmem:[%s4415_s3 + $0x3b0] sm:$0xff] }
  0x36   :  { %1656 = vmatpush1.bf16.msra.mxu0 %v3240_v52  ;;  %1697 = vmatpush1.bf16.msra.mxu1 %v3242_v53  ;;  %v193_v52 = vld [vmem:[%s4415_s3 + $0x528] sm:$0xff] }
  0x37   :  { %1657 = vmatprep.subr.bf16.mxu0 %v3273_v54  ;;  %1698 = vmatprep.subr.bf16.mxu1 %v3275_v55  ;;  %v209_v53 = vld [vmem:[%s4415_s3 + $0x5a8] sm:$0xff]  ;;  %v3244_v54 = vcombine.low %v160_v42, %v176_v43  ;;  %v3246_v55 = vcombine.low %v161_v44, %v177_v45  ;;  %v3217_v42 = vcombine.high %v130_v36, %v146_v37  ;;  %v162_v44 = vld [vmem:[%s4415_s3 + $0x430] sm:$0xff] }
  0x38   :  { %v3279_v57 = vcombine.high %v193_v52, %v209_v53  ;;  %v178_v45 = vld [vmem:[%s4415_s3 + $0x4b0] sm:$0xff] }
  0x3a   :  { %1658 = vmatpush1.bf16.msra.mxu0 %v3272_v60  ;;  %1699 = vmatpush1.bf16.msra.mxu1 %v3274_v61  ;;  %v225_v60 = vld [vmem:[%s4415_s3 + $0x628] sm:$0xff] }
  0x3b   :  { %1659 = vmatprep.subr.bf16.mxu0 %v3305_v62  ;;  %1700 = vmatprep.subr.bf16.mxu1 %v3307_v63  ;;  %v241_v61 = vld [vmem:[%s4415_s3 + $0x6a8] sm:$0xff]  ;;  %v3276_v62 = vcombine.low %v192_v50, %v208_v51  ;;  %v3278_v63 = vcombine.low %v193_v52, %v209_v53  ;;  %v3249_v50 = vcombine.high %v162_v44, %v178_v45  ;;  %v194_v52 = vld [vmem:[%s4415_s3 + $0x530] sm:$0xff] }
  0x3c   :  { %v3311_v1 = vcombine.high %v225_v60, %v241_v61  ;;  %v210_v53 = vld [vmem:[%s4415_s3 + $0x5b0] sm:$0xff] }
  0x3e   :  { %1660 = vmatpush1.bf16.msra.mxu0 %v3304_v5  ;;  %1701 = vmatpush1.bf16.msra.mxu1 %v3306_v6  ;;  %v257_v5 = vld [vmem:[%s4415_s3 + $0x728] sm:$0xff] }
  0x3f   :  { %1661 = vmatprep.subr.bf16.mxu0 %v3337_v7  ;;  %1702 = vmatprep.subr.bf16.mxu1 %v3339_v8  ;;  %v273_v6 = vld [vmem:[%s4415_s3 + $0x7a8] sm:$0xff]  ;;  %v3308_v7 = vcombine.low %v224_v58, %v240_v59  ;;  %v3310_v8 = vcombine.low %v225_v60, %v241_v61  ;;  %v3281_v58 = vcombine.high %v194_v52, %v210_v53  ;;  %v226_v60 = vld [vmem:[%s4415_s3 + $0x630] sm:$0xff] }
  0x40   :  { %v3343_v10 = vcombine.high %v257_v5, %v273_v6  ;;  %v242_v61 = vld [vmem:[%s4415_s3 + $0x6b0] sm:$0xff] }
  0x42   :  { %1662 = vmatpush1.bf16.msra.mxu0 %v3336_v13  ;;  %1703 = vmatpush1.bf16.msra.mxu1 %v3338_v14  ;;  %v35_v13 = vld [vmem:[%s4415_s3 + $0x38] sm:$0xff] }
  0x43   :  { %1729 = vmatprep.subr.bf16.mxu0 %v3117_v15  ;;  %1770 = vmatprep.subr.bf16.mxu1 %v3119_v16  ;;  %v51_v14 = vld [vmem:[%s4415_s3 + $0xb8] sm:$0xff]  ;;  %v3340_v15 = vcombine.low %v256_v2, %v272_v4  ;;  %v3342_v16 = vcombine.low %v257_v5, %v273_v6  ;;  %v3313_v2 = vcombine.high %v226_v60, %v242_v61  ;;  %v258_v5 = vld [vmem:[%s4415_s3 + $0x730] sm:$0xff] }
  0x44   :  { %v3123_v19 = vcombine.high %v35_v13, %v51_v14  ;;  %v274_v6 = vld [vmem:[%s4415_s3 + $0x7b0] sm:$0xff] }
  0x45   :  { %1680 = vmatmul.mubr.bf16.vlgmr.msra.gmra.mrb[4].mxu0 %v3544_v17  ;;  %1721 = vmatmul.mubr.bf16.vlgmr.msra.gmra.mrb[4].mxu1 %v3544_v17 }
  0x46   :  { %1730 = vmatpush1.bf16.msra.mxu0 %v3116_v22  ;;  %1771 = vmatpush1.bf16.msra.mxu1 %v3118_v23  ;;  %v67_v22 = vld [vmem:[%s4415_s3 + $0x138] sm:$0xff] }
  0x47   :  { %1731 = vmatprep.subr.bf16.mxu0 %v3149_v24  ;;  %1772 = vmatprep.subr.bf16.mxu1 %v3151_v25  ;;  %v83_v23 = vld [vmem:[%s4415_s3 + $0x1b8] sm:$0xff]  ;;  %v3120_v24 = vcombine.low %v34_v11, %v50_v12  ;;  %v3122_v25 = vcombine.low %v35_v13, %v51_v14  ;;  %v3345_v11 = vcombine.high %v258_v5, %v274_v6  ;;  %v36_v13 = vld [vmem:[%s4415_s3 + $0x40] sm:$0xff] }
  0x48   :  { %1761 = vmatprep.mubr.bf16.mxu0 %v3382_v3  ;;  %1802 = vmatprep.mubr.bf16.mxu1 %v3382_v3  ;;  %v3155_v27 = vcombine.high %v67_v22, %v83_v23  ;;  %v52_v14 = vld [vmem:[%s4415_s3 + $0xc0] sm:$0xff] }
  0x4a   :  { %1732 = vmatpush1.bf16.msra.mxu0 %v3148_v30  ;;  %1773 = vmatpush1.bf16.msra.mxu1 %v3150_v31  ;;  %v99_v30 = vld [vmem:[%s4415_s3 + $0x238] sm:$0xff] }
  0x4b   :  { %1733 = vmatprep.subr.bf16.mxu0 %v3181_v32  ;;  %1774 = vmatprep.subr.bf16.mxu1 %v3183_v33  ;;  %v115_v31 = vld [vmem:[%s4415_s3 + $0x2b8] sm:$0xff]  ;;  %v3152_v32 = vcombine.low %v66_v20, %v82_v21  ;;  %v3154_v33 = vcombine.low %v67_v22, %v83_v23  ;;  %v3125_v20 = vcombine.high %v36_v13, %v52_v14  ;;  %v68_v22 = vld [vmem:[%s4415_s3 + $0x140] sm:$0xff] }
  0x4c   :  { %v3187_v35 = vcombine.high %v99_v30, %v115_v31  ;;  %v84_v23 = vld [vmem:[%s4415_s3 + $0x1c0] sm:$0xff] }
  0x4e   :  { %1734 = vmatpush1.bf16.msra.mxu0 %v3180_v38  ;;  %1775 = vmatpush1.bf16.msra.mxu1 %v3182_v39  ;;  %v131_v38 = vld [vmem:[%s4415_s3 + $0x338] sm:$0xff] }
  0x4f   :  { %1735 = vmatprep.subr.bf16.mxu0 %v3213_v40  ;;  %1776 = vmatprep.subr.bf16.mxu1 %v3215_v41  ;;  %v147_v39 = vld [vmem:[%s4415_s3 + $0x3b8] sm:$0xff]  ;;  %v3184_v40 = vcombine.low %v98_v28, %v114_v29  ;;  %v3186_v41 = vcombine.low %v99_v30, %v115_v31  ;;  %v3157_v28 = vcombine.high %v68_v22, %v84_v23  ;;  %v100_v30 = vld [vmem:[%s4415_s3 + $0x240] sm:$0xff] }
  0x50   :  { %v3219_v43 = vcombine.high %v131_v38, %v147_v39  ;;  %v116_v31 = vld [vmem:[%s4415_s3 + $0x2c0] sm:$0xff] }
  0x52   :  { %1736 = vmatpush1.bf16.msra.mxu0 %v3212_v46  ;;  %1777 = vmatpush1.bf16.msra.mxu1 %v3214_v47  ;;  %v163_v46 = vld [vmem:[%s4415_s3 + $0x438] sm:$0xff] }
  0x53   :  { %1737 = vmatprep.subr.bf16.mxu0 %v3245_v48  ;;  %1778 = vmatprep.subr.bf16.mxu1 %v3247_v49  ;;  %v179_v47 = vld [vmem:[%s4415_s3 + $0x4b8] sm:$0xff]  ;;  %v3216_v48 = vcombine.low %v130_v36, %v146_v37  ;;  %v3218_v49 = vcombine.low %v131_v38, %v147_v39  ;;  %v3189_v36 = vcombine.high %v100_v30, %v116_v31  ;;  %v132_v38 = vld [vmem:[%s4415_s3 + $0x340] sm:$0xff] }
  0x54   :  { %v3251_v51 = vcombine.high %v163_v46, %v179_v47  ;;  %v148_v39 = vld [vmem:[%s4415_s3 + $0x3c0] sm:$0xff] }
  0x56   :  { %1738 = vmatpush1.bf16.msra.mxu0 %v3244_v54  ;;  %1779 = vmatpush1.bf16.msra.mxu1 %v3246_v55  ;;  %v195_v54 = vld [vmem:[%s4415_s3 + $0x538] sm:$0xff] }
  0x57   :  { %1739 = vmatprep.subr.bf16.mxu0 %v3277_v56  ;;  %1780 = vmatprep.subr.bf16.mxu1 %v3279_v57  ;;  %v211_v55 = vld [vmem:[%s4415_s3 + $0x5b8] sm:$0xff]  ;;  %v3248_v56 = vcombine.low %v162_v44, %v178_v45  ;;  %v3250_v57 = vcombine.low %v163_v46, %v179_v47  ;;  %v3221_v44 = vcombine.high %v132_v38, %v148_v39  ;;  %v164_v46 = vld [vmem:[%s4415_s3 + $0x440] sm:$0xff] }
  0x58   :  { %v3283_v59 = vcombine.high %v195_v54, %v211_v55  ;;  %v180_v47 = vld [vmem:[%s4415_s3 + $0x4c0] sm:$0xff] }
  0x5a   :  { %1740 = vmatpush1.bf16.msra.mxu0 %v3276_v62  ;;  %1781 = vmatpush1.bf16.msra.mxu1 %v3278_v63  ;;  %v227_v62 = vld [vmem:[%s4415_s3 + $0x638] sm:$0xff] }
  0x5b   :  { %1741 = vmatprep.subr.bf16.mxu0 %v3309_v0  ;;  %1782 = vmatprep.subr.bf16.mxu1 %v3311_v1  ;;  %v243_v63 = vld [vmem:[%s4415_s3 + $0x6b8] sm:$0xff]  ;;  %v3280_v0 = vcombine.low %v194_v52, %v210_v53  ;;  %v3282_v1 = vcombine.low %v195_v54, %v211_v55  ;;  %v3253_v52 = vcombine.high %v164_v46, %v180_v47  ;;  %v196_v54 = vld [vmem:[%s4415_s3 + $0x540] sm:$0xff] }
  0x5c   :  { %v3315_v4 = vcombine.high %v227_v62, %v243_v63  ;;  %v212_v55 = vld [vmem:[%s4415_s3 + $0x5c0] sm:$0xff] }
  0x5e   :  { %1742 = vmatpush1.bf16.msra.mxu0 %v3308_v7  ;;  %1783 = vmatpush1.bf16.msra.mxu1 %v3310_v8  ;;  %v259_v7 = vld [vmem:[%s4415_s3 + $0x738] sm:$0xff] }
  0x5f   :  { %1743 = vmatprep.subr.bf16.mxu0 %v3341_v9  ;;  %1784 = vmatprep.subr.bf16.mxu1 %v3343_v10  ;;  %v275_v8 = vld [vmem:[%s4415_s3 + $0x7b8] sm:$0xff]  ;;  %v3312_v9 = vcombine.low %v226_v60, %v242_v61  ;;  %v3314_v10 = vcombine.low %v227_v62, %v243_v63  ;;  %v3285_v60 = vcombine.high %v196_v54, %v212_v55  ;;  %v228_v62 = vld [vmem:[%s4415_s3 + $0x640] sm:$0xff] }
  0x60   :  { %v3347_v12 = vcombine.high %v259_v7, %v275_v8  ;;  %v244_v63 = vld [vmem:[%s4415_s3 + $0x6c0] sm:$0xff] }
  0x62   :  { %1744 = vmatpush1.bf16.msra.mxu0 %v3340_v15  ;;  %1785 = vmatpush1.bf16.msra.mxu1 %v3342_v16  ;;  %v37_v15 = vld [vmem:[%s4415_s3 + $0x48] sm:$0xff] }
  0x63   :  { %1811 = vmatprep.subr.bf16.mxu0 %v3121_v18  ;;  %1852 = vmatprep.subr.bf16.mxu1 %v3123_v19  ;;  %v53_v16 = vld [vmem:[%s4415_s3 + $0xc8] sm:$0xff]  ;;  %v3344_v18 = vcombine.low %v258_v5, %v274_v6  ;;  %v3346_v19 = vcombine.low %v259_v7, %v275_v8  ;;  %v3317_v5 = vcombine.high %v228_v62, %v244_v63  ;;  %v260_v7 = vld [vmem:[%s4415_s3 + $0x740] sm:$0xff] }
  0x64   :  { %v3127_v21 = vcombine.high %v37_v15, %v53_v16  ;;  %v276_v8 = vld [vmem:[%s4415_s3 + $0x7c0] sm:$0xff] }
  0x65   :  { %1762 = vmatmul.mubr.bf16.vlgmr.msra.gmra.mrb[8].mxu0 %v3544_v17  ;;  %1803 = vmatmul.mubr.bf16.vlgmr.msra.gmra.mrb[8].mxu1 %v3544_v17 }
  0x66   :  { %1812 = vmatpush1.bf16.msra.mxu0 %v3120_v24  ;;  %1853 = vmatpush1.bf16.msra.mxu1 %v3122_v25  ;;  %v69_v24 = vld [vmem:[%s4415_s3 + $0x148] sm:$0xff] }
  0x67   :  { %1813 = vmatprep.subr.bf16.mxu0 %v3153_v26  ;;  %1854 = vmatprep.subr.bf16.mxu1 %v3155_v27  ;;  %v85_v25 = vld [vmem:[%s4415_s3 + $0x1c8] sm:$0xff]  ;;  %v3124_v26 = vcombine.low %v36_v13, %v52_v14  ;;  %v3126_v27 = vcombine.low %v37_v15, %v53_v16  ;;  %v3349_v13 = vcombine.high %v260_v7, %v276_v8  ;;  %v38_v15 = vld [vmem:[%s4415_s3 + $0x50] sm:$0xff] }
  0x68   :  { %1843 = vmatprep.mubr.bf16.mxu0 %v3382_v3  ;;  %1884 = vmatprep.mubr.bf16.mxu1 %v3382_v3  ;;  %v3159_v29 = vcombine.high %v69_v24, %v85_v25  ;;  %v54_v16 = vld [vmem:[%s4415_s3 + $0xd0] sm:$0xff] }
  0x6a   :  { %1814 = vmatpush1.bf16.msra.mxu0 %v3152_v32  ;;  %1855 = vmatpush1.bf16.msra.mxu1 %v3154_v33  ;;  %v101_v32 = vld [vmem:[%s4415_s3 + $0x248] sm:$0xff] }
  0x6b   :  { %1815 = vmatprep.subr.bf16.mxu0 %v3185_v34  ;;  %1856 = vmatprep.subr.bf16.mxu1 %v3187_v35  ;;  %v117_v33 = vld [vmem:[%s4415_s3 + $0x2c8] sm:$0xff]  ;;  %v3156_v34 = vcombine.low %v68_v22, %v84_v23  ;;  %v3158_v35 = vcombine.low %v69_v24, %v85_v25  ;;  %v3129_v22 = vcombine.high %v38_v15, %v54_v16  ;;  %v70_v24 = vld [vmem:[%s4415_s3 + $0x150] sm:$0xff] }
  0x6c   :  { %v3191_v37 = vcombine.high %v101_v32, %v117_v33  ;;  %v86_v25 = vld [vmem:[%s4415_s3 + $0x1d0] sm:$0xff] }
  0x6e   :  { %1816 = vmatpush1.bf16.msra.mxu0 %v3184_v40  ;;  %1857 = vmatpush1.bf16.msra.mxu1 %v3186_v41  ;;  %v133_v40 = vld [vmem:[%s4415_s3 + $0x348] sm:$0xff] }
  0x6f   :  { %1817 = vmatprep.subr.bf16.mxu0 %v3217_v42  ;;  %1858 = vmatprep.subr.bf16.mxu1 %v3219_v43  ;;  %v149_v41 = vld [vmem:[%s4415_s3 + $0x3c8] sm:$0xff]  ;;  %v3188_v42 = vcombine.low %v100_v30, %v116_v31  ;;  %v3190_v43 = vcombine.low %v101_v32, %v117_v33  ;;  %v3161_v30 = vcombine.high %v70_v24, %v86_v25  ;;  %v102_v32 = vld [vmem:[%s4415_s3 + $0x250] sm:$0xff] }
  0x70   :  { %v3223_v45 = vcombine.high %v133_v40, %v149_v41  ;;  %v118_v33 = vld [vmem:[%s4415_s3 + $0x2d0] sm:$0xff] }
  0x72   :  { %1818 = vmatpush1.bf16.msra.mxu0 %v3216_v48  ;;  %1859 = vmatpush1.bf16.msra.mxu1 %v3218_v49  ;;  %v165_v48 = vld [vmem:[%s4415_s3 + $0x448] sm:$0xff] }
  0x73   :  { %1819 = vmatprep.subr.bf16.mxu0 %v3249_v50  ;;  %1860 = vmatprep.subr.bf16.mxu1 %v3251_v51  ;;  %v181_v49 = vld [vmem:[%s4415_s3 + $0x4c8] sm:$0xff]  ;;  %v3220_v50 = vcombine.low %v132_v38, %v148_v39  ;;  %v3222_v51 = vcombine.low %v133_v40, %v149_v41  ;;  %v3193_v38 = vcombine.high %v102_v32, %v118_v33  ;;  %v134_v40 = vld [vmem:[%s4415_s3 + $0x350] sm:$0xff] }
  0x74   :  { %v3255_v53 = vcombine.high %v165_v48, %v181_v49  ;;  %v150_v41 = vld [vmem:[%s4415_s3 + $0x3d0] sm:$0xff] }
  0x76   :  { %1820 = vmatpush1.bf16.msra.mxu0 %v3248_v56  ;;  %1861 = vmatpush1.bf16.msra.mxu1 %v3250_v57  ;;  %v197_v56 = vld [vmem:[%s4415_s3 + $0x548] sm:$0xff] }
  0x77   :  { %1821 = vmatprep.subr.bf16.mxu0 %v3281_v58  ;;  %1862 = vmatprep.subr.bf16.mxu1 %v3283_v59  ;;  %v213_v57 = vld [vmem:[%s4415_s3 + $0x5c8] sm:$0xff]  ;;  %v3252_v58 = vcombine.low %v164_v46, %v180_v47  ;;  %v3254_v59 = vcombine.low %v165_v48, %v181_v49  ;;  %v3225_v46 = vcombine.high %v134_v40, %v150_v41  ;;  %v166_v48 = vld [vmem:[%s4415_s3 + $0x450] sm:$0xff] }
  0x78   :  { %v3287_v61 = vcombine.high %v197_v56, %v213_v57  ;;  %v182_v49 = vld [vmem:[%s4415_s3 + $0x4d0] sm:$0xff] }
  0x7a   :  { %1822 = vmatpush1.bf16.msra.mxu0 %v3280_v0  ;;  %1863 = vmatpush1.bf16.msra.mxu1 %v3282_v1  ;;  %v229_v0 = vld [vmem:[%s4415_s3 + $0x648] sm:$0xff] }
  0x7b   :  { %1823 = vmatprep.subr.bf16.mxu0 %v3313_v2  ;;  %1864 = vmatprep.subr.bf16.mxu1 %v3315_v4  ;;  %v245_v1 = vld [vmem:[%s4415_s3 + $0x6c8] sm:$0xff]  ;;  %v3284_v2 = vcombine.low %v196_v54, %v212_v55  ;;  %v3286_v4 = vcombine.low %v197_v56, %v213_v57  ;;  %v3257_v54 = vcombine.high %v166_v48, %v182_v49  ;;  %v198_v56 = vld [vmem:[%s4415_s3 + $0x550] sm:$0xff] }
  0x7c   :  { %v3319_v6 = vcombine.high %v229_v0, %v245_v1  ;;  %v214_v57 = vld [vmem:[%s4415_s3 + $0x5d0] sm:$0xff] }
  0x7e   :  { %1824 = vmatpush1.bf16.msra.mxu0 %v3312_v9  ;;  %1865 = vmatpush1.bf16.msra.mxu1 %v3314_v10  ;;  %v261_v9 = vld [vmem:[%s4415_s3 + $0x748] sm:$0xff] }
  0x7f   :  { %1825 = vmatprep.subr.bf16.mxu0 %v3345_v11  ;;  %1866 = vmatprep.subr.bf16.mxu1 %v3347_v12  ;;  %v277_v10 = vld [vmem:[%s4415_s3 + $0x7c8] sm:$0xff]  ;;  %v3316_v11 = vcombine.low %v228_v62, %v244_v63  ;;  %v3318_v12 = vcombine.low %v229_v0, %v245_v1  ;;  %v3289_v62 = vcombine.high %v198_v56, %v214_v57  ;;  %v230_v0 = vld [vmem:[%s4415_s3 + $0x650] sm:$0xff] }
  0x80   :  { %v3351_v14 = vcombine.high %v261_v9, %v277_v10  ;;  %v246_v1 = vld [vmem:[%s4415_s3 + $0x6d0] sm:$0xff] }
  0x82   :  { %1826 = vmatpush1.bf16.msra.mxu0 %v3344_v18  ;;  %1867 = vmatpush1.bf16.msra.mxu1 %v3346_v19  ;;  %v39_v18 = vld [vmem:[%s4415_s3 + $0x58] sm:$0xff] }
  0x83   :  { %1893 = vmatprep.subr.bf16.mxu0 %v3125_v20  ;;  %1934 = vmatprep.subr.bf16.mxu1 %v3127_v21  ;;  %v55_v19 = vld [vmem:[%s4415_s3 + $0xd8] sm:$0xff]  ;;  %v3348_v20 = vcombine.low %v260_v7, %v276_v8  ;;  %v3350_v21 = vcombine.low %v261_v9, %v277_v10  ;;  %v3321_v7 = vcombine.high %v230_v0, %v246_v1  ;;  %v262_v9 = vld [vmem:[%s4415_s3 + $0x750] sm:$0xff] }
  0x84   :  { %v3131_v23 = vcombine.high %v39_v18, %v55_v19  ;;  %v278_v10 = vld [vmem:[%s4415_s3 + $0x7d0] sm:$0xff] }
  0x85   :  { %1844 = vmatmul.mubr.bf16.vlgmr.msra.gmra.mrb[12].mxu0 %v3544_v17  ;;  %1885 = vmatmul.mubr.bf16.vlgmr.msra.gmra.mrb[12].mxu1 %v3544_v17 }
  0x86   :  { %1894 = vmatpush1.bf16.msra.mxu0 %v3124_v26  ;;  %1935 = vmatpush1.bf16.msra.mxu1 %v3126_v27  ;;  %v71_v26 = vld [vmem:[%s4415_s3 + $0x158] sm:$0xff] }
  0x87   :  { %1895 = vmatprep.subr.bf16.mxu0 %v3157_v28  ;;  %1936 = vmatprep.subr.bf16.mxu1 %v3159_v29  ;;  %v87_v27 = vld [vmem:[%s4415_s3 + $0x1d8] sm:$0xff]  ;;  %v3128_v28 = vcombine.low %v38_v15, %v54_v16  ;;  %v3130_v29 = vcombine.low %v39_v18, %v55_v19  ;;  %v3353_v15 = vcombine.high %v262_v9, %v278_v10  ;;  %v40_v18 = vld [vmem:[%s4415_s3 + $0x60] sm:$0xff] }
  0x88   :  { %1925 = vmatprep.mubr.bf16.mxu0 %v3382_v3  ;;  %1966 = vmatprep.mubr.bf16.mxu1 %v3382_v3  ;;  %v3163_v31 = vcombine.high %v71_v26, %v87_v27  ;;  %v56_v19 = vld [vmem:[%s4415_s3 + $0xe0] sm:$0xff] }
  0x8a   :  { %1896 = vmatpush1.bf16.msra.mxu0 %v3156_v34  ;;  %1937 = vmatpush1.bf16.msra.mxu1 %v3158_v35  ;;  %v103_v34 = vld [vmem:[%s4415_s3 + $0x258] sm:$0xff] }
  0x8b   :  { %1897 = vmatprep.subr.bf16.mxu0 %v3189_v36  ;;  %1938 = vmatprep.subr.bf16.mxu1 %v3191_v37  ;;  %v119_v35 = vld [vmem:[%s4415_s3 + $0x2d8] sm:$0xff]  ;;  %v3160_v36 = vcombine.low %v70_v24, %v86_v25  ;;  %v3162_v37 = vcombine.low %v71_v26, %v87_v27  ;;  %v3133_v24 = vcombine.high %v40_v18, %v56_v19  ;;  %v72_v26 = vld [vmem:[%s4415_s3 + $0x160] sm:$0xff] }
  0x8c   :  { %v3195_v39 = vcombine.high %v103_v34, %v119_v35  ;;  %v88_v27 = vld [vmem:[%s4415_s3 + $0x1e0] sm:$0xff] }
  0x8e   :  { %1898 = vmatpush1.bf16.msra.mxu0 %v3188_v42  ;;  %1939 = vmatpush1.bf16.msra.mxu1 %v3190_v43  ;;  %v135_v42 = vld [vmem:[%s4415_s3 + $0x358] sm:$0xff] }
  0x8f   :  { %1899 = vmatprep.subr.bf16.mxu0 %v3221_v44  ;;  %1940 = vmatprep.subr.bf16.mxu1 %v3223_v45  ;;  %v151_v43 = vld [vmem:[%s4415_s3 + $0x3d8] sm:$0xff]  ;;  %v3192_v44 = vcombine.low %v102_v32, %v118_v33  ;;  %v3194_v45 = vcombine.low %v103_v34, %v119_v35  ;;  %v3165_v32 = vcombine.high %v72_v26, %v88_v27  ;;  %v104_v34 = vld [vmem:[%s4415_s3 + $0x260] sm:$0xff] }
  0x90   :  { %v3227_v47 = vcombine.high %v135_v42, %v151_v43  ;;  %v120_v35 = vld [vmem:[%s4415_s3 + $0x2e0] sm:$0xff] }
  0x92   :  { %1900 = vmatpush1.bf16.msra.mxu0 %v3220_v50  ;;  %1941 = vmatpush1.bf16.msra.mxu1 %v3222_v51  ;;  %v167_v50 = vld [vmem:[%s4415_s3 + $0x458] sm:$0xff] }
  0x93   :  { %1901 = vmatprep.subr.bf16.mxu0 %v3253_v52  ;;  %1942 = vmatprep.subr.bf16.mxu1 %v3255_v53  ;;  %v183_v51 = vld [vmem:[%s4415_s3 + $0x4d8] sm:$0xff]  ;;  %v3224_v52 = vcombine.low %v134_v40, %v150_v41  ;;  %v3226_v53 = vcombine.low %v135_v42, %v151_v43  ;;  %v3197_v40 = vcombine.high %v104_v34, %v120_v35  ;;  %v136_v42 = vld [vmem:[%s4415_s3 + $0x360] sm:$0xff] }
  0x94   :  { %v3259_v55 = vcombine.high %v167_v50, %v183_v51  ;;  %v152_v43 = vld [vmem:[%s4415_s3 + $0x3e0] sm:$0xff] }
  0x96   :  { %1902 = vmatpush1.bf16.msra.mxu0 %v3252_v58  ;;  %1943 = vmatpush1.bf16.msra.mxu1 %v3254_v59  ;;  %v199_v58 = vld [vmem:[%s4415_s3 + $0x558] sm:$0xff] }
  0x97   :  { %1903 = vmatprep.subr.bf16.mxu0 %v3285_v60  ;;  %1944 = vmatprep.subr.bf16.mxu1 %v3287_v61  ;;  %v215_v59 = vld [vmem:[%s4415_s3 + $0x5d8] sm:$0xff]  ;;  %v3256_v60 = vcombine.low %v166_v48, %v182_v49  ;;  %v3258_v61 = vcombine.low %v167_v50, %v183_v51  ;;  %v3229_v48 = vcombine.high %v136_v42, %v152_v43  ;;  %v168_v50 = vld [vmem:[%s4415_s3 + $0x460] sm:$0xff] }
  0x98   :  { %v3291_v63 = vcombine.high %v199_v58, %v215_v59  ;;  %v184_v51 = vld [vmem:[%s4415_s3 + $0x4e0] sm:$0xff] }
  0x9a   :  { %1904 = vmatpush1.bf16.msra.mxu0 %v3284_v2  ;;  %1945 = vmatpush1.bf16.msra.mxu1 %v3286_v4  ;;  %v231_v2 = vld [vmem:[%s4415_s3 + $0x658] sm:$0xff] }
  0x9b   :  { %1905 = vmatprep.subr.bf16.mxu0 %v3317_v5  ;;  %1946 = vmatprep.subr.bf16.mxu1 %v3319_v6  ;;  %v247_v4 = vld [vmem:[%s4415_s3 + $0x6d8] sm:$0xff]  ;;  %v3288_v5 = vcombine.low %v198_v56, %v214_v57  ;;  %v3290_v6 = vcombine.low %v199_v58, %v215_v59  ;;  %v3261_v56 = vcombine.high %v168_v50, %v184_v51  ;;  %v200_v58 = vld [vmem:[%s4415_s3 + $0x560] sm:$0xff] }
  0x9c   :  { %v3323_v8 = vcombine.high %v231_v2, %v247_v4  ;;  %v216_v59 = vld [vmem:[%s4415_s3 + $0x5e0] sm:$0xff] }
  0x9e   :  { %1906 = vmatpush1.bf16.msra.mxu0 %v3316_v11  ;;  %1947 = vmatpush1.bf16.msra.mxu1 %v3318_v12  ;;  %v263_v11 = vld [vmem:[%s4415_s3 + $0x758] sm:$0xff] }
  0x9f   :  { %1907 = vmatprep.subr.bf16.mxu0 %v3349_v13  ;;  %1948 = vmatprep.subr.bf16.mxu1 %v3351_v14  ;;  %v279_v12 = vld [vmem:[%s4415_s3 + $0x7d8] sm:$0xff]  ;;  %v3320_v13 = vcombine.low %v230_v0, %v246_v1  ;;  %v3322_v14 = vcombine.low %v231_v2, %v247_v4  ;;  %v3293_v0 = vcombine.high %v200_v58, %v216_v59  ;;  %v232_v2 = vld [vmem:[%s4415_s3 + $0x660] sm:$0xff] }
  0xa0   :  { %v3355_v16 = vcombine.high %v263_v11, %v279_v12  ;;  %v248_v4 = vld [vmem:[%s4415_s3 + $0x6e0] sm:$0xff] }
  0xa2   :  { %1908 = vmatpush1.bf16.msra.mxu0 %v3348_v20  ;;  %1949 = vmatpush1.bf16.msra.mxu1 %v3350_v21  ;;  %v41_v20 = vld [vmem:[%s4415_s3 + $0x68] sm:$0xff] }
  0xa3   :  { %1975 = vmatprep.subr.bf16.mxu0 %v3129_v22  ;;  %2016 = vmatprep.subr.bf16.mxu1 %v3131_v23  ;;  %v57_v21 = vld [vmem:[%s4415_s3 + $0xe8] sm:$0xff]  ;;  %v3352_v22 = vcombine.low %v262_v9, %v278_v10  ;;  %v3354_v23 = vcombine.low %v263_v11, %v279_v12  ;;  %v3325_v9 = vcombine.high %v232_v2, %v248_v4  ;;  %v264_v11 = vld [vmem:[%s4415_s3 + $0x760] sm:$0xff] }
  0xa4   :  { %v3135_v25 = vcombine.high %v41_v20, %v57_v21  ;;  %v280_v12 = vld [vmem:[%s4415_s3 + $0x7e0] sm:$0xff] }
  0xa5   :  { %1926 = vmatmul.mubr.bf16.vlgmr.msra.gmra.mrb[16].mxu0 %v3544_v17  ;;  %1967 = vmatmul.mubr.bf16.vlgmr.msra.gmra.mrb[16].mxu1 %v3544_v17 }
  0xa6   :  { %1976 = vmatpush1.bf16.msra.mxu0 %v3128_v28  ;;  %2017 = vmatpush1.bf16.msra.mxu1 %v3130_v29  ;;  %v73_v28 = vld [vmem:[%s4415_s3 + $0x168] sm:$0xff] }
  0xa7   :  { %1977 = vmatprep.subr.bf16.mxu0 %v3161_v30  ;;  %2018 = vmatprep.subr.bf16.mxu1 %v3163_v31  ;;  %v89_v29 = vld [vmem:[%s4415_s3 + $0x1e8] sm:$0xff]  ;;  %v3132_v30 = vcombine.low %v40_v18, %v56_v19  ;;  %v3134_v31 = vcombine.low %v41_v20, %v57_v21  ;;  %v3357_v18 = vcombine.high %v264_v11, %v280_v12  ;;  %v42_v20 = vld [vmem:[%s4415_s3 + $0x70] sm:$0xff] }
  0xa8   :  { %2007 = vmatprep.mubr.bf16.mxu0 %v3382_v3  ;;  %2048 = vmatprep.mubr.bf16.mxu1 %v3382_v3  ;;  %v3167_v33 = vcombine.high %v73_v28, %v89_v29  ;;  %v58_v21 = vld [vmem:[%s4415_s3 + $0xf0] sm:$0xff] }
  0xaa   :  { %1978 = vmatpush1.bf16.msra.mxu0 %v3160_v36  ;;  %2019 = vmatpush1.bf16.msra.mxu1 %v3162_v37  ;;  %v105_v36 = vld [vmem:[%s4415_s3 + $0x268] sm:$0xff] }
  0xab   :  { %1979 = vmatprep.subr.bf16.mxu0 %v3193_v38  ;;  %2020 = vmatprep.subr.bf16.mxu1 %v3195_v39  ;;  %v121_v37 = vld [vmem:[%s4415_s3 + $0x2e8] sm:$0xff]  ;;  %v3164_v38 = vcombine.low %v72_v26, %v88_v27  ;;  %v3166_v39 = vcombine.low %v73_v28, %v89_v29  ;;  %v3137_v26 = vcombine.high %v42_v20, %v58_v21  ;;  %v74_v28 = vld [vmem:[%s4415_s3 + $0x170] sm:$0xff] }
  0xac   :  { %v3199_v41 = vcombine.high %v105_v36, %v121_v37  ;;  %v90_v29 = vld [vmem:[%s4415_s3 + $0x1f0] sm:$0xff] }
  0xae   :  { %1980 = vmatpush1.bf16.msra.mxu0 %v3192_v44  ;;  %2021 = vmatpush1.bf16.msra.mxu1 %v3194_v45  ;;  %v137_v44 = vld [vmem:[%s4415_s3 + $0x368] sm:$0xff] }
  0xaf   :  { %1981 = vmatprep.subr.bf16.mxu0 %v3225_v46  ;;  %2022 = vmatprep.subr.bf16.mxu1 %v3227_v47  ;;  %v153_v45 = vld [vmem:[%s4415_s3 + $0x3e8] sm:$0xff]  ;;  %v3196_v46 = vcombine.low %v104_v34, %v120_v35  ;;  %v3198_v47 = vcombine.low %v105_v36, %v121_v37  ;;  %v3169_v34 = vcombine.high %v74_v28, %v90_v29  ;;  %v106_v36 = vld [vmem:[%s4415_s3 + $0x270] sm:$0xff] }
  0xb0   :  { %v3231_v49 = vcombine.high %v137_v44, %v153_v45  ;;  %v122_v37 = vld [vmem:[%s4415_s3 + $0x2f0] sm:$0xff] }
  0xb2   :  { %1982 = vmatpush1.bf16.msra.mxu0 %v3224_v52  ;;  %2023 = vmatpush1.bf16.msra.mxu1 %v3226_v53  ;;  %v169_v52 = vld [vmem:[%s4415_s3 + $0x468] sm:$0xff] }
  0xb3   :  { %1983 = vmatprep.subr.bf16.mxu0 %v3257_v54  ;;  %2024 = vmatprep.subr.bf16.mxu1 %v3259_v55  ;;  %v185_v53 = vld [vmem:[%s4415_s3 + $0x4e8] sm:$0xff]  ;;  %v3228_v54 = vcombine.low %v136_v42, %v152_v43  ;;  %v3230_v55 = vcombine.low %v137_v44, %v153_v45  ;;  %v3201_v42 = vcombine.high %v106_v36, %v122_v37  ;;  %v138_v44 = vld [vmem:[%s4415_s3 + $0x370] sm:$0xff] }
  0xb4   :  { %v3263_v57 = vcombine.high %v169_v52, %v185_v53  ;;  %v154_v45 = vld [vmem:[%s4415_s3 + $0x3f0] sm:$0xff] }
  0xb6   :  { %1984 = vmatpush1.bf16.msra.mxu0 %v3256_v60  ;;  %2025 = vmatpush1.bf16.msra.mxu1 %v3258_v61  ;;  %v201_v60 = vld [vmem:[%s4415_s3 + $0x568] sm:$0xff] }
  0xb7   :  { %1985 = vmatprep.subr.bf16.mxu0 %v3289_v62  ;;  %2026 = vmatprep.subr.bf16.mxu1 %v3291_v63  ;;  %v217_v61 = vld [vmem:[%s4415_s3 + $0x5e8] sm:$0xff]  ;;  %v3260_v62 = vcombine.low %v168_v50, %v184_v51  ;;  %v3262_v63 = vcombine.low %v169_v52, %v185_v53  ;;  %v3233_v50 = vcombine.high %v138_v44, %v154_v45  ;;  %v170_v52 = vld [vmem:[%s4415_s3 + $0x470] sm:$0xff] }
  0xb8   :  { %v3295_v1 = vcombine.high %v201_v60, %v217_v61  ;;  %v186_v53 = vld [vmem:[%s4415_s3 + $0x4f0] sm:$0xff] }
  0xba   :  { %1986 = vmatpush1.bf16.msra.mxu0 %v3288_v5  ;;  %2027 = vmatpush1.bf16.msra.mxu1 %v3290_v6  ;;  %v233_v5 = vld [vmem:[%s4415_s3 + $0x668] sm:$0xff] }
  0xbb   :  { %1987 = vmatprep.subr.bf16.mxu0 %v3321_v7  ;;  %2028 = vmatprep.subr.bf16.mxu1 %v3323_v8  ;;  %v249_v6 = vld [vmem:[%s4415_s3 + $0x6e8] sm:$0xff]  ;;  %v3292_v7 = vcombine.low %v200_v58, %v216_v59  ;;  %v3294_v8 = vcombine.low %v201_v60, %v217_v61  ;;  %v3383_v59 = vmov 1966171168   ;;  %v2292_v61 = vlaneseq }
  0xbc   :  { %v3327_v10 = vcombine.high %v233_v5, %v249_v6  ;;  %v2290_v60 = vunpack.c.l.s4 %v3383_v59 }
  0xbe   :  { %1988 = vmatpush1.bf16.msra.mxu0 %v3320_v13  ;;  %2029 = vmatpush1.bf16.msra.mxu1 %v3322_v14  ;;  %v265_v13 = vld [vmem:[%s4415_s3 + $0x768] sm:$0xff] }
  0xbf   :  { %1989 = vmatprep.subr.bf16.mxu0 %v3353_v15  ;;  %2030 = vmatprep.subr.bf16.mxu1 %v3355_v16  ;;  %v281_v14 = vld [vmem:[%s4415_s3 + $0x7e8] sm:$0xff]  ;;  %v3324_v15 = vcombine.low %v232_v2, %v248_v4  ;;  %v3326_v16 = vcombine.low %v233_v5, %v249_v6  ;;  %v3264_v2 = vcombine.low %v170_v52, %v186_v53  ;;  %v2291_v6 = vunpack.c.0.s8 %v2290_v60 }
  0xc0   :  { %v3359_v19 = vcombine.high %v265_v13, %v281_v14 }
  0xc2   :  { %1990 = vmatpush1.bf16.msra.mxu0 %v3352_v22  ;;  %2031 = vmatpush1.bf16.msra.mxu1 %v3354_v23  ;;  %v43_v22 = vld [vmem:[%s4415_s3 + $0x78] sm:$0xff] }
  0xc3   :  { %2057 = vmatprep.subr.bf16.mxu0 %v3133_v24  ;;  %2098 = vmatprep.subr.bf16.mxu1 %v3135_v25  ;;  %v59_v23 = vld [vmem:[%s4415_s3 + $0xf8] sm:$0xff]  ;;  %v3356_v24 = vcombine.low %v264_v11, %v280_v12  ;;  %v3358_v25 = vcombine.low %v265_v13, %v281_v14  ;;  %v266_v14 = vld [vmem:[%s4415_s3 + $0x770] sm:$0xff] }
  0xc4   :  { %v3139_v27 = vcombine.high %v43_v22, %v59_v23  ;;  %v235_v11 = vld [vmem:[%s4415_s3 + $0x678] sm:$0xff] }
  0xc5   :  { %2008 = vmatmul.mubr.bf16.vlgmr.msra.gmra.mrb[20].mxu0 %v3544_v17  ;;  %2049 = vmatmul.mubr.bf16.vlgmr.msra.gmra.mrb[20].mxu1 %v3544_v17  ;;  %v251_v12 = vld [vmem:[%s4415_s3 + $0x6f8] sm:$0xff] }
  0xc6   :  { %2058 = vmatpush1.bf16.msra.mxu0 %v3132_v30  ;;  %2099 = vmatpush1.bf16.msra.mxu1 %v3134_v31  ;;  %v75_v30 = vld [vmem:[%s4415_s3 + $0x178] sm:$0xff] }
  0xc7   :  { %2059 = vmatprep.subr.bf16.mxu0 %v3165_v32  ;;  %2100 = vmatprep.subr.bf16.mxu1 %v3167_v33  ;;  %v91_v31 = vld [vmem:[%s4415_s3 + $0x1f8] sm:$0xff]  ;;  %v3136_v32 = vcombine.low %v42_v20, %v58_v21  ;;  %v3138_v33 = vcombine.low %v43_v22, %v59_v23  ;;  %v3331_v21 = vcombine.high %v235_v11, %v251_v12 }
  0xc8   :  { %2089 = vmatprep.mubr.bf16.mxu0 %v3382_v3  ;;  %2130 = vmatprep.mubr.bf16.mxu1 %v3382_v3  ;;  %v3171_v35 = vcombine.high %v75_v30, %v91_v31 }
  0xca   :  { %2060 = vmatpush1.bf16.msra.mxu0 %v3164_v38  ;;  %2101 = vmatpush1.bf16.msra.mxu1 %v3166_v39  ;;  %v107_v38 = vld [vmem:[%s4415_s3 + $0x278] sm:$0xff] }
  0xcb   :  { %2061 = vmatprep.subr.bf16.mxu0 %v3197_v40  ;;  %2102 = vmatprep.subr.bf16.mxu1 %v3199_v41  ;;  %v123_v39 = vld [vmem:[%s4415_s3 + $0x2f8] sm:$0xff]  ;;  %v3168_v40 = vcombine.low %v74_v28, %v90_v29  ;;  %v3170_v41 = vcombine.low %v75_v30, %v91_v31 }
  0xcc   :  { %v3203_v43 = vcombine.high %v107_v38, %v123_v39  ;;  %v267_v28 = vld [vmem:[%s4415_s3 + $0x778] sm:$0xff] }
  0xcd   :  { %v283_v29 = vld [vmem:[%s4415_s3 + $0x7f8] sm:$0xff] }
  0xce   :  { %2062 = vmatpush1.bf16.msra.mxu0 %v3196_v46  ;;  %2103 = vmatpush1.bf16.msra.mxu1 %v3198_v47  ;;  %v139_v46 = vld [vmem:[%s4415_s3 + $0x378] sm:$0xff] }
  0xcf   :  { %2063 = vmatprep.subr.bf16.mxu0 %v3229_v48  ;;  %2104 = vmatprep.subr.bf16.mxu1 %v3231_v49  ;;  %v155_v47 = vld [vmem:[%s4415_s3 + $0x3f8] sm:$0xff]  ;;  %v3200_v48 = vcombine.low %v106_v36, %v122_v37  ;;  %v3202_v49 = vcombine.low %v107_v38, %v123_v39 }
  0xd0   :  { %v3235_v51 = vcombine.high %v139_v46, %v155_v47 }
  0xd2   :  { %2064 = vmatpush1.bf16.msra.mxu0 %v3228_v54  ;;  %2105 = vmatpush1.bf16.msra.mxu1 %v3230_v55  ;;  %v187_v54 = vld [vmem:[%s4415_s3 + $0x4f8] sm:$0xff]  ;;  %v3232_v55 = vcombine.low %v138_v44, %v154_v45  ;;  %v3363_v45 = vcombine.high %v267_v28, %v283_v29 }
  0xd3   :  { %2065 = vmatprep.subr.bf16.mxu0 %v3261_v56  ;;  %2106 = vmatprep.subr.bf16.mxu1 %v3263_v57  ;;  %v3234_v56 = vcombine.low %v139_v46, %v155_v47  ;;  %v3265_v57 = vcombine.high %v170_v52, %v186_v53 }
  0xd6   :  { %2066 = vmatpush1.bf16.msra.mxu0 %v3260_v62  ;;  %2107 = vmatpush1.bf16.msra.mxu1 %v3262_v63  ;;  %v202_v62 = vld [vmem:[%s4415_s3 + $0x570] sm:$0xff] }
  0xd7   :  { %2067 = vmatprep.subr.bf16.mxu0 %v3293_v0  ;;  %2108 = vmatprep.subr.bf16.mxu1 %v3295_v1  ;;  %v218_v63 = vld [vmem:[%s4415_s3 + $0x5f0] sm:$0xff]  ;;  %v203_v0 = vld [vmem:[%s4415_s3 + $0x578] sm:$0xff] }
  0xd8   :  { %v219_v1 = vld [vmem:[%s4415_s3 + $0x5f8] sm:$0xff]  ;;  %v3297_v5 = vcombine.high %v202_v62, %v218_v63  ;;  %v3296_v13 = vcombine.low %v202_v62, %v218_v63 }
  0xda   :  { %2068 = vmatpush1.bf16.msra.mxu0 %v3292_v7  ;;  %2109 = vmatpush1.bf16.msra.mxu1 %v3294_v8  ;;  %v2293_v7 = vshrl.u32 %v2292_v61, 7  ;;  %v3299_v8 = vcombine.high %v203_v0, %v219_v1 }
  0xdb   :  { %2069 = vmatprep.subr.bf16.mxu0 %v3325_v9  ;;  %2110 = vmatprep.subr.bf16.mxu1 %v3327_v10  ;;  %v234_v9 = vld [vmem:[%s4415_s3 + $0x670] sm:$0xff] }
  0xdc   :  { %v250_v10 = vld [vmem:[%s4415_s3 + $0x6f0] sm:$0xff]  ;;  %v4222_v20 = vsub.s32 %v2291_v6, %v2293_v7 }
  0xde   :  { %2070 = vmatpush1.bf16.msra.mxu0 %v3324_v15  ;;  %2111 = vmatpush1.bf16.msra.mxu1 %v3326_v16  ;;  %v282_v15 = vld [vmem:[%s4415_s3 + $0x7f0] sm:$0xff]  ;;  %v3298_v16 = vcombine.low %v203_v0, %v219_v1 }
  0xdf   :  { %2071 = vmatprep.subr.bf16.mxu0 %v3357_v18  ;;  %2112 = vmatprep.subr.bf16.mxu1 %v3359_v19  ;;  %v3329_v18 = vcombine.high %v234_v9, %v250_v10 }
  0xe2   :  { %2072 = vmatpush1.bf16.msra.mxu0 %v3356_v24  ;;  %2113 = vmatpush1.bf16.msra.mxu1 %v3358_v25  ;;  %v3328_v25 = vcombine.low %v234_v9, %v250_v10 }
  0xe3   :  { %2139 = vmatprep.subr.bf16.mxu0 %v3137_v26  ;;  %2180 = vmatprep.subr.bf16.mxu1 %v3139_v27  ;;  %v3330_v26 = vcombine.low %v235_v11, %v251_v12  ;;  %v3361_v27 = vcombine.high %v266_v14, %v282_v15 }
  0xe5   :  { %2090 = vmatmul.mubr.bf16.vlgmr.msra.gmra.mrb[24].mxu0 %v3544_v17  ;;  %2131 = vmatmul.mubr.bf16.vlgmr.msra.gmra.mrb[24].mxu1 %v3544_v17 }
  0xe6   :  { %2140 = vmatpush1.bf16.msra.mxu0 %v3136_v32  ;;  %2181 = vmatpush1.bf16.msra.mxu1 %v3138_v33 }
  0xe7   :  { %2141 = vmatprep.subr.bf16.mxu0 %v3169_v34  ;;  %2182 = vmatprep.subr.bf16.mxu1 %v3171_v35 }
  0xe8   :  { %2171 = vmatprep.mubr.bf16.mxu0 %v3382_v3  ;;  %2212 = vmatprep.mubr.bf16.mxu1 %v3382_v3  ;;  %v171_v3 = vld [vmem:[%s4415_s3 + $0x478] sm:$0xff] }
  0xe9   :  { %v3267_v58 = vcombine.high %v171_v3, %v187_v54  ;;  %v3266_v4 = vcombine.low %v171_v3, %v187_v54 }
  0xea   :  { %2142 = vmatpush1.bf16.msra.mxu0 %v3168_v40  ;;  %2183 = vmatpush1.bf16.msra.mxu1 %v3170_v41 }
  0xeb   :  { %2143 = vmatprep.subr.bf16.mxu0 %v3201_v42  ;;  %2184 = vmatprep.subr.bf16.mxu1 %v3203_v43 }
  0xee   :  { %2144 = vmatpush1.bf16.msra.mxu0 %v3200_v48  ;;  %2185 = vmatpush1.bf16.msra.mxu1 %v3202_v49 }
  0xef   :  { %2145 = vmatprep.subr.bf16.mxu0 %v3233_v50  ;;  %2186 = vmatprep.subr.bf16.mxu1 %v3235_v51  ;;  %v3360_v50 = vcombine.low %v266_v14, %v282_v15  ;;  %v3362_v51 = vcombine.low %v267_v28, %v283_v29  ;;  %v2516_v28 = vld [vmem:[%s4419_s4] sm:$0xff] }
  0xf2   :  { %2146 = vmatpush1.bf16.msra.mxu0 %v3232_v55  ;;  %2187 = vmatpush1.bf16.msra.mxu1 %v3234_v56 }
  0xf3   :  { %2147 = vmatprep.subr.bf16.mxu0 %v3265_v57  ;;  %2188 = vmatprep.subr.bf16.mxu1 %v3267_v58 }
  0xf6   :  { %2148 = vmatpush1.bf16.msra.mxu0 %v3264_v2  ;;  %2189 = vmatpush1.bf16.msra.mxu1 %v3266_v4 }
  0xf7   :  { %2149 = vmatprep.subr.bf16.mxu0 %v3297_v5  ;;  %2190 = vmatprep.subr.bf16.mxu1 %v3299_v8 }
  0xf8   :  { %v1599_v19 = vpop.f32.mrb[0].mxu0  ;;  %v1640_v23 = vpop.f32.mrb[0].mxu1 }
  0xf9   :  { %v2796_v22 = vmul.f32 %v1599_v19, %v1599_v19  ;;  %v1601_v24 = vpop.f32.mrb[1].mxu0  ;;  %v2798_v30 = vmul.f32 %v1640_v23, %v1640_v23  ;;  %v1642_v34 = vpop.f32.mrb[1].mxu1 }
  0xfa   :  { %v3364_v31 = vpack.c.bf16 %v1601_v24, %v1599_v19  ;;  %v2592_v32 = vcombine.low %v1599_v19, %v1601_v24  ;;  %v2797_v33 = vmul.f32 %v1601_v24, %v1601_v24  ;;  %v1603_v35 = vpop.f32.mrb[2].mxu0  ;;  %2150 = vmatpush1.bf16.msra.mxu0 %v3296_v13  ;;  %v3365_v36 = vpack.c.bf16 %v1642_v34, %v1640_v23  ;;  %v1644_v39 = vpop.f32.mrb[2].mxu1 }
  0xfb   :  { %v2593_v37 = vcombine.low %v1640_v23, %v1642_v34  ;;  %v2799_v38 = vmul.f32 %v1642_v34, %v1642_v34  ;;  %2191 = vmatpush1.bf16.msra.mxu1 %v3298_v16  ;;  %v1604_v40 = vpop.f32.mrb[3].mxu0  ;;  %2151 = vmatprep.subr.bf16.mxu0 %v3329_v18  ;;  %v1645_v44 = vpop.f32.mrb[3].mxu1 }
  0xfc   :  { %v4231_v41 = vrot.slane %v3364_v31, %v4222_v20  ;;  %v4234_v42 = vrot.slane %v2592_v32, %v4222_v20  ;;  %v2892_v43 = vcombine.low %v2796_v22, %v2797_v33  ;;  %2192 = vmatprep.subr.bf16.mxu1 %v3331_v21  ;;  %v4237_v46 = vrot.slane %v3365_v36, %v4222_v20 }
  0xfd   :  { %v4240_v47 = vrot.slane %v2593_v37, %v4222_v20  ;;  %v2893_v48 = vcombine.low %v2798_v30, %v2799_v38 }
  0xfe   :  { %v4243_v49 = vrot.slane %v2892_v43, %v4222_v20  ;;  %2152 = vmatpush1.bf16.msra.mxu0 %v3328_v25  ;;  %v2317_v52 = vcombine.low %v4231_v41, %v4237_v46 }
  0xff   :  { %v2624_v53 = vcombine.low %v4234_v42, %v4240_v47  ;;  %v4250_v3 = vrot.slane %v2893_v48, %v4222_v20  ;;  %2193 = vmatpush1.bf16.msra.mxu1 %v3330_v26  ;;  %2153 = vmatprep.subr.bf16.mxu0 %v3361_v27 }
 0x100   :  { %2194 = vmatprep.subr.bf16.mxu1 %v3363_v45  ;;  %v2325_v22 = vrot.slane %v2317_v52, %v4222_v20 }
 0x101   :  { %v2924_v54 = vcombine.low %v4243_v49, %v4250_v3  ;;  %v2632_v23 = vrot.slane %v2624_v53, %v4222_v20 }
 0x102   :  { %2154 = vmatpush1.bf16.msra.mxu0 %v3360_v50 }
 0x103   :  { %2195 = vmatpush1.bf16.msra.mxu1 %v3362_v51  ;;  %v2932_v29 = vrot.slane %v2924_v54, %v4222_v20 }
 0x105   :  { %2172 = vmatmul.mubr.bf16.vlgmr.msra.gmra.mrb[28].mxu0 %v3544_v17 }
 0x106   :  { %2213 = vmatmul.mubr.bf16.vlgmr.msra.gmra.mrb[28].mxu1 %v3544_v17 }
 0x118   :  { %v1681_v56 = vpop.f32.mrb[4].mxu0  ;;  %v1722_v58 = vpop.f32.mrb[4].mxu1 }
 0x119   :  { %v2800_v57 = vmul.f32 %v1681_v56, %v1681_v56  ;;  %v1683_v59 = vpop.f32.mrb[5].mxu0  ;;  %v2802_v60 = vmul.f32 %v1722_v58, %v1722_v58  ;;  %v1724_v0 = vpop.f32.mrb[5].mxu1 }
 0x11a   :  { %v3366_v61 = vpack.c.bf16 %v1683_v59, %v1681_v56  ;;  %v2594_v62 = vcombine.low %v1681_v56, %v1683_v59  ;;  %v2801_v63 = vmul.f32 %v1683_v59, %v1683_v59  ;;  %v1685_v1 = vpop.f32.mrb[6].mxu0  ;;  %v3367_v2 = vpack.c.bf16 %v1724_v0, %v1722_v58  ;;  %v1726_v7 = vpop.f32.mrb[6].mxu1 }
 0x11b   :  { %v2595_v5 = vcombine.low %v1722_v58, %v1724_v0  ;;  %v2803_v6 = vmul.f32 %v1724_v0, %v1724_v0  ;;  %v1686_v8 = vpop.f32.mrb[7].mxu0  ;;  %v1727_v12 = vpop.f32.mrb[7].mxu1 }
 0x11c   :  { %v2309_v9 = vrot.slane %v3366_v61, %v4222_v20  ;;  %v2616_v10 = vrot.slane %v2594_v62, %v4222_v20  ;;  %v2894_v11 = vcombine.low %v2800_v57, %v2801_v63  ;;  %v2316_v13 = vrot.slane %v3367_v2, %v4222_v20 }
 0x11d   :  { %v2623_v14 = vrot.slane %v2595_v5, %v4222_v20  ;;  %v2895_v15 = vcombine.low %v2802_v60, %v2803_v6 }
 0x11e   :  { %v2916_v16 = vrot.slane %v2894_v11, %v4222_v20  ;;  %v2318_v18 = vcombine.low %v2309_v9, %v2316_v13 }
 0x11f   :  { %v2625_v19 = vcombine.low %v2616_v10, %v2623_v14  ;;  %v2923_v21 = vrot.slane %v2895_v15, %v4222_v20 }
 0x120   :  { %v2332_v24 = vrot.slane %v2318_v18, %v4222_v20 }
 0x121   :  { %v2639_v25 = vrot.slane %v2625_v19, %v4222_v20  ;;  %v2925_v26 = vcombine.low %v2916_v16, %v2923_v21 }
 0x122   :  { %v2333_v30 = vcombine.low %v2325_v22, %v2332_v24 }
 0x123   :  { %v2640_v31 = vcombine.low %v2632_v23, %v2639_v25  ;;  %v2939_v32 = vrot.slane %v2925_v26, %v4222_v20 }
 0x124   :  { %v2517_v33 = vsel %vm4296_vm14, %v2333_v30, %v2516_v28 }
 0x125   :  { %2792 = vst [vmem:[%s4420_s5] sm:$0xff] %v2640_v31  ;;  %v2940_v34 = vcombine.low %v2932_v29, %v2939_v32  ;;  %2518 = vst [vmem:[%s4419_s4] sm:$0xff] %v2517_v33  ;;  %v2519_v31 = vld [vmem:[%s4419_s4 + $0x8] sm:$0xff] }
 0x127   :  { %3092 = vst [vmem:[%s4421_s6] sm:$0xff] %v2940_v34 }
 0x138   :  { %v1763_v35 = vpop.f32.mrb[8].mxu0  ;;  %v1804_v37 = vpop.f32.mrb[8].mxu1 }
 0x139   :  { %v2804_v36 = vmul.f32 %v1763_v35, %v1763_v35  ;;  %v1765_v38 = vpop.f32.mrb[9].mxu0  ;;  %v2806_v39 = vmul.f32 %v1804_v37, %v1804_v37  ;;  %v1806_v43 = vpop.f32.mrb[9].mxu1 }
 0x13a   :  { %v3368_v40 = vpack.c.bf16 %v1765_v38, %v1763_v35  ;;  %v2641_v41 = vcombine.low %v1763_v35, %v1765_v38  ;;  %v2805_v42 = vmul.f32 %v1765_v38, %v1765_v38  ;;  %v1767_v44 = vpop.f32.mrb[10].mxu0  ;;  %v3369_v45 = vpack.c.bf16 %v1806_v43, %v1804_v37  ;;  %v1808_v48 = vpop.f32.mrb[10].mxu1 }
 0x13b   :  { %v2642_v46 = vcombine.low %v1804_v37, %v1806_v43  ;;  %v2807_v47 = vmul.f32 %v1806_v43, %v1806_v43  ;;  %v1768_v49 = vpop.f32.mrb[11].mxu0  ;;  %v1809_v53 = vpop.f32.mrb[11].mxu1 }
 0x13c   :  { %v2344_v50 = vrot.slane %v3368_v40, %v4222_v20  ;;  %v2651_v51 = vrot.slane %v2641_v41, %v4222_v20  ;;  %v2941_v52 = vcombine.low %v2804_v36, %v2805_v42  ;;  %v2351_v3 = vrot.slane %v3369_v45, %v4222_v20 }
 0x13d   :  { %v2658_v54 = vrot.slane %v2642_v46, %v4222_v20  ;;  %v2942_v55 = vcombine.low %v2806_v39, %v2807_v47 }
 0x13e   :  { %v2951_v17 = vrot.slane %v2941_v52, %v4222_v20  ;;  %v2366_v56 = vcombine.low %v2344_v50, %v2351_v3 }
 0x13f   :  { %v2673_v57 = vcombine.low %v2651_v51, %v2658_v54  ;;  %v2958_v58 = vrot.slane %v2942_v55, %v4222_v20 }
 0x140   :  { %v2374_v25 = vrot.slane %v2366_v56, %v4222_v20 }
 0x141   :  { %v2973_v59 = vcombine.low %v2951_v17, %v2958_v58  ;;  %v2681_v26 = vrot.slane %v2673_v57, %v4222_v20 }
 0x143   :  { %v2981_v32 = vrot.slane %v2973_v59, %v4222_v20 }
 0x158   :  { %v1845_v60 = vpop.f32.mrb[12].mxu0  ;;  %v1886_v62 = vpop.f32.mrb[12].mxu1 }
 0x159   :  { %v2808_v61 = vmul.f32 %v1845_v60, %v1845_v60  ;;  %v1847_v63 = vpop.f32.mrb[13].mxu0  ;;  %v2810_v0 = vmul.f32 %v1886_v62, %v1886_v62  ;;  %v1888_v5 = vpop.f32.mrb[13].mxu1 }
 0x15a   :  { %v3370_v1 = vpack.c.bf16 %v1847_v63, %v1845_v60  ;;  %v2643_v2 = vcombine.low %v1845_v60, %v1847_v63  ;;  %v2809_v4 = vmul.f32 %v1847_v63, %v1847_v63  ;;  %v1849_v6 = vpop.f32.mrb[14].mxu0  ;;  %v3371_v7 = vpack.c.bf16 %v1888_v5, %v1886_v62  ;;  %v1890_v10 = vpop.f32.mrb[14].mxu1 }
 0x15b   :  { %v2644_v8 = vcombine.low %v1886_v62, %v1888_v5  ;;  %v2811_v9 = vmul.f32 %v1888_v5, %v1888_v5  ;;  %v1850_v11 = vpop.f32.mrb[15].mxu0  ;;  %v1891_v15 = vpop.f32.mrb[15].mxu1 }
 0x15c   :  { %v2358_v12 = vrot.slane %v3370_v1, %v4222_v20  ;;  %v2665_v13 = vrot.slane %v2643_v2, %v4222_v20  ;;  %v2943_v14 = vcombine.low %v2808_v61, %v2809_v4  ;;  %v2365_v16 = vrot.slane %v3371_v7, %v4222_v20 }
 0x15d   :  { %v2672_v18 = vrot.slane %v2644_v8, %v4222_v20  ;;  %v2944_v19 = vcombine.low %v2810_v0, %v2811_v9 }
 0x15e   :  { %v2965_v21 = vrot.slane %v2943_v14, %v4222_v20  ;;  %v2367_v22 = vcombine.low %v2358_v12, %v2365_v16 }
 0x15f   :  { %v2674_v23 = vcombine.low %v2665_v13, %v2672_v18  ;;  %v2972_v24 = vrot.slane %v2944_v19, %v4222_v20 }
 0x160   :  { %v2381_v28 = vrot.slane %v2367_v22, %v4222_v20 }
 0x161   :  { %v2688_v29 = vrot.slane %v2674_v23, %v4222_v20  ;;  %v2974_v30 = vcombine.low %v2965_v21, %v2972_v24 }
 0x162   :  { %v2382_v33 = vcombine.low %v2374_v25, %v2381_v28 }
 0x163   :  { %v2689_v34 = vcombine.low %v2681_v26, %v2688_v29  ;;  %v2988_v35 = vrot.slane %v2974_v30, %v4222_v20 }
 0x164   :  { %v2520_v36 = vsel %vm4296_vm14, %v2382_v33, %v2519_v31 }
 0x165   :  { %2793 = vst [vmem:[%s4420_s5 + $0x8] sm:$0xff] %v2689_v34  ;;  %v2989_v37 = vcombine.low %v2981_v32, %v2988_v35  ;;  %2521 = vst [vmem:[%s4419_s4 + $0x8] sm:$0xff] %v2520_v36  ;;  %v2522_v34 = vld [vmem:[%s4419_s4 + $0x10] sm:$0xff] }
 0x167   :  { %3093 = vst [vmem:[%s4421_s6 + $0x8] sm:$0xff] %v2989_v37 }
 0x178   :  { %v1927_v38 = vpop.f32.mrb[16].mxu0  ;;  %v1968_v40 = vpop.f32.mrb[16].mxu1 }
 0x179   :  { %v2812_v39 = vmul.f32 %v1927_v38, %v1927_v38  ;;  %v1929_v41 = vpop.f32.mrb[17].mxu0  ;;  %v2814_v42 = vmul.f32 %v1968_v40, %v1968_v40  ;;  %v1970_v46 = vpop.f32.mrb[17].mxu1 }
 0x17a   :  { %v3372_v43 = vpack.c.bf16 %v1929_v41, %v1927_v38  ;;  %v2690_v44 = vcombine.low %v1927_v38, %v1929_v41  ;;  %v2813_v45 = vmul.f32 %v1929_v41, %v1929_v41  ;;  %v1931_v47 = vpop.f32.mrb[18].mxu0  ;;  %v3373_v48 = vpack.c.bf16 %v1970_v46, %v1968_v40  ;;  %v1972_v51 = vpop.f32.mrb[18].mxu1 }
 0x17b   :  { %v2691_v49 = vcombine.low %v1968_v40, %v1970_v46  ;;  %v2815_v50 = vmul.f32 %v1970_v46, %v1970_v46  ;;  %v1932_v52 = vpop.f32.mrb[19].mxu0  ;;  %v1973_v55 = vpop.f32.mrb[19].mxu1 }
 0x17c   :  { %v2393_v53 = vrot.slane %v3372_v43, %v4222_v20  ;;  %v2700_v3 = vrot.slane %v2690_v44, %v4222_v20  ;;  %v2990_v54 = vcombine.low %v2812_v39, %v2813_v45  ;;  %v2400_v17 = vrot.slane %v3373_v48, %v4222_v20 }
 0x17d   :  { %v2707_v56 = vrot.slane %v2691_v49, %v4222_v20  ;;  %v2991_v57 = vcombine.low %v2814_v42, %v2815_v50 }
 0x17e   :  { %v3000_v58 = vrot.slane %v2990_v54, %v4222_v20  ;;  %v2415_v59 = vcombine.low %v2393_v53, %v2400_v17 }
 0x17f   :  { %v2722_v60 = vcombine.low %v2700_v3, %v2707_v56  ;;  %v3007_v61 = vrot.slane %v2991_v57, %v4222_v20 }
 0x180   :  { %v2423_v29 = vrot.slane %v2415_v59, %v4222_v20 }
 0x181   :  { %v3022_v62 = vcombine.low %v3000_v58, %v3007_v61  ;;  %v2730_v30 = vrot.slane %v2722_v60, %v4222_v20 }
 0x183   :  { %v3030_v35 = vrot.slane %v3022_v62, %v4222_v20 }
 0x198   :  { %v2009_v63 = vpop.f32.mrb[20].mxu0  ;;  %v2050_v1 = vpop.f32.mrb[20].mxu1 }
 0x199   :  { %v2816_v0 = vmul.f32 %v2009_v63, %v2009_v63  ;;  %v2011_v2 = vpop.f32.mrb[21].mxu0  ;;  %v2818_v4 = vmul.f32 %v2050_v1, %v2050_v1  ;;  %v2052_v8 = vpop.f32.mrb[21].mxu1 }
 0x19a   :  { %v3374_v5 = vpack.c.bf16 %v2011_v2, %v2009_v63  ;;  %v2692_v6 = vcombine.low %v2009_v63, %v2011_v2  ;;  %v2817_v7 = vmul.f32 %v2011_v2, %v2011_v2  ;;  %v2013_v9 = vpop.f32.mrb[22].mxu0  ;;  %v3375_v10 = vpack.c.bf16 %v2052_v8, %v2050_v1  ;;  %v2054_v13 = vpop.f32.mrb[22].mxu1 }
 0x19b   :  { %v2693_v11 = vcombine.low %v2050_v1, %v2052_v8  ;;  %v2819_v12 = vmul.f32 %v2052_v8, %v2052_v8  ;;  %v2014_v14 = vpop.f32.mrb[23].mxu0  ;;  %v2055_v19 = vpop.f32.mrb[23].mxu1 }
 0x19c   :  { %v2407_v15 = vrot.slane %v3374_v5, %v4222_v20  ;;  %v2714_v16 = vrot.slane %v2692_v6, %v4222_v20  ;;  %v2992_v18 = vcombine.low %v2816_v0, %v2817_v7  ;;  %v2414_v21 = vrot.slane %v3375_v10, %v4222_v20 }
 0x19d   :  { %v2721_v22 = vrot.slane %v2693_v11, %v4222_v20  ;;  %v2993_v23 = vcombine.low %v2818_v4, %v2819_v12 }
 0x19e   :  { %v3014_v24 = vrot.slane %v2992_v18, %v4222_v20  ;;  %v2416_v25 = vcombine.low %v2407_v15, %v2414_v21 }
 0x19f   :  { %v2723_v26 = vcombine.low %v2714_v16, %v2721_v22  ;;  %v3021_v28 = vrot.slane %v2993_v23, %v4222_v20 }
 0x1a0   :  { %v2430_v31 = vrot.slane %v2416_v25, %v4222_v20 }
 0x1a1   :  { %v2737_v32 = vrot.slane %v2723_v26, %v4222_v20  ;;  %v3023_v33 = vcombine.low %v3014_v24, %v3021_v28 }
 0x1a2   :  { %v2431_v36 = vcombine.low %v2423_v29, %v2430_v31 }
 0x1a3   :  { %v2738_v37 = vcombine.low %v2730_v30, %v2737_v32  ;;  %v3037_v38 = vrot.slane %v3023_v33, %v4222_v20 }
 0x1a4   :  { %v2523_v39 = vsel %vm4296_vm14, %v2431_v36, %v2522_v34 }
 0x1a5   :  { %2794 = vst [vmem:[%s4420_s5 + $0x10] sm:$0xff] %v2738_v37  ;;  %v3038_v40 = vcombine.low %v3030_v35, %v3037_v38  ;;  %2524 = vst [vmem:[%s4419_s4 + $0x10] sm:$0xff] %v2523_v39  ;;  %v2525_v37 = vld [vmem:[%s4419_s4 + $0x18] sm:$0xff] }
 0x1a7   :  { %3094 = vst [vmem:[%s4421_s6 + $0x10] sm:$0xff] %v3038_v40 }
 0x1b8   :  { %v2091_v41 = vpop.f32.mrb[24].mxu0  ;;  %v2132_v43 = vpop.f32.mrb[24].mxu1 }
 0x1b9   :  { %v2820_v42 = vmul.f32 %v2091_v41, %v2091_v41  ;;  %v2093_v44 = vpop.f32.mrb[25].mxu0  ;;  %v2822_v45 = vmul.f32 %v2132_v43, %v2132_v43  ;;  %v2134_v49 = vpop.f32.mrb[25].mxu1 }
 0x1ba   :  { %v3376_v46 = vpack.c.bf16 %v2093_v44, %v2091_v41  ;;  %v2739_v47 = vcombine.low %v2091_v41, %v2093_v44  ;;  %v2821_v48 = vmul.f32 %v2093_v44, %v2093_v44  ;;  %v2095_v50 = vpop.f32.mrb[26].mxu0  ;;  %v3377_v51 = vpack.c.bf16 %v2134_v49, %v2132_v43  ;;  %v2136_v3 = vpop.f32.mrb[26].mxu1 }
 0x1bb   :  { %v2740_v52 = vcombine.low %v2132_v43, %v2134_v49  ;;  %v2823_v53 = vmul.f32 %v2134_v49, %v2134_v49  ;;  %v2096_v54 = vpop.f32.mrb[27].mxu0  ;;  %v2137_v57 = vpop.f32.mrb[27].mxu1 }
 0x1bc   :  { %v2442_v55 = vrot.slane %v3376_v46, %v4222_v20  ;;  %v2749_v17 = vrot.slane %v2739_v47, %v4222_v20  ;;  %v3039_v56 = vcombine.low %v2820_v42, %v2821_v48  ;;  %v2449_v58 = vrot.slane %v3377_v51, %v4222_v20 }
 0x1bd   :  { %v2756_v59 = vrot.slane %v2740_v52, %v4222_v20  ;;  %v3040_v60 = vcombine.low %v2822_v45, %v2823_v53 }
 0x1be   :  { %v3049_v61 = vrot.slane %v3039_v56, %v4222_v20  ;;  %v2464_v62 = vcombine.low %v2442_v55, %v2449_v58 }
 0x1bf   :  { %v2771_v63 = vcombine.low %v2749_v17, %v2756_v59  ;;  %v3056_v0 = vrot.slane %v3040_v60, %v4222_v20 }
 0x1c0   :  { %v2472_v32 = vrot.slane %v2464_v62, %v4222_v20 }
 0x1c1   :  { %v3071_v1 = vcombine.low %v3049_v61, %v3056_v0  ;;  %v2779_v33 = vrot.slane %v2771_v63, %v4222_v20 }
 0x1c3   :  { %v3079_v38 = vrot.slane %v3071_v1, %v4222_v20 }
 0x1d8   :  { %v2173_v2 = vpop.f32.mrb[28].mxu0 }
 0x1d9   :  { %v2824_v4 = vmul.f32 %v2173_v2, %v2173_v2  ;;  %v2214_v5 = vpop.f32.mrb[28].mxu1  ;;  %v2175_v6 = vpop.f32.mrb[29].mxu0 }
 0x1da   :  { %v2826_v7 = vmul.f32 %v2214_v5, %v2214_v5  ;;  %v3378_v8 = vpack.c.bf16 %v2175_v6, %v2173_v2  ;;  %v2741_v9 = vcombine.low %v2173_v2, %v2175_v6  ;;  %v2825_v10 = vmul.f32 %v2175_v6, %v2175_v6  ;;  %v2216_v11 = vpop.f32.mrb[29].mxu1  ;;  %v2177_v12 = vpop.f32.mrb[30].mxu0 }
 0x1db   :  { %v3379_v13 = vpack.c.bf16 %v2216_v11, %v2214_v5  ;;  %v2742_v14 = vcombine.low %v2214_v5, %v2216_v11  ;;  %v2827_v15 = vmul.f32 %v2216_v11, %v2216_v11  ;;  %v2218_v16 = vpop.f32.mrb[30].mxu1  ;;  %v2178_v18 = vpop.f32.mrb[31].mxu0 }
 0x1dc   :  { %v2456_v19 = vrot.slane %v3378_v8, %v4222_v20  ;;  %v2763_v21 = vrot.slane %v2741_v9, %v4222_v20  ;;  %v3041_v22 = vcombine.low %v2824_v4, %v2825_v10  ;;  %v2219_v23 = vpop.f32.mrb[31].mxu1 }
 0x1dd   :  { %v2463_v24 = vrot.slane %v3379_v13, %v4222_v20  ;;  %v2770_v25 = vrot.slane %v2742_v14, %v4222_v20  ;;  %v3042_v26 = vcombine.low %v2826_v7, %v2827_v15 }
 0x1de   :  { %v3063_v28 = vrot.slane %v3041_v22, %v4222_v20 }
 0x1df   :  { %v2465_v29 = vcombine.low %v2456_v19, %v2463_v24  ;;  %v2772_v30 = vcombine.low %v2763_v21, %v2770_v25  ;;  %v3070_v31 = vrot.slane %v3042_v26, %v4222_v20 }
 0x1e1   :  { %v2479_v34 = vrot.slane %v2465_v29, %v4222_v20  ;;  %v2786_v35 = vrot.slane %v2772_v30, %v4222_v20  ;;  %v3072_v36 = vcombine.low %v3063_v28, %v3070_v31 }
 0x1e3   :  { %v2480_v39 = vcombine.low %v2472_v32, %v2479_v34  ;;  %v2787_v40 = vcombine.low %v2779_v33, %v2786_v35  ;;  %v3086_v41 = vrot.slane %v3072_v36, %v4222_v20 }
 0x1e5   :  { %v2526_v42 = vsel %vm4296_vm14, %v2480_v39, %v2525_v37  ;;  %2795 = vst [vmem:[%s4420_s5 + $0x18] sm:$0xff] %v2787_v40  ;;  %v3087_v43 = vcombine.low %v3079_v38, %v3086_v41 }
 0x1e6   :  { %2527 = vst [vmem:[%s4419_s4 + $0x18] sm:$0xff] %v2526_v42 }
 0x1e7   :  { %3095 = vst [vmem:[%s4421_s6 + $0x18] sm:$0xff] %v3087_v43 }

// kernel: autoencoder_forward.12
= control target key start
LH: loop header
LB: loop body
LE: loop exit
PB: predicated region body
PF: predicated region fallthrough
CT: control target
= control target key end

     0   :  { %v29_v20 = vlaneseq  ;;  %vm817_vm0 = vcmask 1043456   ;;  %s1333_s3 = inlined_call_operand.vmem [shape: bf16[1024,128], index: 3, kind: input, shape index: {}]   ;;  %s1334_s0 = inlined_call_operand.vmem [shape: bf16[4,1024], index: 0, kind: input, shape index: {}]   ;;  %s1335_s1 = inlined_call_operand.vmem [shape: f32[1,1024], index: 1, kind: input, shape index: {}]   ;;  %s1336_s2 = inlined_call_operand.vmem [shape: f32[1,1024], index: 2, kind: input, shape index: {}]   ;;  %s1337_s4 = inlined_call_operand.vmem [shape: bf16[4,128], index: 4, kind: output, shape index: {0}]   ;;  %s1338_s5 = inlined_call_operand.vmem [shape: f32[1,1,128], index: 5, kind: output, shape index: {1}]   ;;  %s1339_s6 = inlined_call_operand.vmem [shape: f32[1,1,128], index: 6, kind: output, shape index: {2}]  }
   0x1   :  { %v999_v0 = vld [vmem:[%s1333_s3 + $0x40] sm:$0xff]   ;;  %v1003_v4 = vld [vmem:[%s1333_s3 + $0x48] sm:$0xff]   ;;  %v1007_v8 = vld [vmem:[%s1333_s3 + $0x50] sm:$0xff]  }
   0x2   :  { %v1000_v1 = vld [vmem:[%s1333_s3 + $0xc0] sm:$0xff]   ;;  %911 = vmatprep.subr.bf16.mxu0 %v999_v0  ;;  %v1004_v5 = vld [vmem:[%s1333_s3 + $0xc8] sm:$0xff]   ;;  %v1008_v9 = vld [vmem:[%s1333_s3 + $0xd0] sm:$0xff]   ;;  %v1170_v25 = vshrl.u32 %v29_v20, 7 }
   0x3   :  { %v1001_v2 = vld [vmem:[%s1333_s3] sm:$0xff]   ;;  %933 = vmatprep.subr.bf16.mxu1 %v1000_v1  ;;  %v1005_v6 = vld [vmem:[%s1333_s3 + $0x8] sm:$0xff]   ;;  %v1009_v10 = vld [vmem:[%s1333_s3 + $0x10] sm:$0xff]  }
   0x4   :  { %v1002_v3 = vld [vmem:[%s1333_s3 + $0x80] sm:$0xff]   ;;  %912 = vmatpush3.bf16.msra.mxu0 %v1001_v2  ;;  %v1006_v7 = vld [vmem:[%s1333_s3 + $0x88] sm:$0xff]   ;;  %v1010_v11 = vld [vmem:[%s1333_s3 + $0x90] sm:$0xff]   ;;  %v31_v30 = vsub.s32 0, %v1170_v25  ;;  %v35_v32 = vsub.s32 1, %v1170_v25  ;;  %v39_v34 = vsub.s32 2, %v1170_v25 }
   0x5   :  { %934 = vmatpush3.bf16.msra.mxu1 %v1002_v3  ;;  %913 = vmatprep.subr.bf16.mxu0 %v1003_v4  ;;  %v1011_v12 = vld [vmem:[%s1333_s3 + $0x58] sm:$0xff]   ;;  %v1015_v16 = vld [vmem:[%s1333_s3 + $0x60] sm:$0xff]   ;;  %v1019_v21 = vld [vmem:[%s1333_s3 + $0x68] sm:$0xff]   ;;  %v43_v36 = vsub.s32 3, %v1170_v25  ;;  %v47_v38 = vsub.s32 4, %v1170_v25  ;;  %v51_v42 = vsub.s32 5, %v1170_v25 }
   0x6   :  { %935 = vmatprep.subr.bf16.mxu1 %v1004_v5  ;;  %v1012_v13 = vld [vmem:[%s1333_s3 + $0xd8] sm:$0xff]   ;;  %v1016_v17 = vld [vmem:[%s1333_s3 + $0xe0] sm:$0xff]   ;;  %v1020_v22 = vld [vmem:[%s1333_s3 + $0xe8] sm:$0xff]   ;;  %v55_v43 = vsub.s32 6, %v1170_v25  ;;  %v59_v44 = vsub.s32 7, %v1170_v25 }
   0x7   :  { %v1013_v14 = vld [vmem:[%s1333_s3 + $0x18] sm:$0xff]   ;;  %v1017_v18 = vld [vmem:[%s1333_s3 + $0x20] sm:$0xff]   ;;  %v1021_v23 = vld [vmem:[%s1333_s3 + $0x28] sm:$0xff]  }
   0x8   :  { %914 = vmatpush3.bf16.msra.mxu0 %v1005_v6  ;;  %v1014_v15 = vld [vmem:[%s1333_s3 + $0x98] sm:$0xff]   ;;  %v1018_v19 = vld [vmem:[%s1333_s3 + $0xa0] sm:$0xff]   ;;  %v1022_v24 = vld [vmem:[%s1333_s3 + $0xa8] sm:$0xff]  }
   0x9   :  { %936 = vmatpush3.bf16.msra.mxu1 %v1006_v7  ;;  %915 = vmatprep.subr.bf16.mxu0 %v1007_v8  ;;  %v1023_v26 = vld [vmem:[%s1333_s3 + $0x70] sm:$0xff]   ;;  %v1027_v31 = vld [vmem:[%s1333_s3 + $0x78] sm:$0xff]   ;;  %v21_v39 = vld [vmem:[%s1334_s0] sm:$0xff] }
   0xa   :  { %937 = vmatprep.subr.bf16.mxu1 %v1008_v9  ;;  %v1024_v27 = vld [vmem:[%s1333_s3 + $0xf0] sm:$0xff]   ;;  %v1028_v33 = vld [vmem:[%s1333_s3 + $0xf8] sm:$0xff]   ;;  %v22_v40 = vld [vmem:[%s1334_s0 + $0x8] sm:$0xff]  ;;  %v23_v45 = vunpack.c.l.bf16 %v21_v39  ;;  %v24_v49 = vunpack.c.h.bf16 %v21_v39 }
   0xb   :  { %v1025_v28 = vld [vmem:[%s1333_s3 + $0x30] sm:$0xff]   ;;  %v1029_v35 = vld [vmem:[%s1333_s3 + $0x38] sm:$0xff]   ;;  %v27_v41 = vld [vmem:[%s1335_s1] sm:$0xff]  ;;  %v25_v59 = vunpack.c.l.bf16 %v22_v40  ;;  %v26_v6 = vunpack.c.h.bf16 %v22_v40 }
   0xc   :  { %916 = vmatpush3.bf16.msra.mxu0 %v1009_v10  ;;  %v1026_v29 = vld [vmem:[%s1333_s3 + $0xb0] sm:$0xff]   ;;  %v1030_v37 = vld [vmem:[%s1333_s3 + $0xb8] sm:$0xff]   ;;  %v32_v46 = vrot.slane %v27_v41, %v31_v30  ;;  %v36_v47 = vrot.slane %v27_v41, %v35_v32  ;;  %v73_v48 = vld [vmem:[%s1336_s2] sm:$0xff]  ;;  %v40_v52 = vrot.slane %v27_v41, %v39_v34  ;;  %v44_v53 = vrot.slane %v27_v41, %v43_v36 }
   0xd   :  { %938 = vmatpush3.bf16.msra.mxu1 %v1010_v11  ;;  %917 = vmatprep.subr.bf16.mxu0 %v1011_v12  ;;  %v78_v50 = vrot.slane %v73_v48, %v31_v30  ;;  %v82_v51 = vrot.slane %v73_v48, %v35_v32  ;;  %v1031_v54 = vld [vmem:[%s1333_s3 + $0x140] sm:$0xff]   ;;  %v86_v56 = vrot.slane %v73_v48, %v39_v34  ;;  %v1039_v39 = vld [vmem:[%s1333_s3 + $0x150] sm:$0xff]  }
   0xe   :  { %939 = vmatprep.subr.bf16.mxu1 %v1012_v13  ;;  %v61_v55 = vcombine.low %v32_v46, %v36_v47  ;;  %v90_v57 = vrot.slane %v73_v48, %v43_v36  ;;  %v1032_v58 = vld [vmem:[%s1333_s3 + $0x1c0] sm:$0xff]   ;;  %v62_v61 = vcombine.low %v40_v52, %v44_v53  ;;  %v48_v62 = vrot.slane %v27_v41, %v47_v38  ;;  %v1040_v40 = vld [vmem:[%s1333_s3 + $0x1d0] sm:$0xff]   ;;  %v1045_v46 = vld [vmem:[%s1333_s3 + $0x118] sm:$0xff]  }
   0xf   :  { %v107_v60 = vcombine.low %v78_v50, %v82_v51  ;;  %v52_v63 = vrot.slane %v27_v41, %v51_v42  ;;  %v94_v2 = vrot.slane %v73_v48, %v47_v38  ;;  %v98_v3 = vrot.slane %v73_v48, %v51_v42  ;;  %v1041_v42 = vld [vmem:[%s1333_s3 + $0x110] sm:$0xff]   ;;  %v1046_v47 = vld [vmem:[%s1333_s3 + $0x198] sm:$0xff]   ;;  %v1049_v50 = vld [vmem:[%s1333_s3 + $0x120] sm:$0xff]  }
  0x10   :  { %918 = vmatpush3.bf16.msra.mxu0 %v1013_v14  ;;  %v69_v0 = vmul.f32 %v61_v55, %v23_v45  ;;  %v108_v1 = vcombine.low %v86_v56, %v90_v57  ;;  %v70_v4 = vmul.f32 %v62_v61, %v24_v49  ;;  %v56_v7 = vrot.slane %v27_v41, %v55_v43  ;;  %v1044_v45 = vld [vmem:[%s1333_s3 + $0x1d8] sm:$0xff]   ;;  %v1048_v49 = vld [vmem:[%s1333_s3 + $0x1e0] sm:$0xff]   ;;  %v1051_v52 = vld [vmem:[%s1333_s3 + $0x168] sm:$0xff]  }
  0x11   :  { %940 = vmatpush3.bf16.msra.mxu1 %v1014_v15  ;;  %919 = vmatprep.subr.bf16.mxu0 %v1015_v16  ;;  %v63_v5 = vcombine.low %v48_v62, %v52_v63  ;;  %v109_v9 = vcombine.low %v94_v2, %v98_v3  ;;  %v60_v10 = vrot.slane %v27_v41, %v59_v44  ;;  %v1050_v51 = vld [vmem:[%s1333_s3 + $0x1a0] sm:$0xff]   ;;  %v1052_v53 = vld [vmem:[%s1333_s3 + $0x1e8] sm:$0xff]   ;;  %v1055_v56 = vld [vmem:[%s1333_s3 + $0x170] sm:$0xff]  }
  0x12   :  { %941 = vmatprep.subr.bf16.mxu1 %v1016_v17  ;;  %v115_v8 = vadd.f32 %v107_v60, %v69_v0  ;;  %v102_v11 = vrot.slane %v73_v48, %v55_v43  ;;  %v116_v12 = vadd.f32 %v108_v1, %v70_v4  ;;  %v106_v14 = vrot.slane %v73_v48, %v59_v44  ;;  %v1042_v43 = vld [vmem:[%s1333_s3 + $0x190] sm:$0xff]   ;;  %v1043_v44 = vld [vmem:[%s1333_s3 + $0x158] sm:$0xff]   ;;  %v1047_v48 = vld [vmem:[%s1333_s3 + $0x160] sm:$0xff]  }
  0x13   :  { %v71_v13 = vmul.f32 %v63_v5, %v25_v59  ;;  %v64_v16 = vcombine.low %v56_v7, %v60_v10  ;;  %v1054_v55 = vld [vmem:[%s1333_s3 + $0x1a8] sm:$0xff]   ;;  %v1056_v57 = vld [vmem:[%s1333_s3 + $0x1f0] sm:$0xff]   ;;  %v1059_v60 = vld [vmem:[%s1333_s3 + $0x178] sm:$0xff]  }
  0x14   :  { %920 = vmatpush3.bf16.msra.mxu0 %v1017_v18  ;;  %v119_v15 = vmax.f32 %v115_v8, 0.0  ;;  %v120_v17 = vmax.f32 %v116_v12, 0.0  ;;  %v1058_v59 = vld [vmem:[%s1333_s3 + $0x1b0] sm:$0xff]   ;;  %v1060_v61 = vld [vmem:[%s1333_s3 + $0x1f8] sm:$0xff]  }
  0x15   :  { %942 = vmatpush3.bf16.msra.mxu1 %v1018_v19  ;;  %921 = vmatprep.subr.bf16.mxu0 %v1019_v21  ;;  %v117_v18 = vadd.f32 %v109_v9, %v71_v13  ;;  %v110_v19 = vcombine.low %v102_v11, %v106_v14  ;;  %v72_v21 = vmul.f32 %v64_v16, %v26_v6  ;;  %v1061_v62 = vld [vmem:[%s1333_s3 + $0x138] sm:$0xff]  }
  0x16   :  { %943 = vmatprep.subr.bf16.mxu1 %v1020_v22  ;;  %v255_v20 = vcombine.high %v119_v15, %v119_v15  ;;  %v256_v22 = vcombine.high %v120_v17, %v120_v17  ;;  %v1062_v63 = vld [vmem:[%s1333_s3 + $0x1b8] sm:$0xff]  }
  0x17   :  { %v1225_v25 = vmax.f32 %v117_v18, 0.0 }
  0x18   :  { %922 = vmatpush3.bf16.msra.mxu0 %v1021_v23  ;;  %v263_v23 = vpack.c.bf16 %v119_v15, %v119_v15  ;;  %v266_v30 = vpack.c.bf16 %v256_v22, %v256_v22 }
  0x19   :  { %944 = vmatpush3.bf16.msra.mxu1 %v1022_v24  ;;  %923 = vmatprep.subr.bf16.mxu0 %v1023_v26  ;;  %v1033_v24 = vld [vmem:[%s1333_s3 + $0x100] sm:$0xff]   ;;  %v264_v26 = vpack.c.bf16 %v255_v20, %v255_v20  ;;  %v257_v32 = vcombine.high %v1225_v25, %v1225_v25  ;;  %v267_v0 = vpack.c.bf16 %v1225_v25, %v1225_v25 }
  0x1a   :  { %945 = vmatprep.subr.bf16.mxu1 %v1024_v27  ;;  %v265_v27 = vpack.c.bf16 %v120_v17, %v120_v17  ;;  %727 = vmatprep.mubr.bf16.mxu1 %v266_v30 }
  0x1b   :  { %687 = vmatprep.mubr.bf16.mxu0 %v264_v26  ;;  %v268_v36 = vpack.c.bf16 %v257_v32, %v257_v32 }
  0x1c   :  { %924 = vmatpush3.bf16.msra.mxu0 %v1025_v28  ;;  %v1034_v28 = vld [vmem:[%s1333_s3 + $0x180] sm:$0xff]  }
  0x1d   :  { %946 = vmatpush3.bf16.msra.mxu1 %v1026_v29  ;;  %925 = vmatprep.subr.bf16.mxu0 %v1027_v31  ;;  %v118_v29 = vadd.f32 %v110_v19, %v72_v21  ;;  %v1035_v31 = vld [vmem:[%s1333_s3 + $0x148] sm:$0xff]  }
  0x1e   :  { %947 = vmatprep.subr.bf16.mxu1 %v1028_v33  ;;  %v1036_v33 = vld [vmem:[%s1333_s3 + $0x1c8] sm:$0xff]  }
  0x1f   :  { %v1238_v34 = vmax.f32 %v118_v29, 0.0 }
  0x20   :  { %926 = vmatpush3.bf16.msra.mxu0 %v1029_v35  ;;  %v1037_v35 = vld [vmem:[%s1333_s3 + $0x108] sm:$0xff]  }
  0x21   :  { %948 = vmatpush3.bf16.msra.mxu1 %v1030_v37  ;;  %955 = vmatprep.subr.bf16.mxu0 %v1031_v54  ;;  %v1038_v37 = vld [vmem:[%s1333_s3 + $0x188] sm:$0xff]   ;;  %v258_v38 = vcombine.high %v1238_v34, %v1238_v34  ;;  %v269_v1 = vpack.c.bf16 %v1238_v34, %v1238_v34 }
  0x22   :  { %977 = vmatprep.subr.bf16.mxu1 %v1032_v58  ;;  %v1053_v54 = vld [vmem:[%s1333_s3 + $0x128] sm:$0xff]   ;;  %v1057_v58 = vld [vmem:[%s1333_s3 + $0x130] sm:$0xff]  }
  0x23   :  { %688 = vmatmul.mubr.bf16.vlgmr.msra.gmra.mrb[0].mxu0 %v263_v23  ;;  %v270_v41 = vpack.c.bf16 %v258_v38, %v258_v38 }
  0x24   :  { %728 = vmatmul.mubr.bf16.vlgmr.msra.gmra.mrb[0].mxu1 %v265_v27  ;;  %956 = vmatpush3.bf16.msra.mxu0 %v1033_v24 }
  0x25   :  { %978 = vmatpush3.bf16.msra.mxu1 %v1034_v28  ;;  %957 = vmatprep.subr.bf16.mxu0 %v1035_v31 }
  0x26   :  { %979 = vmatprep.subr.bf16.mxu1 %v1036_v33  ;;  %767 = vmatprep.mubr.bf16.mxu0 %v268_v36 }
  0x27   :  { %807 = vmatprep.mubr.bf16.mxu1 %v270_v41 }
  0x28   :  { %958 = vmatpush3.bf16.msra.mxu0 %v1037_v35 }
  0x29   :  { %980 = vmatpush3.bf16.msra.mxu1 %v1038_v37  ;;  %959 = vmatprep.subr.bf16.mxu0 %v1039_v39 }
  0x2a   :  { %981 = vmatprep.subr.bf16.mxu1 %v1040_v40 }
  0x2c   :  { %960 = vmatpush3.bf16.msra.mxu0 %v1041_v42 }
  0x2d   :  { %982 = vmatpush3.bf16.msra.mxu1 %v1042_v43  ;;  %961 = vmatprep.subr.bf16.mxu0 %v1043_v44 }
  0x2e   :  { %983 = vmatprep.subr.bf16.mxu1 %v1044_v45 }
  0x30   :  { %962 = vmatpush3.bf16.msra.mxu0 %v1045_v46 }
  0x31   :  { %984 = vmatpush3.bf16.msra.mxu1 %v1046_v47  ;;  %963 = vmatprep.subr.bf16.mxu0 %v1047_v48 }
  0x32   :  { %985 = vmatprep.subr.bf16.mxu1 %v1048_v49 }
  0x34   :  { %964 = vmatpush3.bf16.msra.mxu0 %v1049_v50 }
  0x35   :  { %986 = vmatpush3.bf16.msra.mxu1 %v1050_v51  ;;  %965 = vmatprep.subr.bf16.mxu0 %v1051_v52 }
  0x36   :  { %987 = vmatprep.subr.bf16.mxu1 %v1052_v53 }
  0x38   :  { %966 = vmatpush3.bf16.msra.mxu0 %v1053_v54 }
  0x39   :  { %988 = vmatpush3.bf16.msra.mxu1 %v1054_v55  ;;  %967 = vmatprep.subr.bf16.mxu0 %v1055_v56 }
  0x3a   :  { %989 = vmatprep.subr.bf16.mxu1 %v1056_v57 }
  0x3c   :  { %968 = vmatpush3.bf16.msra.mxu0 %v1057_v58 }
  0x3d   :  { %990 = vmatpush3.bf16.msra.mxu1 %v1058_v59  ;;  %969 = vmatprep.subr.bf16.mxu0 %v1059_v60 }
  0x3e   :  { %991 = vmatprep.subr.bf16.mxu1 %v1060_v61 }
  0x40   :  { %970 = vmatpush3.bf16.msra.mxu0 %v1061_v62 }
  0x41   :  { %992 = vmatpush3.bf16.msra.mxu1 %v1062_v63 }
  0x43   :  { %768 = vmatmul.mubr.bf16.vlgmr.msra.gmra.mrb[4].mxu0 %v267_v0 }
  0x44   :  { %808 = vmatmul.mubr.bf16.vlgmr.msra.gmra.mrb[4].mxu1 %v269_v1 }
  0xf6   :  { %v927_v2 = vpop.f32.mrb[0].mxu0 }
  0xf7   :  { %v949_v3 = vpop.f32.mrb[0].mxu1  ;;  %v928_v4 = vpop.f32.mrb[1].mxu0 }
  0xf8   :  { %v929_v5 = vadd.f32 %v928_v4, %v927_v2  ;;  %v950_v6 = vpop.f32.mrb[1].mxu1  ;;  %v930_v7 = vpop.f32.mrb[2].mxu0 }
  0xf9   :  { %v951_v8 = vadd.f32 %v950_v6, %v949_v3  ;;  %v952_v9 = vpop.f32.mrb[2].mxu1  ;;  %v931_v10 = vpop.f32.mrb[3].mxu0 }
  0xfa   :  { %v953_v11 = vpop.f32.mrb[3].mxu1 }
  0xfb   :  { %v730_v12 = vadd.f32 %v951_v8, %v929_v5 }
 0x116   :  { %v971_v13 = vpop.f32.mrb[4].mxu0 }
 0x117   :  { %v993_v14 = vpop.f32.mrb[4].mxu1  ;;  %v972_v15 = vpop.f32.mrb[5].mxu0 }
 0x118   :  { %v973_v16 = vadd.f32 %v972_v15, %v971_v13  ;;  %v994_v17 = vpop.f32.mrb[5].mxu1  ;;  %v974_v18 = vpop.f32.mrb[6].mxu0 }
 0x119   :  { %v995_v19 = vadd.f32 %v994_v17, %v993_v14  ;;  %v996_v20 = vpop.f32.mrb[6].mxu1  ;;  %v975_v21 = vpop.f32.mrb[7].mxu0 }
 0x11a   :  { %v770_v22 = vadd.f32 %v973_v16, %v730_v12  ;;  %v997_v23 = vpop.f32.mrb[7].mxu1 }
 0x11c   :  { %v810_v24 = vadd.f32 %v995_v19, %v770_v22 }
 0x11e   :  { %v815_v25 = vpack.c.bf16 %v810_v24, %v810_v24  ;;  %v818_v26 = vsel %vm817_vm0, %v810_v24, 0.0  ;;  %v826_v27 = vmul.f32 %v810_v24, %v810_v24 }
 0x11f   :  { %v819_v28 = vrot.slane %v818_v26, 4 }
 0x120   :  { %816 = vst [vmem:[%s1337_s4] sm:$0x3] %v815_v25  ;;  %v827_v29 = vsel %vm817_vm0, %v826_v27, 0.0 }
 0x121   :  { %v820_v30 = vadd.f32 %v819_v28, %v818_v26  ;;  %v828_v31 = vrot.slane %v827_v29, 4 }
 0x123   :  { %v821_v32 = vrot.slane %v820_v30, 2  ;;  %v829_v33 = vadd.f32 %v828_v31, %v827_v29 }
 0x125   :  { %v822_v34 = vadd.f32 %v821_v32, %v820_v30  ;;  %v830_v35 = vrot.slane %v829_v33, 2 }
 0x127   :  { %v823_v36 = vrot.slane %v822_v34, 1  ;;  %v831_v37 = vadd.f32 %v830_v35, %v829_v33 }
 0x129   :  { %v824_v38 = vadd.f32 %v823_v36, %v822_v34  ;;  %v832_v39 = vrot.slane %v831_v37, 1 }
 0x12b   :  { %825 = vst [vmem:[%s1338_s5] sm:$0x1] %v824_v38  ;;  %v833_v40 = vadd.f32 %v832_v39, %v831_v37 }
 0x12d   :  { %834 = vst [vmem:[%s1339_s6] sm:$0x1] %v833_v40 }

// kernel: autoencoder_forward.13
= control target key start
LH: loop header
LB: loop body
LE: loop exit
PB: predicated region body
PF: predicated region fallthrough
CT: control target
= control target key end

     0   :  { %v216_v1 = vmov 0   ;;  %s295_s0 = inlined_call_operand.vmem [shape: f32[1,2], index: 0, kind: input, shape index: {}]   ;;  %s296_s1 = inlined_call_operand.vmem [shape: bf16[2,16,16], index: 1, kind: input, shape index: {}]   ;;  %s297_s2 = inlined_call_operand.vmem [shape: bf16[2,16,16], index: 2, kind: input, shape index: {}]   ;;  %s298_s3 = inlined_call_operand.hbm [shape: f32[2,16,16], index: 3, kind: output, shape index: {}]  }
   0x1   :  { %v162_v0 = vld [vmem:[%s295_s0] ss:$0 sm:$0xff]  ;;  %186 = vset.pattern.permute.xlu0 %v216_v1 }
   0x2   :  { %8 = vsyncpa [#allocation3], 0  ;;  %30 = vperm.xlu0 %186, %v162_v0   ;;  %v217_v2 = vmov 1   ;;  %v179_v3 = vld [vmem:[%s296_s1 + $0x8] sm:$0xff]   ;;  %v164_v5 = vld [vmem:[%s296_s1] sm:$0xff]   ;;  %vm77_vm0 = vcmask 130048  }
   0x3   :  { %v180_v4 = vld [vmem:[%s297_s2 + $0x8] sm:$0xff]   ;;  %v172_v6 = vld [vmem:[%s297_s2] sm:$0xff]   ;;  %v170_v8 = vunpack.c.h.bf16 %v179_v3  ;;  %v165_v10 = vunpack.c.l.bf16 %v164_v5  ;;  %v166_v12 = vunpack.c.h.bf16 %v164_v5  ;;  %v169_v14 = vunpack.c.l.bf16 %v179_v3  ;;  %s218_s1 = smov [#allocation2]  }
   0x4   :  { %v178_v9 = vunpack.c.h.bf16 %v180_v4  ;;  %v173_v11 = vunpack.c.l.bf16 %v172_v6  ;;  %v174_v13 = vunpack.c.h.bf16 %v172_v6  ;;  %v177_v15 = vunpack.c.l.bf16 %v180_v4  ;;  %s151_s2 = sshll.u32 %s218_s1, 4  ;;  %s152_s2 = int_to_ptr.vmem [resolvable:$true] %s151_s2 }
   0x5   :  { %s192_s21 = scalar_lea.vmem %s152_s2, 512  ;;  %p197_p1 = scmp.lt.s32.totalorder %s152_s2, %s152_s2 }
   0x6   :  { %187 = vset.pattern.permute.xlu0 %v217_v2  ;;  %p193_p0 = scmp.ne.s32.totalorder %s152_s2, %s192_s21  ;;  %p198_p2 = scmp.lt.s32.totalorder %s192_s21, %s192_s21 }
   0x7   :  { %38 = vperm.xlu0 %187, %v162_v0  }
   0x8   :  { %p199_p3 = por %p198_p2, %p197_p1 }
   0xa   :  { %p200_p4 = pnand %p199_p3, %p193_p0 }
  0x81   :  { %v31_v7 = vpop.permute.xlu0 %30 }
  0x82   :  { %v36_v16 = vmul.f32 %v170_v8, %v31_v7  ;;  %v60_v17 = vmul.f32 %v178_v9, %v31_v7  ;;  %v33_v18 = vmul.f32 %v165_v10, %v31_v7  ;;  %v57_v19 = vmul.f32 %v173_v11, %v31_v7 }
  0x83   :  { %v34_v21 = vmul.f32 %v166_v12, %v31_v7  ;;  %v58_v22 = vmul.f32 %v174_v13, %v31_v7  ;;  %v35_v23 = vmul.f32 %v169_v14, %v31_v7  ;;  %v59_v24 = vmul.f32 %v177_v15, %v31_v7 }
  0x86   :  { %v39_v20 = vpop.permute.xlu0 %38 }
  0x87   :  { %v44_v25 = vadd.f32 %v39_v20, %v36_v16  ;;  %v64_v26 = vadd.f32 %v60_v17, %v39_v20  ;;  %v41_v27 = vadd.f32 %v39_v20, %v33_v18  ;;  %v61_v28 = vadd.f32 %v57_v19, %v39_v20 }
  0x88   :  { %v42_v29 = vadd.f32 %v39_v20, %v34_v21  ;;  %v62_v30 = vadd.f32 %v58_v22, %v39_v20  ;;  %v43_v31 = vadd.f32 %v39_v20, %v35_v23  ;;  %v63_v32 = vadd.f32 %v59_v24, %v39_v20 }
  0x89   :  { %v48_v33 = vmax.f32 %v44_v25, 0.0  ;;  %v68_v34 = vmax.f32 %v64_v26, 0.0  ;;  %v45_v35 = vmax.f32 %v41_v27, 0.0  ;;  %v65_v36 = vmax.f32 %v61_v28, 0.0 }
  0x8a   :  { %v46_v37 = vmax.f32 %v42_v29, 0.0  ;;  %v66_v38 = vmax.f32 %v62_v30, 0.0  ;;  %v47_v41 = vmax.f32 %v43_v31, 0.0  ;;  %v67_v42 = vmax.f32 %v63_v32, 0.0 }
  0x8b   :  { %v72_v39 = vadd.f32 %v68_v34, %v48_v33  ;;  %v69_v40 = vadd.f32 %v65_v36, %v45_v35 }
  0x8c   :  { %v70_v43 = vadd.f32 %v66_v38, %v46_v37  ;;  %v71_v49 = vadd.f32 %v67_v42, %v47_v41 }
  0x8d   :  { %v256_v44 = vmul.f32 0.5, %v72_v39  ;;  %v258_v45 = vmul.f32 0.5, %v69_v40 }
  0x8e   :  { %v74_v48 = vmul.f32 0.5, %v70_v43  ;;  %v265_v51 = vmul.f32 0.5, %v71_v49 }
  0x8f   :  { %v87_v46 = vsel %vm77_vm0, %v256_v44, -inf  ;;  %v78_v47 = vsel %vm77_vm0, %v258_v45, -inf  ;;  %v104_v53 = vsel %vm77_vm0, %v258_v45, inf  ;;  %v113_v56 = vsel %vm77_vm0, %v256_v44, inf }
  0x90   :  { %88 = vmax.xlane.f32.xlu0 %v87_v46  ;;  %79 = vmax.xlane.f32.xlu1 %v78_v47  ;;  %v81_v50 = vsel %vm77_vm0, %v74_v48, -inf  ;;  %v84_v52 = vsel %vm77_vm0, %v265_v51, -inf  ;;  %v107_v54 = vsel %vm77_vm0, %v74_v48, inf  ;;  %v110_v55 = vsel %vm77_vm0, %v265_v51, inf }
  0x94   :  { %82 = vmax.xlane.f32.xlu1 %v81_v50 }
  0x98   :  { %85 = vmax.xlane.f32.xlu1 %v84_v52 }
  0x9c   :  { %105 = vmin.xlane.f32.xlu1 %v104_v53 }
  0xa0   :  { %108 = vmin.xlane.f32.xlu1 %v107_v54 }
  0xa4   :  { %111 = vmin.xlane.f32.xlu1 %v110_v55 }
  0xa8   :  { %114 = vmin.xlane.f32.xlu1 %v113_v56 }
 0x11d   :  { %v80_v57 = vpop.xlane.xlu1 %79  ;;  %v89_v62 = vpop.xlane.xlu0 %88 }
 0x121   :  { %v83_v58 = vpop.xlane.xlu1 %82 }
 0x122   :  { %v90_v59 = vmax.f32 %v80_v57, %v83_v58 }
 0x124   :  { %v91_v61 = vrot.slane %v90_v59, 4 }
 0x125   :  { %v86_v60 = vpop.xlane.xlu1 %85 }
 0x126   :  { %v92_v0 = vmax.f32 %v90_v59, %v91_v61  ;;  %v97_v1 = vmax.f32 %v86_v60, %v89_v62 }
 0x128   :  { %v93_v3 = vrot.slane %v92_v0, 2  ;;  %v98_v4 = vrot.slane %v97_v1, 4 }
 0x129   :  { %v106_v63 = vpop.xlane.xlu1 %105 }
 0x12a   :  { %v94_v8 = vmax.f32 %v92_v0, %v93_v3  ;;  %v99_v9 = vmax.f32 %v97_v1, %v98_v4 }
 0x12c   :  { %v95_v13 = vrot.slane %v94_v8, 1  ;;  %v100_v14 = vrot.slane %v99_v9, 2 }
 0x12d   :  { %v109_v2 = vpop.xlane.xlu1 %108 }
 0x12e   :  { %v116_v5 = vmin.f32 %v106_v63, %v109_v2  ;;  %v96_v19 = vmax.f32 %v94_v8, %v95_v13  ;;  %v101_v20 = vmax.f32 %v99_v9, %v100_v14 }
 0x130   :  { %v117_v6 = vrot.slane %v116_v5, 4  ;;  %v102_v25 = vrot.slane %v101_v20, 1 }
 0x131   :  { %v112_v7 = vpop.xlane.xlu1 %111 }
 0x132   :  { %v118_v10 = vmin.f32 %v116_v5, %v117_v6  ;;  %v103_v28 = vmax.f32 %v101_v20, %v102_v25 }
 0x134   :  { %v119_v11 = vrot.slane %v118_v10, 2 }
 0x135   :  { %v115_v12 = vpop.xlane.xlu1 %114 }
 0x136   :  { %v120_v15 = vmin.f32 %v118_v10, %v119_v11  ;;  %v123_v16 = vmin.f32 %v112_v7, %v115_v12 }
 0x138   :  { %v121_v17 = vrot.slane %v120_v15, 1  ;;  %v124_v18 = vrot.slane %v123_v16, 4 }
 0x13a   :  { %v122_v21 = vmin.f32 %v120_v15, %v121_v17  ;;  %v125_v22 = vmin.f32 %v123_v16, %v124_v18 }
 0x13c   :  { %v130_v23 = vsub.f32 %v96_v19, %v122_v21  ;;  %v126_v24 = vrot.slane %v125_v22, 2  ;;  %v134_v31 = vsub.f32 %v258_v45, %v122_v21  ;;  %v135_v32 = vsub.f32 %v74_v48, %v122_v21 }
 0x13e   :  { %188 = vrcp.f32 %v130_v23  ;;  %v127_v26 = vmin.f32 %v125_v22, %v126_v24 }
 0x140   :  { %v128_v27 = vrot.slane %v127_v26, 1 }
 0x142   :  { %v129_v29 = vmin.f32 %v127_v26, %v128_v27 }
 0x144   :  { %v131_v30 = vsub.f32 %v103_v28, %v129_v29  ;;  %v136_v36 = vsub.f32 %v265_v51, %v129_v29  ;;  %v137_v37 = vsub.f32 %v256_v44, %v129_v29 }
 0x146   :  { %190 = vrcp.f32 %v131_v30 }
 0x148   :  { %v189_v33 = vpop.eup %188 }
 0x149   :  { %v138_v34 = vmul.f32 %v189_v33, %v134_v31  ;;  %v139_v35 = vmul.f32 %v189_v33, %v135_v32 }
 0x14b   :  { %142 = vst.msk [vmem:[#allocation2] sm:$0xff] %vm77_vm0, %v138_v34  ;;  %143 = vst.msk [vmem:[#allocation2 + $0x8] sm:$0xff] %vm77_vm0, %v139_v35 }
 0x150   :  { %v191_v38 = vpop.eup %190 }
 0x151   :  { %v140_v39 = vmul.f32 %v191_v38, %v136_v36  ;;  %v141_v40 = vmul.f32 %v191_v38, %v137_v37 }
 0x153   :  { %144 = vst.msk [vmem:[#allocation2 + $0x10] sm:$0xff] %vm77_vm0, %v140_v39  ;;  %145 = vst.msk [vmem:[#allocation2 + $0x18] sm:$0xff] %vm77_vm0, %v141_v40 }
 0x154   :  { %203 = shalt.err (!%p200_p4)
}
 0x155   :  { %s204_s24 = scalar_lea.hbm %s298_s3, 512 }
 0x156   :  { %p205_p5 = scmp.ne.s32.totalorder %s298_s3, %s204_s24  ;;  %p208_p6 = scmp.lt.u32.totalorder %s204_s24, %s298_s3 }
 0x158   :  { %p210_p7 = pnand %p208_p6, %p205_p5 }
 0x15a   :  { %213 = shalt.err (!%p210_p7)
}
 0x15b   :  { %s219_s29 = smov 128   ;;  %s220_s30 = smov 8  }
 0x15c   :  { %157 = dma.vmem_to_hbm [thread:$0]  %s152_s2, 512, %s298_s3, [#allocation3], %s219_s29, %s219_s29, %s220_s30  }
 0x15d   :  { %214 = dma.done.wait [#allocation3], 512  }
 0x15e   :  { %215 = vsyncadd [#allocation3], 4294966784 }
 0x15f   :  { %161 = vsyncpa [#allocation3], 1 }

</bundles_post_ra>
